<compile_context>
chip_gen: v5e
topology: v5e:2x2
jax: 0.10.0
libtpu: 0.0.40
codegen_flags: <defaults>
</compile_context>

<pallas_src>
import numpy as np
import jax
import jax.numpy as jnp
from jax.experimental import pallas as pl
from jax.experimental.pallas import tpu as pltpu

D = 768            # TaBERT hidden size (out_dim in the PyTorch module)
H = 256            # head hidden width
SAMPLE_ROW_NUM = 2 # stands in for vertical_attention_table_bert_model.config.sample_row_num
BN_EPS = 1e-5
LANE = 128         # pad head output widths to this for lane-dense (unmasked) stores
TN_BASE = 256      # minimum row tile (comp head / small inputs)
TN_BIG = 512       # target row tile for the big (edge-path) calls


def _round_up(n, m):
    return ((n + m - 1) // m) * m


def _choose_tn(n, target=TN_BIG, base=TN_BASE):
    """Largest row tile <= target (multiple of `base`) that still leaves >= 2 grid steps
    (so ("parallel",) can shard across v7x's 2 TensorCores); tiny n falls back to `base`."""
    tn = target
    while tn > base and _round_up(max(n, 1), base) < 2 * tn:
        tn //= 2
    return tn


# --------------------- host-side (static) table-structure helpers --------------------
def get_all_pair(ar):
    return np.array(np.meshgrid(ar, ar)).T.reshape(-1, 2)


def get_edges(r, c):
    edges = np.empty((0, 2), dtype=int)
    row_edges = get_all_pair(np.arange(c))
    for i in range(r):
        edges = np.concatenate((edges, row_edges + i * c), axis=0)
    col_edges = get_all_pair(np.arange(0, r * c, c))
    for i in range(c):
        edges = np.concatenate((edges, col_edges + i), axis=0)
    edges = np.unique(edges, axis=0)
    edges = edges[np.lexsort((edges[:, 1], edges[:, 0]))]
    assert len(edges) == r * c * (r + c - 1)
    return edges.astype(np.int32)


def create_edge_labels(all_edges, edge_list):
    s = set(edge_list)
    return np.array([1 if (int(a), int(b)) in s else 0 for a, b in all_edges],
                    dtype=np.int32)


# ------------------------------- Pallas kernels --------------------------------------
def _linear_kernel(x_ref, w_ref, b_ref, o_ref):
    # out = x @ w + b        (bf16 operands, f32 MXU accumulation, output in o_ref.dtype)
    o_ref[...] = (jnp.dot(x_ref[...], w_ref[...], preferred_element_type=jnp.float32)
                  + b_ref[...]).astype(o_ref.dtype)


def _mlp_kernel(x_ref, w1_ref, b1_ref, w2_ref, b2_ref, o_ref):
    # Dropout(id) -> Linear (BN folded in) -> ReLU -> Dropout(id) -> Linear (lane-padded)
    h = (jnp.dot(x_ref[...], w1_ref[...], preferred_element_type=jnp.float32)
         + b1_ref[...])
    h = jnp.maximum(h, 0.0)                               # elementwise kept in f32
    o_ref[...] = (jnp.dot(h.astype(w2_ref.dtype), w2_ref[...],
                          preferred_element_type=jnp.float32)
                  + b2_ref[...]).astype(o_ref.dtype)


def _edge_tail_kernel(x0_ref, x1_ref, w2_ref, b2_ref, o_ref):
    # x0 = W_top-projection(+folded b1) of edge endpoint 0, x1 = W_bot-projection of endpoint 1
    h = jnp.maximum(x0_ref[...].astype(jnp.float32) + x1_ref[...].astype(jnp.float32), 0.0)
    o_ref[...] = (jnp.dot(h.astype(w2_ref.dtype), w2_ref[...],
                          preferred_element_type=jnp.float32)
                  + b2_ref[...]).astype(o_ref.dtype)


# ------------------------------- Pallas wrappers --------------------------------------
def _pad_rows(x, tn):
    n = x.shape[0]
    n_pad = _round_up(max(n, 1), tn)
    if n_pad != n:
        x = jnp.pad(x, ((0, n_pad - n), (0, 0)))
    return x, n


def _head_call(kernel, inputs, in_specs, n_pad, dpad, tn, out_dtype=jnp.float32):
    return pl.pallas_call(
        kernel,
        out_shape=jax.ShapeDtypeStruct((n_pad, dpad), out_dtype),
        grid_spec=pltpu.PrefetchScalarGridSpec(
            num_scalar_prefetch=0,
            grid=(n_pad // tn,),
            in_specs=in_specs,
            out_specs=pl.BlockSpec((tn, dpad), lambda i: (i, 0)),
        ),
        compiler_params=pltpu.CompilerParams(dimension_semantics=("parallel",)),
    )(*inputs)


def linear_pallas(x, w, b, *, out_dtype=jnp.float32, tn=None):
    """x:[n,din] @ w:[din,dout] + b.  dout must be a multiple of 128 (lane-dense)."""
    if tn is None:
        tn = _choose_tn(x.shape[0])
    # cast BEFORE padding so convert+pad fuse and the padded copy is bf16
    xp, n = _pad_rows(x.astype(jnp.bfloat16), tn)
    n_pad, din = xp.shape
    dout = w.shape[1]
    in_specs = [
        pl.BlockSpec((tn, din), lambda i: (i, 0)),
        pl.BlockSpec((din, dout), lambda i: (0, 0)),
        pl.BlockSpec((1, dout), lambda i: (0, 0)),
    ]
    out = _head_call(_linear_kernel,
                     (xp, w.astype(jnp.bfloat16), b.astype(jnp.float32)),
                     in_specs, n_pad, dout, tn, out_dtype=out_dtype)
    return out[:n]


def mlp_head(x, hp, tn=TN_BASE):
    """Full head (BN folded, lane-padded output), one batched call.  N is tiny here
    (sum of r+c per table) so this call is launch/DMA-latency bound; keep TN_BASE."""
    xp, n = _pad_rows(x.astype(jnp.bfloat16), tn)
    n_pad, din = xp.shape
    h = hp['w1'].shape[1]
    dpad = hp['w2'].shape[1]
    in_specs = [
        pl.BlockSpec((tn, din), lambda i: (i, 0)),
        pl.BlockSpec((din, h), lambda i: (0, 0)),
        pl.BlockSpec((1, h), lambda i: (0, 0)),
        pl.BlockSpec((h, dpad), lambda i: (0, 0)),
        pl.BlockSpec((1, dpad), lambda i: (0, 0)),
    ]
    out = _head_call(_mlp_kernel,
                     (xp, hp['w1'].astype(jnp.bfloat16), hp['b1'],
                      hp['w2'].astype(jnp.bfloat16), hp['b2']),
                     in_specs, n_pad, dpad, tn)
    return out[:n, :hp['dout']]


def edge_tail(x0, x1, hp, tn):
    """ReLU(x0 + x1) @ w2 + b2 over all edges (x0/x1 already contain folded b1).
    Inputs are bf16 and already padded to a multiple of tn (padding folded into the
    host-side index gather); output is bf16 lane-padded (halved writeback)."""
    n_pad, h = x0.shape
    assert n_pad % tn == 0 and x1.shape == x0.shape
    dpad = hp['w2'].shape[1]
    in_specs = [
        pl.BlockSpec((tn, h), lambda i: (i, 0)),
        pl.BlockSpec((tn, h), lambda i: (i, 0)),
        pl.BlockSpec((h, dpad), lambda i: (0, 0)),
        pl.BlockSpec((1, dpad), lambda i: (0, 0)),
    ]
    out = _head_call(_edge_tail_kernel,
                     (x0.astype(jnp.bfloat16), x1.astype(jnp.bfloat16),
                      hp['w2'].astype(jnp.bfloat16), hp['b2']),
                     in_specs, n_pad, dpad, tn, out_dtype=jnp.bfloat16)
    return out


# ----------------------------- parameter construction --------------------------------
def init_head(key, din, h, dout):
    """Raw PyTorch-like params: Linear(din,h) + BatchNorm1d(h) running stats + Linear(h,dout)."""
    ks = jax.random.split(key, 8)
    return dict(
        w1=jax.random.normal(ks[0], (din, h), jnp.float32) * 0.02,
        b1=jax.random.normal(ks[1], (1, h), jnp.float32) * 0.02,
        gamma=1.0 + 0.1 * jax.random.normal(ks[2], (1, h), jnp.float32),
        beta=0.1 * jax.random.normal(ks[3], (1, h), jnp.float32),
        run_mean=0.05 * jax.random.normal(ks[4], (1, h), jnp.float32),
        run_var=jnp.abs(1.0 + 0.1 * jax.random.normal(ks[5], (1, h), jnp.float32)),
        w2=jax.random.normal(ks[6], (h, dout), jnp.float32) * 0.02,
        b2=jax.random.normal(ks[7], (1, dout), jnp.float32) * 0.02,
        dout=dout)


def fold_head(p):
    """Fold eval-mode BN into the first Linear; lane-pad the second Linear to 128."""
    scale = p['gamma'] / jnp.sqrt(p['run_var'] + BN_EPS)
    shift = p['beta'] - p['run_mean'] * scale
    w1f = p['w1'] * scale
    b1f = p['b1'] * scale + shift
    dout = p['dout']
    dpad = _round_up(dout, LANE)
    w2p = jnp.pad(p['w2'], ((0, 0), (0, dpad - dout)))
    b2p = jnp.pad(p['b2'], ((0, 0), (0, dpad - dout)))
    return dict(w1=w1f, b1=b1f, w2=w2p, b2=b2p, dout=dout)


def fold_edge_head(p):
    """Edge head: additionally build the split projection  [W_top | W_bot]  (768 -> 512)
    so that Linear(concat(e0,e1)) = e0@W_top + e1@W_bot + b1 (bias folded into W_top side)."""
    hp = fold_head(p)
    w1f, b1f = hp['w1'], hp['b1']                                   # (2D, H), (1, H)
    hp['w_proj'] = jnp.concatenate([w1f[:D], w1f[D:]], axis=1)      # (D, 2H) lane-dense
    hp['b_proj'] = jnp.concatenate([b1f, jnp.zeros_like(b1f)], axis=1)
    return hp


# ------------------------------ plain-JAX references ----------------------------------
def _ref_mlp(x, hp):
    h = jnp.dot(x.astype(jnp.bfloat16), hp['w1'].astype(jnp.bfloat16),
                preferred_element_type=jnp.float32) + hp['b1']
    h = jnp.maximum(h, 0.0)
    o = jnp.dot(h.astype(jnp.bfloat16), hp['w2'].astype(jnp.bfloat16),
                preferred_element_type=jnp.float32) + hp['b2']
    return o[:, :hp['dout']]


def _ref_comp_full(row_col_embs, raw, rows_mask):
    """Original (unfolded, f32) formulation of the comp/gid head, incl. forced rows."""
    scale = raw['gamma'] / jnp.sqrt(raw['run_var'] + BN_EPS)
    shift = raw['beta'] - raw['run_mean'] * scale
    h = jnp.maximum((row_col_embs @ raw['w1'] + raw['b1']) * scale + shift, 0.0)
    o = h @ raw['w2'] + raw['b2']
    forced = jnp.array([1.0, 0.0, 0.0, 0.0], jnp.float32)
    return jnp.where(rows_mask[:, None], forced[None, :], o)


def _ref_edge_full(cells_all, idx0, idx1, raw, mask):
    """Original (unfolded, f32, concat-then-MLP) formulation of the edge head."""
    e = jnp.concatenate([jnp.take(cells_all, idx0, axis=0),
                         jnp.take(cells_all, idx1, axis=0)], axis=1)
    scale = raw['gamma'] / jnp.sqrt(raw['run_var'] + BN_EPS)
    shift = raw['beta'] - raw['run_mean'] * scale
    h = jnp.maximum((e @ raw['w1'] + raw['b1']) * scale + shift, 0.0)
    o = h @ raw['w2'] + raw['b2']
    return jnp.where(mask, -jnp.inf, o[:, 0])


# --------------------------------- forward pass ---------------------------------------
def tabert_adapted_forward(final_table_encodings, inps, comp_head, edge_head,
                           return_aux=False):
    """Port of TabertAdaptedBaselineModel.forward *after* the pretrained
    VerticalAttentionTableBert encoder (its [B, R, C, 768] output is an input here)."""
    B, R_enc, C_max, d = final_table_encodings.shape

    row_col_embs, cells_list = [], []
    edge_idx0, edge_idx1 = [], []
    batch_edge_labels, batch_row_col_gid_labels = [], []
    extra_rows_mask, extra_edges_mask = [], []

    offset = 0
    for i, x in enumerate(inps):
        r, c = x['num_rows'], x['num_cols']
        r_ = min(r, R_enc)
        cells = final_table_encodings[i, :r_, :c, :]
        if r > r_:
            cells = jnp.concatenate(
                [cells, jnp.zeros((r - r_, c, d), jnp.float32)], axis=0)

        # tiny per-table reductions (r,c <= a few): plain JAX, not worth a kernel launch.
        # NOTE: col means include zero-padded rows (r_/r dilution) exactly like PyTorch.
        row_col_embs += [jnp.mean(cells, axis=1), jnp.mean(cells, axis=0)]
        extra_rows_mask += [0] * r_ + [1] * (r - r_) + [0] * c
        batch_row_col_gid_labels += list(x['row_label']) + list(x['col_label'])

        cells_list.append(cells.reshape(r * c, d))
        act_edges = get_edges(r, c)                               # host/static numpy
        e_mask = act_edges.max(axis=1) >= r_ * c                  # edges into padded rows
        edge_idx0.append(act_edges[:, 0] + offset)
        edge_idx1.append(act_edges[:, 1] + offset)
        extra_edges_mask.append(e_mask)
        batch_edge_labels.append(create_edge_labels(act_edges, x['edge_list']))
        offset += r * c

    row_col_embs = jnp.concatenate(row_col_embs, axis=0)          # [N_rc, 768]
    cells_all = jnp.concatenate(cells_list, axis=0)               # [N_cells, 768]
    idx0_np = np.concatenate(edge_idx0).astype(np.int32)
    idx1_np = np.concatenate(edge_idx1).astype(np.int32)
    n_edges = idx0_np.shape[0]
    extra_rows_mask = jnp.asarray(np.array(extra_rows_mask, dtype=bool))
    extra_edges_mask = jnp.asarray(np.concatenate(extra_edges_mask))

    # ---- comp/gid head: one batched Pallas MLP call (tiny N, launch-latency bound) ----
    row_col_gid_logits = mlp_head(row_col_embs, comp_head)
    forced = jnp.array([1.0, 0.0, 0.0, 0.0], jnp.float32)
    row_col_gid_logits = jnp.where(extra_rows_mask[:, None], forced[None, :],
                                   row_col_gid_logits)

    # ---- edge head: the HBM-bandwidth dominated path, kept bf16 end to end ----
    # 1) project cells ONCE (768 -> 2*256); bf16 output halves P writeback + gather reads
    P = linear_pallas(cells_all, edge_head['w_proj'], edge_head['b_proj'],
                      out_dtype=jnp.bfloat16)                      # [N_cells, 512] bf16
    # 2) fold the edge-row padding into the gather: pad the host index arrays (to a tile
    #    multiple, padding index 0) instead of jnp.pad-ing the big [N_edges,256] tensors
    tn_edge = _choose_tn(n_edges)
    n_e_pad = _round_up(max(n_edges, 1), tn_edge)
    idx0 = jnp.asarray(np.pad(idx0_np, (0, n_e_pad - n_edges)))
    idx1 = jnp.asarray(np.pad(idx1_np, (0, n_e_pad - n_edges)))
    x0 = jnp.take(P[:, :H], idx0, axis=0)                          # bf16 gathers
    x1 = jnp.take(P[:, H:], idx1, axis=0)
    # TODO(synk): further win would be fusing this gather into edge_tail (resident-VMEM P +
    # scalar-prefetched idx0/idx1) so x0/x1 never hit HBM; kept in-wrapper for robustness.
    edge_logits = edge_tail(x0, x1, edge_head, tn_edge)[:n_edges, 0].astype(jnp.float32)
    edge_logits = jnp.where(extra_edges_mask, -jnp.inf, edge_logits)

    labels_rc = jnp.asarray(np.array(batch_row_col_gid_labels, dtype=np.int32))
    labels_e = jnp.asarray(np.concatenate(batch_edge_labels))
    assert labels_rc.shape[0] == row_col_gid_logits.shape[0]
    assert labels_e.shape[0] == edge_logits.shape[0]

    result = ((row_col_gid_logits, labels_rc), (edge_logits, labels_e))
    if return_aux:
        aux = dict(row_col_embs=row_col_embs, cells_all=cells_all,
                   idx0=jnp.asarray(idx0_np), idx1=jnp.asarray(idx1_np),
                   rows_mask=extra_rows_mask, edges_mask=extra_edges_mask)
        return result, aux
    return result


# -------------------------------------- main ------------------------------------------
if __name__ == "__main__":
    key = jax.random.PRNGKey(0)
    k_enc, k_comp, k_edge = jax.random.split(key, 3)

    inps = [
        {'num_rows': 3, 'num_cols': 4,
         'edge_list': [(0, 1), (1, 0), (4, 5), (0, 4)],
         'row_label': [0, 1, 2], 'col_label': [3, 0, 1, 2]},
        {'num_rows': 2, 'num_cols': 3,
         'edge_list': [(0, 3), (3, 0)],
         'row_label': [1, 0], 'col_label': [2, 2, 0]},
    ]
    max_r = max(x['num_rows'] for x in inps)
    max_c = max(x['num_cols'] for x in inps)
    R_enc = min(SAMPLE_ROW_NUM, max_r)

    # TODO(synk): the pretrained VerticalAttentionTableBert encoder + tokenization is not
    # reproduced; its [B, min(sample_row_num, max_r), max_c, 768] output is synthetic input.
    final_table_encodings = jax.random.normal(
        k_enc, (len(inps), R_enc, max_c, D), jnp.float32)

    comp_raw = init_head(k_comp, D, H, 4)          # comp_and_gid_layer
    edge_raw = init_head(k_edge, 2 * D, H, 1)      # edge_layer
    comp_head = fold_head(comp_raw)
    edge_head = fold_edge_head(edge_raw)

    ((rc_logits, rc_labels), (e_logits, e_labels)), aux = tabert_adapted_forward(
        final_table_encodings, inps, comp_head, edge_head, return_aux=True)
    jax.block_until_ready((rc_logits, e_logits))

    # --- spot-check the Pallas kernels vs plain-JAX references ---
    # comp-head kernel (multi-step grid: 300 rows -> 2 tiles of 256)
    xtest = jax.random.normal(jax.random.PRNGKey(1), (300, D), jnp.float32)
    assert np.allclose(np.asarray(mlp_head(xtest, comp_head)),
                       np.asarray(_ref_mlp(xtest, comp_head)), atol=1e-2, rtol=1e-2)

    # projection kernel (bf16 output path)
    p_ref = (jnp.dot(aux['cells_all'].astype(jnp.bfloat16),
                     edge_head['w_proj'].astype(jnp.bfloat16),
                     preferred_element_type=jnp.float32) + edge_head['b_proj'])
    p_got = linear_pallas(aux['cells_all'], edge_head['w_proj'], edge_head['b_proj'],
                          out_dtype=jnp.bfloat16).astype(jnp.float32)
    assert np.allclose(np.asarray(p_got), np.asarray(p_ref), atol=1e-2, rtol=1e-2)

    # end-to-end vs the ORIGINAL (unfolded, f32, concat-then-MLP) formulation
    rc_ref = _ref_comp_full(aux['row_col_embs'], comp_raw, aux['rows_mask'])
    assert np.allclose(np.asarray(rc_logits), np.asarray(rc_ref), atol=3e-2, rtol=3e-2)
    e_ref = _ref_edge_full(aux['cells_all'], aux['idx0'], aux['idx1'],
                           edge_raw, aux['edges_mask'])
    assert np.allclose(np.asarray(e_logits), np.asarray(e_ref), atol=3e-2, rtol=3e-2)

    # shape checks (eval-mode return: unfiltered logits + labels)
    n_rc = sum(x['num_rows'] + x['num_cols'] for x in inps)
    n_e = sum(x['num_rows'] * x['num_cols'] * (x['num_rows'] + x['num_cols'] - 1)
              for x in inps)
    assert rc_logits.shape == (n_rc, 4) and rc_labels.shape[0] == n_rc
    assert e_logits.shape == (n_e,) and e_labels.shape[0] == n_e

    print("KERNEL_OK")
</pallas_src>

<mosaic_0001>
module attributes {stable_mosaic.version = 11 : i64} {
  func.func @_mlp_kernel(%arg0: i32, %arg1: memref<256x768xbf16, #tpu.memory_space<vmem>>, %arg2: memref<768x256xbf16, #tpu.memory_space<vmem>>, %arg3: memref<1x256xf32, #tpu.memory_space<vmem>>, %arg4: memref<256x128xbf16, #tpu.memory_space<vmem>>, %arg5: memref<1x128xf32, #tpu.memory_space<vmem>>, %arg6: memref<256x128xf32, #tpu.memory_space<vmem>>) attributes {dimension_semantics = [#tpu.dimension_semantics<parallel>], iteration_bounds = array<i64: 1>, scalar_prefetch = 0 : i64, scratch_operands = 0 : i64, tpu.core_type = #tpu.core_type<tc>, window_params = [{transform_indices = @transform_0, window_bounds = array<i64: 256, 768>}, {pipeline_mode = #tpu.pipeline_mode<synchronous>, transform_indices = @transform_1, window_bounds = array<i64: 768, 256>}, {pipeline_mode = #tpu.pipeline_mode<synchronous>, transform_indices = @transform_2, window_bounds = array<i64: 1, 256>}, {pipeline_mode = #tpu.pipeline_mode<synchronous>, transform_indices = @transform_3, window_bounds = array<i64: 256, 128>}, {pipeline_mode = #tpu.pipeline_mode<synchronous>, transform_indices = @transform_4, window_bounds = array<i64: 1, 128>}, {transform_indices = @transform_5, window_bounds = array<i64: 256, 128>}]} {
    %c0 = arith.constant 0 : index
    %c0_0 = arith.constant 0 : index
    %0 = vector.load %arg1[%c0, %c0_0] : memref<256x768xbf16, #tpu.memory_space<vmem>>, vector<256x768xbf16>
    %c0_1 = arith.constant 0 : index
    %c0_2 = arith.constant 0 : index
    %1 = vector.load %arg2[%c0_1, %c0_2] : memref<768x256xbf16, #tpu.memory_space<vmem>>, vector<768x256xbf16>
    %cst = arith.constant dense<0.000000e+00> : vector<256x256xf32>
    %2 = tpu.matmul %0, %1, %cst {dimension_numbers = #tpu.dot_dimension_numbers<[1], [0], [0], [1], [0, 0, 1, 1], [], []>} : vector<256x768xbf16>, vector<768x256xbf16>, vector<256x256xf32> -> vector<256x256xf32>
    %c0_3 = arith.constant 0 : index
    %c0_4 = arith.constant 0 : index
    %3 = vector.load %arg3[%c0_3, %c0_4] : memref<1x256xf32, #tpu.memory_space<vmem>>, vector<1x256xf32>
    %4 = vector.broadcast %3 : vector<1x256xf32> to vector<256x256xf32>
    %5 = arith.addf %2, %4 : vector<256x256xf32>
    %cst_5 = arith.constant 0.000000e+00 : f32
    %6 = vector.broadcast %cst_5 : f32 to vector<256x256xf32>
    %7 = arith.maximumf %5, %6 : vector<256x256xf32>
    %8 = arith.truncf %7 : vector<256x256xf32> to vector<256x256xbf16>
    %c0_6 = arith.constant 0 : index
    %c0_7 = arith.constant 0 : index
    %9 = vector.load %arg4[%c0_6, %c0_7] : memref<256x128xbf16, #tpu.memory_space<vmem>>, vector<256x128xbf16>
    %cst_8 = arith.constant dense<0.000000e+00> : vector<256x128xf32>
    %10 = tpu.matmul %8, %9, %cst_8 {dimension_numbers = #tpu.dot_dimension_numbers<[1], [0], [0], [1], [0, 0, 1, 1], [], []>} : vector<256x256xbf16>, vector<256x128xbf16>, vector<256x128xf32> -> vector<256x128xf32>
    %c0_9 = arith.constant 0 : index
    %c0_10 = arith.constant 0 : index
    %11 = vector.load %arg5[%c0_9, %c0_10] : memref<1x128xf32, #tpu.memory_space<vmem>>, vector<1x128xf32>
    %12 = vector.broadcast %11 : vector<1x128xf32> to vector<256x128xf32>
    %13 = arith.addf %10, %12 : vector<256x128xf32>
    %c0_11 = arith.constant 0 : index
    %c0_12 = arith.constant 0 : index
    %14 = vector.load %arg6[%c0_11, %c0_12] : memref<256x128xf32, #tpu.memory_space<vmem>>, vector<256x128xf32>
    tpu.vector_store %arg6[%c0_11, %c0_12], %13 {strides = array<i32>} : memref<256x128xf32, #tpu.memory_space<vmem>>, vector<256x128xf32>,
    return
  }
  func.func @transform_0(%arg0: i32) -> (i32, i32) {
    %c0_i32 = arith.constant 0 : i32
    %c0_i32_0 = arith.constant 0 : i32
    return %arg0, %c0_i32 : i32, i32
  }
  func.func @transform_1(%arg0: i32) -> (i32, i32) {
    %c0_i32 = arith.constant 0 : i32
    %c0_i32_0 = arith.constant 0 : i32
    %c0_i32_1 = arith.constant 0 : i32
    return %c0_i32, %c0_i32_0 : i32, i32
  }
  func.func @transform_2(%arg0: i32) -> (i32, i32) {
    %c0_i32 = arith.constant 0 : i32
    %c0_i32_0 = arith.constant 0 : i32
    %c0_i32_1 = arith.constant 0 : i32
    return %c0_i32, %c0_i32_0 : i32, i32
  }
  func.func @transform_3(%arg0: i32) -> (i32, i32) {
    %c0_i32 = arith.constant 0 : i32
    %c0_i32_0 = arith.constant 0 : i32
    %c0_i32_1 = arith.constant 0 : i32
    return %c0_i32, %c0_i32_0 : i32, i32
  }
  func.func @transform_4(%arg0: i32) -> (i32, i32) {
    %c0_i32 = arith.constant 0 : i32
    %c0_i32_0 = arith.constant 0 : i32
    %c0_i32_1 = arith.constant 0 : i32
    return %c0_i32, %c0_i32_0 : i32, i32
  }
  func.func @transform_5(%arg0: i32) -> (i32, i32) {
    %c0_i32 = arith.constant 0 : i32
    %c0_i32_0 = arith.constant 0 : i32
    return %arg0, %c0_i32 : i32, i32
  }
}

</mosaic_0001>

<bundles_post_ra>
// kernel: tpu_custom_call.1
= control target key start
LH: loop header
LB: loop body
LE: loop exit
PB: predicated region body
PF: predicated region fallthrough
CT: control target
= control target key end

     0   :  { %10 = vsyncpa [#allocation3], 0  ;;  %s4821_s0 = inlined_call_operand.hbm [shape: bf16[256,768], index: 0, kind: input, shape index: {}]   ;;  %s4822_s1 = inlined_call_operand.hbm [shape: bf16[768,256], index: 1, kind: input, shape index: {}]   ;;  %s4823_s2 = inlined_call_operand.hbm [shape: f32[1,256], index: 2, kind: input, shape index: {}]   ;;  %s4824_s3 = inlined_call_operand.hbm [shape: bf16[256,128], index: 3, kind: input, shape index: {}]   ;;  %s4825_s4 = inlined_call_operand.vmem [shape: f32[1,128], index: 4, kind: input, shape index: {}]   ;;  %s4826_s5 = inlined_call_operand.hbm [shape: f32[256,128], index: 5, kind: output, shape index: {}]  }
   0x1   :  { %11 = vsyncpa [#allocation6], 0 }
   0x2   :  { %12 = vsyncpa [#allocation9], 0  ;;  %s31_s20 = sshll.u32 %s4822_s1, 4  ;;  %s32_s20 = int_to_ptr.hbm [resolvable:$true] %s31_s20 }
   0x3   :  { %13 = vsyncpa [#allocation4], 0  ;;  %s3964_s21 = smov [#allocation5]   ;;  %s18_s25 = sshll.u32 %s4821_s0, 4  ;;  %s19_s25 = int_to_ptr.hbm [resolvable:$true] %s18_s25 }
   0x4   :  { %s33_s22 = sshll.u32 %s3964_s21, 4  ;;  %s3965_s26 = smov 128   ;;  %s34_s22 = int_to_ptr.vmem [resolvable:$true] %s33_s22 }
   0x5   :  { %s3966_s27 = smov 8   ;;  %s3967_s28 = smov [#allocation2]  }
   0x6   :  { %39 = dma.hbm_to_vmem [thread:$0]  %s32_s20, 12288, %s34_s22, [#allocation6], %s3965_s26, %s3965_s26, %s3966_s27  }
   0x7   :  { %s20_s29 = sshll.u32 %s3967_s28, 4  ;;  %s3968_s1 = smov 384   ;;  %s21_s29 = int_to_ptr.vmem [resolvable:$true] %s20_s29 }
   0x8   :  { %s3969_s30 = smov 24   ;;  %s45_s8 = sshll.u32 %s4823_s2, 4  ;;  %s46_s8 = int_to_ptr.hbm [resolvable:$true] %s45_s8 }
   0x9   :  { %26 = dma.hbm_to_vmem [thread:$0]  %s19_s25, 12288, %s21_s29, [#allocation3], %s3968_s1, %s3968_s1, %s3969_s30  }
   0xa   :  { %s3970_s9 = smov [#allocation7]   ;;  %s55_s12 = sshll.u32 %s4824_s3, 4  ;;  %s56_s12 = int_to_ptr.hbm [resolvable:$true] %s55_s12 }
   0xb   :  { %s47_s0 = sshll.u32 %s3970_s9, 4  ;;  %s3971_s13 = smov [#allocation8]   ;;  %s48_s0 = int_to_ptr.vmem [resolvable:$true] %s47_s0 }
   0xc   :  { %50 = dma.hbm_to_vmem [thread:$0]  %s46_s8, 32, %s48_s0, [#allocation6]  }
   0xd   :  { %s57_s14 = sshll.u32 %s3971_s13, 4  ;;  %s3972_s15 = smov 64   ;;  %s58_s14 = int_to_ptr.vmem [resolvable:$true] %s57_s14 }
   0xe   :  { %s3973_s16 = smov 4  }
   0xf   :  { %63 = dma.hbm_to_vmem [thread:$0]  %s56_s12, 2048, %s58_s14, [#allocation9], %s3972_s15, %s3972_s15, %s3973_s16  }
  0x10   :  { %3956 = dma.done.wait [#allocation3], 12288  }
  0x11   :  { %3957 = vsyncadd [#allocation3], 4294955008 }
  0x12   :  { %3958 = dma.done.wait [#allocation6], 12320  }
  0x13   :  { %3959 = vsyncadd [#allocation6], 4294954976 }
  0x14   :  { %3960 = dma.done.wait [#allocation9], 2048  }
  0x15   :  { %3961 = vsyncadd [#allocation9], 4294965248  ;;  %v3209_v0 = vld [vmem:[#allocation5 + $0x70] sm:$0xf]  ;;  %v3710_v1 = vld [vmem:[#allocation5 + $0x74] sm:$0xf0] }
  0x16   :  { %v3273_v2 = vld [vmem:[#allocation5 + $0xf0] sm:$0xf]  ;;  %v3210_v3 = vor.u32 %v3710_v1, %v3209_v0  ;;  %v3726_v4 = vld [vmem:[#allocation5 + $0xf4] sm:$0xf0]  ;;  %v3201_v5 = vld [vmem:[#allocation5 + $0x60] sm:$0xf] }
  0x17   :  { %v3708_v6 = vld [vmem:[#allocation5 + $0x64] sm:$0xf0]  ;;  %v3274_v7 = vor.u32 %v3726_v4, %v3273_v2  ;;  %v3265_v8 = vld [vmem:[#allocation5 + $0xe0] sm:$0xf]  ;;  %v3193_v12 = vld [vmem:[#allocation5 + $0x50] sm:$0xf] }
  0x18   :  { %v3724_v9 = vld [vmem:[#allocation5 + $0xe4] sm:$0xf0]  ;;  %1240 = vmatpush.bf16.msra.mxu0 %v3210_v3  ;;  %3807 = vmatpush.bf16.msra.mxu2 %v3210_v3  ;;  %v3202_v10 = vor.u32 %v3708_v6, %v3201_v5  ;;  %v3706_v13 = vld [vmem:[#allocation5 + $0x54] sm:$0xf0]  ;;  %v3257_v14 = vld [vmem:[#allocation5 + $0xd0] sm:$0xf] }
  0x19   :  { %3815 = vmatpush.bf16.msra.mxu3 %v3274_v7  ;;  %v3266_v11 = vor.u32 %v3724_v9, %v3265_v8  ;;  %1329 = vmatpush.bf16.msra.mxu1 %v3274_v7  ;;  %v3722_v15 = vld [vmem:[#allocation5 + $0xd4] sm:$0xf0]  ;;  %v3194_v16 = vor.u32 %v3706_v13, %v3193_v12  ;;  %v3185_v18 = vld [vmem:[#allocation5 + $0x40] sm:$0xf]  ;;  %v3704_v19 = vld [vmem:[#allocation5 + $0x44] sm:$0xf0] }
  0x1a   :  { %v3258_v17 = vor.u32 %v3722_v15, %v3257_v14  ;;  %v3249_v20 = vld [vmem:[#allocation5 + $0xc0] sm:$0xf]  ;;  %v3720_v21 = vld [vmem:[#allocation5 + $0xc4] sm:$0xf0]  ;;  %v3186_v22 = vor.u32 %v3704_v19, %v3185_v18  ;;  %v3177_v24 = vld [vmem:[#allocation5 + $0x30] sm:$0xf] }
  0x1b   :  { %v3250_v23 = vor.u32 %v3720_v21, %v3249_v20  ;;  %v3702_v25 = vld [vmem:[#allocation5 + $0x34] sm:$0xf0]  ;;  %v3241_v26 = vld [vmem:[#allocation5 + $0xb0] sm:$0xf]  ;;  %v3169_v30 = vld [vmem:[#allocation5 + $0x20] sm:$0xf] }
  0x1c   :  { %1241 = vmatpush.bf16.msra.mxu0 %v3202_v10  ;;  %3808 = vmatpush.bf16.msra.mxu2 %v3202_v10  ;;  %v3718_v27 = vld [vmem:[#allocation5 + $0xb4] sm:$0xf0]  ;;  %v3178_v28 = vor.u32 %v3702_v25, %v3177_v24  ;;  %v3700_v31 = vld [vmem:[#allocation5 + $0x24] sm:$0xf0]  ;;  %v3233_v32 = vld [vmem:[#allocation5 + $0xa0] sm:$0xf] }
  0x1d   :  { %3816 = vmatpush.bf16.msra.mxu3 %v3266_v11  ;;  %1330 = vmatpush.bf16.msra.mxu1 %v3266_v11  ;;  %v3242_v29 = vor.u32 %v3718_v27, %v3241_v26  ;;  %v3716_v33 = vld [vmem:[#allocation5 + $0xa4] sm:$0xf0]  ;;  %v3170_v34 = vor.u32 %v3700_v31, %v3169_v30  ;;  %v3161_v36 = vld [vmem:[#allocation5 + $0x10] sm:$0xf]  ;;  %v3698_v37 = vld [vmem:[#allocation5 + $0x14] sm:$0xf0] }
  0x1e   :  { %v3234_v35 = vor.u32 %v3716_v33, %v3233_v32  ;;  %v3225_v38 = vld [vmem:[#allocation5 + $0x90] sm:$0xf]  ;;  %v3714_v39 = vld [vmem:[#allocation5 + $0x94] sm:$0xf0]  ;;  %v3162_v40 = vor.u32 %v3698_v37, %v3161_v36  ;;  %v3153_v42 = vld [vmem:[#allocation5] sm:$0xf] }
  0x1f   :  { %v3226_v41 = vor.u32 %v3714_v39, %v3225_v38  ;;  %v3696_v43 = vld [vmem:[#allocation5 + $0x4] sm:$0xf0]  ;;  %v3217_v44 = vld [vmem:[#allocation5 + $0x80] sm:$0xf]  ;;  %v3337_v46 = vld [vmem:[#allocation5 + $0x170] sm:$0xf] }
  0x20   :  { %1242 = vmatpush.bf16.msra.mxu0 %v3194_v16  ;;  %3809 = vmatpush.bf16.msra.mxu2 %v3194_v16  ;;  %v3712_v45 = vld [vmem:[#allocation5 + $0x84] sm:$0xf0]  ;;  %v3742_v47 = vld [vmem:[#allocation5 + $0x174] sm:$0xf0]  ;;  %v2769_v48 = vld [vmem:[#allocation2] sm:$0xf]  ;;  %v3154_v51 = vor.u32 %v3696_v43, %v3153_v42 }
  0x21   :  { %3817 = vmatpush.bf16.msra.mxu3 %v3258_v17  ;;  %1331 = vmatpush.bf16.msra.mxu1 %v3258_v17  ;;  %v3401_v49 = vld [vmem:[#allocation5 + $0x1f0] sm:$0xf]  ;;  %v3758_v50 = vld [vmem:[#allocation5 + $0x1f4] sm:$0xf0]  ;;  %v2961_v53 = vld [vmem:[#allocation2 + $0x180] sm:$0xf]  ;;  %v3218_v55 = vor.u32 %v3712_v45, %v3217_v44  ;;  %v3338_v58 = vor.u32 %v3742_v47, %v3337_v46 }
  0x22   :  { %v3602_v52 = vld [vmem:[#allocation2 + $0x14] sm:$0xf0]  ;;  %v3647_v56 = vld [vmem:[#allocation2 + $0x184] sm:$0xf]  ;;  %v2963_v57 = vld [vmem:[#allocation2 + $0x198] sm:$0xf0]  ;;  %v3402_v60 = vor.u32 %v3758_v50, %v3401_v49 }
  0x23   :  { %v3650_v54 = vld [vmem:[#allocation2 + $0x194] sm:$0xf0]  ;;  %v3599_v59 = vld [vmem:[#allocation2 + $0x4] sm:$0xf]  ;;  %v2771_v61 = vld [vmem:[#allocation2 + $0x18] sm:$0xf0]  ;;  %v4020_v0 = vor.u32 %v3602_v52, %v2769_v48  ;;  %v4024_v4 = vor.u32 %v3647_v56, %v2963_v57 }
  0x24   :  { %1243 = vmatpush.bf16.msra.mxu0 %v3186_v22  ;;  %3810 = vmatpush.bf16.msra.mxu2 %v3186_v22  ;;  %v3329_v62 = vld [vmem:[#allocation5 + $0x160] sm:$0xf]  ;;  %v3740_v63 = vld [vmem:[#allocation5 + $0x164] sm:$0xf0]  ;;  %v4022_v1 = vor.u32 %v3650_v54, %v2961_v53  ;;  %v4026_v5 = vor.u32 %v3599_v59, %v2771_v61  ;;  %v3321_v8 = vld [vmem:[#allocation5 + $0x150] sm:$0xf] }
  0x25   :  { %3818 = vmatpush.bf16.msra.mxu3 %v3250_v23  ;;  %1332 = vmatpush.bf16.msra.mxu1 %v3250_v23  ;;  %v3393_v2 = vld [vmem:[#allocation5 + $0x1e0] sm:$0xf]  ;;  %v3756_v3 = vld [vmem:[#allocation5 + $0x1e4] sm:$0xf0]  ;;  %4894 = vst [vmem:[#allocation16_spill] sm:$0xff] %v4024_v4  ;;  %v3330_v6 = vor.u32 %v3740_v63, %v3329_v62  ;;  %s2752_s20 = sshll.u32 %s4826_s5, 4  ;;  %s2753_s20 = int_to_ptr.hbm [resolvable:$true] %s2752_s20 }
  0x26   :  { %4893 = vst [vmem:[#allocation15_spill] sm:$0xff] %v4022_v1  ;;  %v3394_v7 = vor.u32 %v3756_v3, %v3393_v2  ;;  %v3738_v9 = vld [vmem:[#allocation5 + $0x154] sm:$0xf0]  ;;  %v3385_v10 = vld [vmem:[#allocation5 + $0x1d0] sm:$0xf] }
  0x27   :  { %v3322_v11 = vor.u32 %v3738_v9, %v3321_v8  ;;  %v3754_v12 = vld [vmem:[#allocation5 + $0x1d4] sm:$0xf0]  ;;  %v2793_v14 = vld [vmem:[#allocation2 + $0x30] sm:$0xf]  ;;  %v3608_v15 = vld [vmem:[#allocation2 + $0x44] sm:$0xf0] }
  0x28   :  { %1244 = vmatpush.bf16.msra.mxu0 %v3178_v28  ;;  %3811 = vmatpush.bf16.msra.mxu2 %v3178_v28  ;;  %v3386_v13 = vor.u32 %v3754_v12, %v3385_v10  ;;  %v2985_v16 = vld [vmem:[#allocation2 + $0x1b0] sm:$0xf]  ;;  %v3656_v17 = vld [vmem:[#allocation2 + $0x1c4] sm:$0xf0]  ;;  %v3653_v18 = vld [vmem:[#allocation2 + $0x1b4] sm:$0xf]  ;;  %v4032_v22 = vor.u32 %v3608_v15, %v2793_v14 }
  0x29   :  { %3819 = vmatpush.bf16.msra.mxu3 %v3242_v29  ;;  %1333 = vmatpush.bf16.msra.mxu1 %v3242_v29  ;;  %v2987_v19 = vld [vmem:[#allocation2 + $0x1c8] sm:$0xf0]  ;;  %v3605_v20 = vld [vmem:[#allocation2 + $0x34] sm:$0xf]  ;;  %v4034_v23 = vor.u32 %v3656_v17, %v2985_v16  ;;  %v3313_v26 = vld [vmem:[#allocation5 + $0x140] sm:$0xf] }
  0x2a   :  { %v2795_v21 = vld [vmem:[#allocation2 + $0x48] sm:$0xf0]  ;;  %v4036_v24 = vor.u32 %v3653_v18, %v2987_v19  ;;  %v3736_v27 = vld [vmem:[#allocation5 + $0x144] sm:$0xf0]  ;;  %v3377_v28 = vld [vmem:[#allocation5 + $0x1c0] sm:$0xf] }
  0x2b   :  { %4895 = vst [vmem:[#allocation17_spill] sm:$0xff] %v4034_v23  ;;  %v4038_v25 = vor.u32 %v3605_v20, %v2795_v21  ;;  %v3314_v29 = vor.u32 %v3736_v27, %v3313_v26  ;;  %v3752_v30 = vld [vmem:[#allocation5 + $0x1c4] sm:$0xf0]  ;;  %v2817_v32 = vld [vmem:[#allocation2 + $0x60] sm:$0xf] }
  0x2c   :  { %1245 = vmatpush.bf16.msra.mxu0 %v3170_v34  ;;  %3812 = vmatpush.bf16.msra.mxu2 %v3170_v34  ;;  %4896 = vst [vmem:[#allocation18_spill] sm:$0xff] %v4036_v24  ;;  %v3378_v31 = vor.u32 %v3752_v30, %v3377_v28  ;;  %v3614_v33 = vld [vmem:[#allocation2 + $0x74] sm:$0xf0]  ;;  %v3009_v34 = vld [vmem:[#allocation2 + $0x1e0] sm:$0xf] }
  0x2d   :  { %3820 = vmatpush.bf16.msra.mxu3 %v3234_v35  ;;  %1334 = vmatpush.bf16.msra.mxu1 %v3234_v35  ;;  %v3662_v35 = vld [vmem:[#allocation2 + $0x1f4] sm:$0xf0]  ;;  %v3659_v36 = vld [vmem:[#allocation2 + $0x1e4] sm:$0xf]  ;;  %v3011_v37 = vld [vmem:[#allocation2 + $0x1f8] sm:$0xf0] }
  0x2e   :  { %v3611_v38 = vld [vmem:[#allocation2 + $0x64] sm:$0xf]  ;;  %v2819_v39 = vld [vmem:[#allocation2 + $0x78] sm:$0xf0]  ;;  %v4048_v42 = vor.u32 %v3659_v36, %v3011_v37  ;;  %v3305_v44 = vld [vmem:[#allocation5 + $0x130] sm:$0xf] }
  0x2f   :  { %v4050_v43 = vor.u32 %v3611_v38, %v2819_v39  ;;  %v3734_v45 = vld [vmem:[#allocation5 + $0x134] sm:$0xf0]  ;;  %v3369_v46 = vld [vmem:[#allocation5 + $0x1b0] sm:$0xf]  ;;  %v3668_v53 = vld [vmem:[#allocation2 + $0x224] sm:$0xf0] }
  0x30   :  { %1246 = vmatpush.bf16.msra.mxu0 %v3162_v40  ;;  %3813 = vmatpush.bf16.msra.mxu2 %v3162_v40  ;;  %v4044_v40 = vor.u32 %v3614_v33, %v2817_v32  ;;  %4898 = vst [vmem:[#allocation20_spill] sm:$0xff] %v4048_v42  ;;  %v3306_v47 = vor.u32 %v3734_v45, %v3305_v44  ;;  %v3750_v48 = vld [vmem:[#allocation5 + $0x1b4] sm:$0xf0]  ;;  %v2841_v50 = vld [vmem:[#allocation2 + $0x90] sm:$0xf] }
  0x31   :  { %3821 = vmatpush.bf16.msra.mxu3 %v3226_v41  ;;  %1335 = vmatpush.bf16.msra.mxu1 %v3226_v41  ;;  %v4046_v41 = vor.u32 %v3662_v35, %v3009_v34  ;;  %v3370_v49 = vor.u32 %v3750_v48, %v3369_v46  ;;  %v3033_v52 = vld [vmem:[#allocation2 + $0x210] sm:$0xf]  ;;  %v3665_v54 = vld [vmem:[#allocation2 + $0x214] sm:$0xf]  ;;  %v2843_v57 = vld [vmem:[#allocation2 + $0xa8] sm:$0xf0] }
  0x32   :  { %v3617_v56 = vld [vmem:[#allocation2 + $0x94] sm:$0xf]  ;;  %v4058_v59 = vor.u32 %v3668_v53, %v3033_v52  ;;  %v3297_v62 = vld [vmem:[#allocation5 + $0x120] sm:$0xf]  ;;  %v3732_v63 = vld [vmem:[#allocation5 + $0x124] sm:$0xf0] }
  0x33   :  { %4897 = vst [vmem:[#allocation19_spill] sm:$0xff] %v4046_v41  ;;  %v4062_v61 = vor.u32 %v3617_v56, %v2843_v57  ;;  %v3361_v2 = vld [vmem:[#allocation5 + $0x1a0] sm:$0xf]  ;;  %v3298_v3 = vor.u32 %v3732_v63, %v3297_v62  ;;  %v3626_v9 = vld [vmem:[#allocation2 + $0xd4] sm:$0xf0] }
  0x34   :  { %1247 = vmatpush.bf16.msra.mxu0 %v3154_v51  ;;  %3814 = vmatpush.bf16.msra.mxu2 %v3154_v51  ;;  %v3620_v51 = vld [vmem:[#allocation2 + $0xa4] sm:$0xf0]  ;;  %4899 = vst [vmem:[#allocation21_spill] sm:$0xff] %v4058_v59  ;;  %v2865_v8 = vld [vmem:[#allocation2 + $0xc0] sm:$0xf] }
  0x35   :  { %3822 = vmatpush.bf16.msra.mxu3 %v3218_v55  ;;  %1336 = vmatpush.bf16.msra.mxu1 %v3218_v55  ;;  %v3035_v55 = vld [vmem:[#allocation2 + $0x228] sm:$0xf0]  ;;  %v3057_v10 = vld [vmem:[#allocation2 + $0x240] sm:$0xf]  ;;  %v3671_v12 = vld [vmem:[#allocation2 + $0x244] sm:$0xf]  ;;  %v4068_v16 = vor.u32 %v3626_v9, %v2865_v8 }
  0x36   :  { %v3623_v14 = vld [vmem:[#allocation2 + $0xc4] sm:$0xf]  ;;  %v2867_v15 = vld [vmem:[#allocation2 + $0xd8] sm:$0xf0]  ;;  %v3465_v20 = vld [vmem:[#allocation5 + $0x270] sm:$0xf] }
  0x37   :  { %1248 = vmatmul.bf16.vlgmr.msra.gmra.mxu0 %v4020_v0  ;;  %1288 = vmatmul.bf16.vlgmr.msra.gmra.mxu2 %v4022_v1  ;;  %v4074_v19 = vor.u32 %v3623_v14, %v2867_v15  ;;  %v3774_v21 = vld [vmem:[#allocation5 + $0x274] sm:$0xf0]  ;;  %v3289_v27 = vld [vmem:[#allocation5 + $0x110] sm:$0xf]  ;;  %v3457_v32 = vld [vmem:[#allocation5 + $0x260] sm:$0xf] }
  0x38   :  { %1418 = vmatpush.bf16.msrb.mxu2 %v3338_v58  ;;  %1377 = vmatmul.bf16.vlgmr.msra.gmra.mxu3 %v4024_v4  ;;  %v4056_v58 = vor.u32 %v3620_v51, %v2841_v50  ;;  %v3466_v26 = vor.u32 %v3774_v21, %v3465_v20  ;;  %v3730_v28 = vld [vmem:[#allocation5 + $0x114] sm:$0xf0]  ;;  %v3772_v33 = vld [vmem:[#allocation5 + $0x264] sm:$0xf0]  ;;  %v3449_v36 = vld [vmem:[#allocation5 + $0x250] sm:$0xf] }
  0x39   :  { %1507 = vmatpush.bf16.msrb.mxu3 %v3402_v60  ;;  %1337 = vmatmul.bf16.vlgmr.msra.gmra.mxu1 %v4026_v5  ;;  %v4060_v60 = vor.u32 %v3665_v54, %v3035_v55  ;;  %4903 = vst [vmem:[#allocation25_spill] sm:$0xff] %v4074_v19  ;;  %v3290_v30 = vor.u32 %v3730_v28, %v3289_v27  ;;  %v3770_v37 = vld [vmem:[#allocation5 + $0x254] sm:$0xf0]  ;;  %v3529_v38 = vld [vmem:[#allocation5 + $0x2f0] sm:$0xf] }
  0x3a   :  { %1596 = vmatpush.bf16.msrb.mxu0 %v3466_v26  ;;  %v3458_v35 = vor.u32 %v3772_v33, %v3457_v32  ;;  %v3790_v39 = vld [vmem:[#allocation5 + $0x2f4] sm:$0xf0]  ;;  %v3450_v44 = vor.u32 %v3770_v37, %v3449_v36  ;;  %v3441_v46 = vld [vmem:[#allocation5 + $0x240] sm:$0xf]  ;;  %v2889_v48 = vld [vmem:[#allocation2 + $0xf0] sm:$0xf] }
  0x3b   :  { %4900 = vst [vmem:[#allocation22_spill] sm:$0xff] %v4060_v60  ;;  %v3530_v45 = vor.u32 %v3790_v39, %v3529_v38  ;;  %v3081_v50 = vld [vmem:[#allocation2 + $0x270] sm:$0xf]  ;;  %v3680_v51 = vld [vmem:[#allocation2 + $0x284] sm:$0xf0] }
  0x3c   :  { %1419 = vmatpush.bf16.msrb.mxu2 %v3330_v6  ;;  %v3748_v6 = vld [vmem:[#allocation5 + $0x1a4] sm:$0xf0]  ;;  %v3677_v52 = vld [vmem:[#allocation2 + $0x274] sm:$0xf]  ;;  %v3083_v53 = vld [vmem:[#allocation2 + $0x288] sm:$0xf0]  ;;  %v4082_v62 = vor.u32 %v3680_v51, %v3081_v50 }
  0x3d   :  { %1508 = vmatpush.bf16.msrb.mxu3 %v3394_v7  ;;  %v3362_v7 = vor.u32 %v3748_v6, %v3361_v2  ;;  %1685 = vmatpush.bf16.msrb.mxu1 %v3530_v45  ;;  %v3629_v55 = vld [vmem:[#allocation2 + $0xf4] sm:$0xf]  ;;  %v2891_v56 = vld [vmem:[#allocation2 + $0x108] sm:$0xf0]  ;;  %v4084_v63 = vor.u32 %v3677_v52, %v3083_v53  ;;  %v3766_v6 = vld [vmem:[#allocation5 + $0x234] sm:$0xf0] }
  0x3e   :  { %1597 = vmatpush.bf16.msrb.mxu0 %v3458_v35  ;;  %4905 = vst [vmem:[#allocation27_spill] sm:$0xff] %v4082_v62  ;;  %v4086_v2 = vor.u32 %v3629_v55, %v2891_v56  ;;  %v3521_v8 = vld [vmem:[#allocation5 + $0x2e0] sm:$0xf]  ;;  %v3788_v9 = vld [vmem:[#allocation5 + $0x2e4] sm:$0xf0] }
  0x3f   :  { %4906 = vst [vmem:[#allocation28_spill] sm:$0xff] %v4084_v63  ;;  %v3744_v15 = vld [vmem:[#allocation5 + $0x184] sm:$0xf0]  ;;  %v3425_v20 = vld [vmem:[#allocation5 + $0x220] sm:$0xf] }
  0x40   :  { %1420 = vmatpush.bf16.msrb.mxu2 %v3322_v11  ;;  %v3674_v11 = vld [vmem:[#allocation2 + $0x254] sm:$0xf0]  ;;  %4907 = vst [vmem:[#allocation29_spill] sm:$0xff] %v4086_v2  ;;  %v3764_v21 = vld [vmem:[#allocation5 + $0x224] sm:$0xf0] }
  0x41   :  { %1509 = vmatpush.bf16.msrb.mxu3 %v3386_v13  ;;  %v3059_v13 = vld [vmem:[#allocation2 + $0x258] sm:$0xf0]  ;;  %v4070_v17 = vor.u32 %v3674_v11, %v3057_v10  ;;  %v3281_v10 = vld [vmem:[#allocation5 + $0x100] sm:$0xf]  ;;  %v3728_v11 = vld [vmem:[#allocation5 + $0x104] sm:$0xf0]  ;;  %v3426_v27 = vor.u32 %v3764_v21, %v3425_v20 }
  0x42   :  { %v4072_v18 = vor.u32 %v3671_v12, %v3059_v13  ;;  %1598 = vmatpush.bf16.msrb.mxu0 %v3450_v44  ;;  %v3522_v12 = vor.u32 %v3788_v9, %v3521_v8  ;;  %v3345_v13 = vld [vmem:[#allocation5 + $0x180] sm:$0xf]  ;;  %v3282_v14 = vor.u32 %v3728_v11, %v3281_v10  ;;  %v3513_v28 = vld [vmem:[#allocation5 + $0x2d0] sm:$0xf]  ;;  %v3762_v32 = vld [vmem:[#allocation5 + $0x214] sm:$0xf0] }
  0x43   :  { %4901 = vst [vmem:[#allocation23_spill] sm:$0xff] %v4070_v17  ;;  %v3346_v26 = vor.u32 %v3744_v15, %v3345_v13  ;;  %v3505_v33 = vld [vmem:[#allocation5 + $0x2c0] sm:$0xf]  ;;  %v3638_v38 = vld [vmem:[#allocation2 + $0x134] sm:$0xf0] }
  0x44   :  { %1421 = vmatpush.bf16.msrb.mxu2 %v3314_v29  ;;  %4902 = vst [vmem:[#allocation24_spill] sm:$0xff] %v4072_v18  ;;  %v3353_v29 = vld [vmem:[#allocation5 + $0x190] sm:$0xf]  ;;  %1686 = vmatpush.bf16.msrb.mxu1 %v3522_v12  ;;  %v2913_v37 = vld [vmem:[#allocation2 + $0x120] sm:$0xf] }
  0x45   :  { %1510 = vmatpush.bf16.msrb.mxu3 %v3378_v31  ;;  %v3746_v31 = vld [vmem:[#allocation5 + $0x194] sm:$0xf0]  ;;  %v3105_v39 = vld [vmem:[#allocation2 + $0x2a0] sm:$0xf]  ;;  %v3683_v45 = vld [vmem:[#allocation2 + $0x2a4] sm:$0xf]  ;;  %v4092_v52 = vor.u32 %v3638_v38, %v2913_v37 }
  0x46   :  { %v3354_v34 = vor.u32 %v3746_v31, %v3353_v29  ;;  %v3786_v29 = vld [vmem:[#allocation5 + $0x2d4] sm:$0xf0]  ;;  %v3760_v50 = vld [vmem:[#allocation5 + $0x204] sm:$0xf0]  ;;  %v3497_v51 = vld [vmem:[#allocation5 + $0x2b0] sm:$0xf] }
  0x47   :  { %1253 = vmatmul.bf16.gmra.mxu0 %v4032_v22  ;;  %1293 = vmatmul.bf16.gmra.mxu2 %v4034_v23  ;;  %v3514_v31 = vor.u32 %v3786_v29, %v3513_v28  ;;  %v3686_v44 = vld [vmem:[#allocation2 + $0x2b4] sm:$0xf0]  ;;  %4908 = vst [vmem:[#allocation30_spill] sm:$0xff] %v4092_v52  ;;  %v3780_v8 = vld [vmem:[#allocation5 + $0x2a4] sm:$0xf0] }
  0x48   :  { %1382 = vmatmul.bf16.gmra.mxu3 %v4036_v24  ;;  %1422 = vmatpush.bf16.msrb.mxu2 %v3306_v47  ;;  %v3768_v47 = vld [vmem:[#allocation5 + $0x244] sm:$0xf0]  ;;  %v4094_v53 = vor.u32 %v3686_v44, %v3105_v39  ;;  %v3782_v55 = vld [vmem:[#allocation5 + $0x2b4] sm:$0xf0]  ;;  %v3709_v9 = vld [vmem:[#allocation5 + $0x74] sm:$0xf] }
  0x49   :  { %1342 = vmatmul.bf16.gmra.mxu1 %v4038_v25  ;;  %1511 = vmatpush.bf16.msrb.mxu3 %v3370_v49  ;;  %v3632_v49 = vld [vmem:[#allocation2 + $0x104] sm:$0xf0]  ;;  %v3442_v54 = vor.u32 %v3768_v47, %v3441_v46  ;;  %v3107_v46 = vld [vmem:[#allocation2 + $0x2b8] sm:$0xf0]  ;;  %v3635_v47 = vld [vmem:[#allocation2 + $0x124] sm:$0xf] }
  0x4a   :  { %v4080_v57 = vor.u32 %v3632_v49, %v2889_v48  ;;  %1687 = vmatpush.bf16.msrb.mxu1 %v3514_v31  ;;  %v2915_v48 = vld [vmem:[#allocation2 + $0x138] sm:$0xf0]  ;;  %v3409_v49 = vld [vmem:[#allocation5 + $0x200] sm:$0xf]  ;;  %4909 = vst [vmem:[#allocation31_spill] sm:$0xff] %v4094_v53  ;;  %v4096_v56 = vor.u32 %v3683_v45, %v3107_v46 }
  0x4b   :  { %1599 = vmatpush.bf16.msrb.mxu0 %v3442_v54  ;;  %v3410_v54 = vor.u32 %v3760_v50, %v3409_v49  ;;  %v3211_v10 = vld [vmem:[#allocation5 + $0x78] sm:$0xf0]  ;;  %v3725_v12 = vld [vmem:[#allocation5 + $0xf4] sm:$0xf]  ;;  %v3481_v20 = vld [vmem:[#allocation5 + $0x290] sm:$0xf] }
  0x4c   :  { %1423 = vmatpush.bf16.msrb.mxu2 %v3298_v3  ;;  %4904 = vst [vmem:[#allocation26_spill] sm:$0xff] %v4080_v57  ;;  %v3433_v3 = vld [vmem:[#allocation5 + $0x230] sm:$0xf]  ;;  %v3214_v13 = vor.u32 %v3709_v9, %v3211_v10  ;;  %v3778_v21 = vld [vmem:[#allocation5 + $0x294] sm:$0xf0] }
  0x4d   :  { %1512 = vmatpush.bf16.msrb.mxu3 %v3362_v7  ;;  %v3434_v7 = vor.u32 %v3766_v6, %v3433_v3  ;;  %4910 = vst [vmem:[#allocation32_spill] sm:$0xff] %v4096_v56  ;;  %v3498_v3 = vor.u32 %v3782_v55, %v3497_v51  ;;  %v4098_v6 = vor.u32 %v3635_v47, %v2915_v48  ;;  %v3776_v28 = vld [vmem:[#allocation5 + $0x284] sm:$0xf0]  ;;  %v2939_v37 = vld [vmem:[#allocation2 + $0x168] sm:$0xf0] }
  0x4e   :  { %v3644_v31 = vld [vmem:[#allocation2 + $0x164] sm:$0xf0]  ;;  %v274_v46 = vld [vmem:[#allocation7] sm:$0x3]  ;;  %v2785_v49 = vld [vmem:[#allocation2 + $0x10] sm:$0xf] }
  0x4f   :  { %1600 = vmatpush.bf16.msrb.mxu0 %v3434_v7  ;;  %4911 = vst [vmem:[#allocation33_spill] sm:$0xff] %v4098_v6  ;;  %v3489_v7 = vld [vmem:[#allocation5 + $0x2a0] sm:$0xf]  ;;  %v2777_v47 = vld [vmem:[#allocation2 + $0x8] sm:$0xf] }
  0x50   :  { %1424 = vmatpush.bf16.msrb.mxu2 %v3290_v30  ;;  %v3417_v30 = vld [vmem:[#allocation5 + $0x210] sm:$0xf]  ;;  %v3490_v11 = vor.u32 %v3780_v8, %v3489_v7  ;;  %v3603_v48 = vld [vmem:[#allocation2 + $0x1c] sm:$0xf0]  ;;  %v3604_v50 = vld [vmem:[#allocation2 + $0x24] sm:$0xf0] }
  0x51   :  { %1513 = vmatpush.bf16.msrb.mxu3 %v3354_v34  ;;  %v3784_v34 = vld [vmem:[#allocation5 + $0x2c4] sm:$0xf0]  ;;  %v3418_v35 = vor.u32 %v3762_v32, %v3417_v30  ;;  %v2937_v30 = vld [vmem:[#allocation2 + $0x150] sm:$0xf]  ;;  %v3600_v51 = vld [vmem:[#allocation2 + $0xc] sm:$0xf]  ;;  %v4118_v8 = vor.u32 %v3603_v48, %v2777_v47  ;;  %v4120_v9 = vor.u32 %v3604_v50, %v2785_v49 }
  0x52   :  { %v3506_v36 = vor.u32 %v3784_v34, %v3505_v33  ;;  %v3129_v32 = vld [vmem:[#allocation2 + $0x2d0] sm:$0xf]  ;;  %v3692_v33 = vld [vmem:[#allocation2 + $0x2e4] sm:$0xf0]  ;;  %v3689_v34 = vld [vmem:[#allocation2 + $0x2d4] sm:$0xf]  ;;  %v4104_v38 = vor.u32 %v3644_v31, %v2937_v30 }
  0x53   :  { %1601 = vmatpush.bf16.msrb.mxu0 %v3426_v27  ;;  %v3473_v27 = vld [vmem:[#allocation5 + $0x280] sm:$0xf]  ;;  %v4106_v39 = vor.u32 %v3692_v33, %v3129_v32  ;;  %v3601_v55 = vld [vmem:[#allocation2 + $0x14] sm:$0xf]  ;;  %v4116_v7 = vperm.slane %v274_v46, 0  ;;  %4916 = vst [vmem:[#allocation38_spill] sm:$0xff] %v4120_v9 }
  0x54   :  { %1425 = vmatpush.bf16.msrb.mxu2 %v3282_v14  ;;  %1688 = vmatpush.bf16.msrb.mxu1 %v3506_v36  ;;  %v3275_v14 = vld [vmem:[#allocation5 + $0xf8] sm:$0xf0]  ;;  %v3474_v29 = vor.u32 %v3776_v28, %v3473_v27  ;;  %v3641_v36 = vld [vmem:[#allocation2 + $0x154] sm:$0xf]  ;;  %4912 = vst [vmem:[#allocation34_spill] sm:$0xff] %v4104_v38 }
  0x55   :  { %1514 = vmatpush.bf16.msrb.mxu3 %v3346_v26  ;;  %v3278_v15 = vor.u32 %v3725_v12, %v3275_v14  ;;  %v3482_v26 = vor.u32 %v3778_v21, %v3481_v20  ;;  %4913 = vst [vmem:[#allocation35_spill] sm:$0xff] %v4106_v39  ;;  %v4110_v45 = vor.u32 %v3641_v36, %v2939_v37  ;;  %v3707_v20 = vld [vmem:[#allocation5 + $0x64] sm:$0xf]  ;;  %v3203_v21 = vld [vmem:[#allocation5 + $0x68] sm:$0xf0] }
  0x56   :  { %v3206_v27 = vor.u32 %v3707_v20, %v3203_v21  ;;  %v3267_v28 = vld [vmem:[#allocation5 + $0xe8] sm:$0xf0]  ;;  %v2801_v37 = vld [vmem:[#allocation2 + $0x38] sm:$0xf]  ;;  %v3609_v47 = vld [vmem:[#allocation2 + $0x4c] sm:$0xf0] }
  0x57   :  { %1258 = vmatmul.bf16.gmra.mxu0 %v4044_v40  ;;  %1298 = vmatmul.bf16.gmra.mxu2 %v4046_v41  ;;  %4915 = vst [vmem:[#allocation37_spill] sm:$0xff] %v4110_v45  ;;  %v2809_v48 = vld [vmem:[#allocation2 + $0x40] sm:$0xf]  ;;  %v3610_v49 = vld [vmem:[#allocation2 + $0x54] sm:$0xf0] }
  0x58   :  { %1387 = vmatmul.bf16.gmra.mxu3 %v4048_v42  ;;  %1602 = vmatpush.bf16.msrb.mxu0 %v3418_v35  ;;  %v3131_v35 = vld [vmem:[#allocation2 + $0x2e8] sm:$0xf0]  ;;  %v3606_v50 = vld [vmem:[#allocation2 + $0x3c] sm:$0xf]  ;;  %v4142_v20 = vor.u32 %v3610_v49, %v2809_v48  ;;  %v2825_v49 = vld [vmem:[#allocation2 + $0x68] sm:$0xf] }
  0x59   :  { %1347 = vmatmul.bf16.gmra.mxu1 %v4050_v43  ;;  %1774 = vmatpush.bf16.msra.mxu2 %v3214_v13  ;;  %v4108_v44 = vor.u32 %v3689_v34, %v3131_v35  ;;  %v3633_v24 = vld [vmem:[#allocation2 + $0x10c] sm:$0xf0]  ;;  %v2899_v23 = vld [vmem:[#allocation2 + $0x110] sm:$0xf0] }
  0x5a   :  { %1689 = vmatpush.bf16.msrb.mxu1 %v3498_v3  ;;  %1863 = vmatpush.bf16.msra.mxu3 %v3278_v15  ;;  %v2787_v3 = vld [vmem:[#allocation2 + $0x28] sm:$0xf0]  ;;  %4918 = vst [vmem:[#allocation40_spill] sm:$0xff] %v4142_v20 }
  0x5b   :  { %4914 = vst [vmem:[#allocation36_spill] sm:$0xff] %v4108_v44  ;;  %v4125_v13 = vor.u32 %v3601_v55, %v2787_v3  ;;  %v3607_v55 = vld [vmem:[#allocation2 + $0x44] sm:$0xf]  ;;  %v2811_v3 = vld [vmem:[#allocation2 + $0x58] sm:$0xf0] }
  0x5c   :  { %1603 = vmatpush.bf16.msrb.mxu0 %v3410_v54  ;;  %v2779_v54 = vld [vmem:[#allocation2 + $0x20] sm:$0xf0] }
  0x5d   :  { %4917 = vst [vmem:[#allocation39_spill] sm:$0xff] %v4125_v13  ;;  %1775 = vmatpush.bf16.msra.mxu2 %v3206_v27 }
  0x5e   :  { %1690 = vmatpush.bf16.msrb.mxu1 %v3490_v11  ;;  %v4122_v11 = vor.u32 %v3600_v51, %v2779_v54  ;;  %v2803_v51 = vld [vmem:[#allocation2 + $0x50] sm:$0xf0] }
  0x62   :  { %1691 = vmatpush.bf16.msrb.mxu1 %v3482_v26  ;;  %v3723_v26 = vld [vmem:[#allocation5 + $0xe4] sm:$0xf] }
  0x63   :  { %v3270_v30 = vor.u32 %v3723_v26, %v3267_v28  ;;  %v4144_v26 = vor.u32 %v3606_v50, %v2803_v51  ;;  %v3615_v51 = vld [vmem:[#allocation2 + $0x7c] sm:$0xf0] }
  0x65   :  { %1864 = vmatpush.bf16.msra.mxu3 %v3270_v30 }
  0x66   :  { %1692 = vmatpush.bf16.msrb.mxu1 %v3474_v29 }
  0x67   :  { %1263 = vmatmul.bf16.gmra.mxu0 %v4056_v58  ;;  %1303 = vmatmul.bf16.gmra.mxu2 %v4058_v59 }
  0x68   :  { %1392 = vmatmul.bf16.gmra.mxu3 %v4060_v60 }
  0x69   :  { %1352 = vmatmul.bf16.gmra.mxu1 %v4062_v61 }
  0x77   :  { %1268 = vmatmul.bf16.gmra.mxu0 %v4068_v16  ;;  %1308 = vmatmul.bf16.gmra.mxu2 %v4070_v17 }
  0x78   :  { %1397 = vmatmul.bf16.gmra.mxu3 %v4072_v18  ;;  %v2883_v18 = vld [vmem:[#allocation2 + $0xe8] sm:$0xf0] }
  0x79   :  { %1357 = vmatmul.bf16.gmra.mxu1 %v4074_v19  ;;  %v3655_v19 = vld [vmem:[#allocation2 + $0x1c4] sm:$0xf] }
  0x87   :  { %1273 = vmatmul.bf16.gmra.mxu0 %v4080_v57  ;;  %1313 = vmatmul.bf16.gmra.mxu2 %v4082_v62 }
  0x88   :  { %1402 = vmatmul.bf16.gmra.mxu3 %v4084_v63 }
  0x89   :  { %1362 = vmatmul.bf16.gmra.mxu1 %v4086_v2 }
  0x97   :  { %1278 = vmatmul.bf16.gmra.mxu0 %v4092_v52  ;;  %1318 = vmatmul.bf16.gmra.mxu2 %v4094_v53 }
  0x98   :  { %1407 = vmatmul.bf16.gmra.mxu3 %v4096_v56 }
  0x99   :  { %1367 = vmatmul.bf16.gmra.mxu1 %v4098_v6  ;;  %v2931_v6 = vld [vmem:[#allocation2 + $0x148] sm:$0xf0] }
  0xa7   :  { %1283 = vmatmul.bf16.gmra.mxu0 %v4104_v38  ;;  %1323 = vmatmul.bf16.gmra.mxu2 %v4106_v39  ;;  %v2851_v39 = vld [vmem:[#allocation2 + $0xb0] sm:$0xf0] }
  0xa8   :  { %1412 = vmatmul.bf16.gmra.mxu3 %v4108_v44  ;;  %v3621_v44 = vld [vmem:[#allocation2 + $0xac] sm:$0xf0] }
  0xa9   :  { %1372 = vmatmul.bf16.gmra.mxu1 %v4110_v45 }
  0xb4   :  { %v1249_v10 = vpop.f32.mrf.mxu0 }
  0xb5   :  { %v1250_v12 = vadd.f32 %v1249_v10, %v4116_v7 }
  0xb6   :  { %v1338_v14 = vpop.f32.mrf.mxu1 }
  0xb7   :  { %1426 = vmatmul.bf16.vlgmr.msrb.gmra.mxu2 %v4118_v8  ;;  %1604 = vmatmul.bf16.vlgmr.msrb.gmra.mxu0 %v4120_v9  ;;  %v4129_v15 = vadd.f32 %v1338_v14, %v1250_v12  ;;  %v4140_v14 = vor.u32 %v3609_v47, %v2801_v37 }
  0xb8   :  { %1515 = vmatmul.bf16.vlgmr.msrb.gmra.mxu3 %v4122_v11 }
  0xb9   :  { %1693 = vmatmul.bf16.vlgmr.msrb.gmra.mxu1 %v4125_v13 }
  0xba   :  { %v1289_v29 = vpop.f32.mrf.mxu2 }
  0xbb   :  { %v1290_v31 = vadd.f32 %v1289_v29, %v4116_v7  ;;  %v1378_v32 = vpop.f32.mrf.mxu3  ;;  %v4149_v29 = vor.u32 %v3607_v55, %v2811_v3  ;;  %v3616_v55 = vld [vmem:[#allocation2 + $0x84] sm:$0xf0]  ;;  %v3612_v3 = vld [vmem:[#allocation2 + $0x6c] sm:$0xf] }
  0xbc   :  { %v1251_v33 = vpop.f32.mrf.mxu0 }
  0xbd   :  { %v4134_v34 = vadd.f32 %v1378_v32, %v1290_v31  ;;  %v1252_v35 = vadd.f32 %v1251_v33, %v4116_v7  ;;  %4919 = vst [vmem:[#allocation41_spill] sm:$0xff] %v4149_v29 }
  0xbe   :  { %v1340_v36 = vpop.f32.mrf.mxu1 }
  0xbf   :  { %v4137_v46 = vadd.f32 %v1340_v36, %v1252_v35 }
  0xc2   :  { %v1291_v54 = vpop.f32.mrf.mxu2 }
  0xc3   :  { %v1292_v10 = vadd.f32 %v1291_v54, %v4116_v7  ;;  %v1380_v12 = vpop.f32.mrf.mxu3  ;;  %v2833_v54 = vld [vmem:[#allocation2 + $0x70] sm:$0xf] }
  0xc4   :  { %v1254_v21 = vpop.f32.mrf.mxu0 }
  0xc5   :  { %v4146_v27 = vadd.f32 %v1380_v12, %v1292_v10  ;;  %v1255_v28 = vadd.f32 %v1254_v21, %v4116_v7  ;;  %v2827_v10 = vld [vmem:[#allocation2 + $0x80] sm:$0xf0]  ;;  %v3613_v21 = vld [vmem:[#allocation2 + $0x74] sm:$0xf] }
  0xc6   :  { %v1343_v30 = vpop.f32.mrf.mxu1 }
  0xc7   :  { %1431 = vmatmul.bf16.gmra.mxu2 %v4140_v14  ;;  %1609 = vmatmul.bf16.gmra.mxu0 %v4142_v20  ;;  %v4153_v31 = vadd.f32 %v1343_v30, %v1255_v28  ;;  %v2835_v28 = vld [vmem:[#allocation2 + $0x88] sm:$0xf0] }
  0xc8   :  { %1520 = vmatmul.bf16.gmra.mxu3 %v4144_v26  ;;  %v4173_v20 = vor.u32 %v3613_v21, %v2835_v28 }
  0xc9   :  { %1698 = vmatmul.bf16.gmra.mxu1 %v4149_v29  ;;  %v4164_v29 = vor.u32 %v3615_v51, %v2825_v49  ;;  %v3705_v49 = vld [vmem:[#allocation5 + $0x54] sm:$0xf]  ;;  %v3195_v51 = vld [vmem:[#allocation5 + $0x58] sm:$0xf0] }
  0xca   :  { %v1294_v32 = vpop.f32.mrf.mxu2  ;;  %4921 = vst [vmem:[#allocation43_spill] sm:$0xff] %v4173_v20 }
  0xcb   :  { %v1295_v33 = vadd.f32 %v1294_v32, %v4116_v7  ;;  %v1383_v35 = vpop.f32.mrf.mxu3 }
  0xcc   :  { %v1256_v36 = vpop.f32.mrf.mxu0 }
  0xcd   :  { %v4158_v37 = vadd.f32 %v1383_v35, %v1295_v33  ;;  %v1257_v47 = vadd.f32 %v1256_v36, %v4116_v7  ;;  %v4166_v33 = vor.u32 %v3616_v55, %v2833_v54  ;;  %v4168_v36 = vor.u32 %v3612_v3, %v2827_v10  ;;  %v3721_v54 = vld [vmem:[#allocation5 + $0xd4] sm:$0xf]  ;;  %v3259_v3 = vld [vmem:[#allocation5 + $0xd8] sm:$0xf0] }
  0xce   :  { %v1345_v48 = vpop.f32.mrf.mxu1  ;;  %v3198_v55 = vor.u32 %v3705_v49, %v3195_v51  ;;  %v3622_v49 = vld [vmem:[#allocation2 + $0xb4] sm:$0xf0]  ;;  %v3618_v51 = vld [vmem:[#allocation2 + $0x9c] sm:$0xf] }
  0xcf   :  { %v4161_v50 = vadd.f32 %v1345_v48, %v1257_v47  ;;  %4920 = vst [vmem:[#allocation42_spill] sm:$0xff] %v4166_v33 }
  0xd0   :  { %1776 = vmatpush.bf16.msra.mxu2 %v3198_v55 }
  0xd2   :  { %v1296_v12 = vpop.f32.mrf.mxu2 }
  0xd3   :  { %v1297_v30 = vadd.f32 %v1296_v12, %v4116_v7  ;;  %v1385_v32 = vpop.f32.mrf.mxu3 }
  0xd4   :  { %v1259_v35 = vpop.f32.mrf.mxu0 }
  0xd5   :  { %v4170_v47 = vadd.f32 %v1385_v32, %v1297_v30  ;;  %v1260_v48 = vadd.f32 %v1259_v35, %v4116_v7  ;;  %v3262_v30 = vor.u32 %v3721_v54, %v3259_v3  ;;  %v3619_v3 = vld [vmem:[#allocation2 + $0xa4] sm:$0xf] }
  0xd6   :  { %v1348_v13 = vpop.f32.mrf.mxu1 }
  0xd7   :  { %1436 = vmatmul.bf16.gmra.mxu2 %v4164_v29  ;;  %1614 = vmatmul.bf16.gmra.mxu0 %v4166_v33  ;;  %v4177_v12 = vadd.f32 %v1348_v13, %v1260_v48  ;;  %v2849_v33 = vld [vmem:[#allocation2 + $0x98] sm:$0xf] }
  0xd8   :  { %1525 = vmatmul.bf16.gmra.mxu3 %v4168_v36 }
  0xd9   :  { %1703 = vmatmul.bf16.gmra.mxu1 %v4173_v20  ;;  %1865 = vmatpush.bf16.msra.mxu3 %v3262_v30  ;;  %v2857_v20 = vld [vmem:[#allocation2 + $0xa0] sm:$0xf]  ;;  %v4188_v30 = vor.u32 %v3621_v44, %v2849_v33 }
  0xda   :  { %v1299_v10 = vpop.f32.mrf.mxu2 }
  0xdb   :  { %v1300_v21 = vadd.f32 %v1299_v10, %v4116_v7  ;;  %v1388_v28 = vpop.f32.mrf.mxu3  ;;  %v2859_v10 = vld [vmem:[#allocation2 + $0xb8] sm:$0xf0] }
  0xdc   :  { %v1261_v32 = vpop.f32.mrf.mxu0  ;;  %v4197_v53 = vor.u32 %v3619_v3, %v2859_v10  ;;  %v2873_v3 = vld [vmem:[#allocation2 + $0xc8] sm:$0xf] }
  0xdd   :  { %v4182_v35 = vadd.f32 %v1388_v28, %v1300_v21  ;;  %v1262_v13 = vadd.f32 %v1261_v32, %v4116_v7  ;;  %v4190_v21 = vor.u32 %v3622_v49, %v2857_v20  ;;  %v4192_v32 = vor.u32 %v3618_v51, %v2851_v39 }
  0xde   :  { %v1350_v48 = vpop.f32.mrf.mxu1  ;;  %4923 = vst [vmem:[#allocation45_spill] sm:$0xff] %v4197_v53 }
  0xdf   :  { %v4185_v9 = vadd.f32 %v1350_v48, %v1262_v13  ;;  %4922 = vst [vmem:[#allocation44_spill] sm:$0xff] %v4190_v21 }
  0xe2   :  { %v1301_v54 = vpop.f32.mrf.mxu2 }
  0xe3   :  { %v1302_v55 = vadd.f32 %v1301_v54, %v4116_v7  ;;  %v1390_v56 = vpop.f32.mrf.mxu3 }
  0xe4   :  { %v1264_v28 = vpop.f32.mrf.mxu0 }
  0xe5   :  { %v4194_v13 = vadd.f32 %v1390_v56, %v1302_v55  ;;  %v1265_v48 = vadd.f32 %v1264_v28, %v4116_v7  ;;  %v3627_v55 = vld [vmem:[#allocation2 + $0xdc] sm:$0xf0]  ;;  %v3628_v28 = vld [vmem:[#allocation2 + $0xe4] sm:$0xf0] }
  0xe6   :  { %v1353_v63 = vpop.f32.mrf.mxu1  ;;  %v4212_v60 = vor.u32 %v3627_v55, %v2873_v3  ;;  %v3703_v3 = vld [vmem:[#allocation5 + $0x44] sm:$0xf]  ;;  %v3187_v55 = vld [vmem:[#allocation5 + $0x48] sm:$0xf0] }
  0xe7   :  { %1441 = vmatmul.bf16.gmra.mxu2 %v4188_v30  ;;  %1619 = vmatmul.bf16.gmra.mxu0 %v4190_v21  ;;  %v4201_v54 = vadd.f32 %v1353_v63, %v1265_v48  ;;  %v2881_v63 = vld [vmem:[#allocation2 + $0xd0] sm:$0xf]  ;;  %v3624_v48 = vld [vmem:[#allocation2 + $0xcc] sm:$0xf]  ;;  %v2875_v21 = vld [vmem:[#allocation2 + $0xe0] sm:$0xf0] }
  0xe8   :  { %1530 = vmatmul.bf16.gmra.mxu3 %v4192_v32  ;;  %4924 = vst [vmem:[#allocation46_spill] sm:$0xff] %v4212_v60 }
  0xe9   :  { %1708 = vmatmul.bf16.gmra.mxu1 %v4197_v53  ;;  %v3625_v53 = vld [vmem:[#allocation2 + $0xd4] sm:$0xf] }
  0xea   :  { %v1304_v44 = vpop.f32.mrf.mxu2  ;;  %v4221_v59 = vor.u32 %v3625_v53, %v2883_v18 }
  0xeb   :  { %v1305_v39 = vadd.f32 %v1304_v44, %v4116_v7  ;;  %v1393_v56 = vpop.f32.mrf.mxu3 }
  0xec   :  { %v1266_v20 = vpop.f32.mrf.mxu0  ;;  %4927 = vst [vmem:[#allocation49_spill] sm:$0xff] %v4221_v59 }
  0xed   :  { %v4206_v33 = vadd.f32 %v1393_v56, %v1305_v39  ;;  %v1267_v49 = vadd.f32 %v1266_v20, %v4116_v7  ;;  %v4214_v39 = vor.u32 %v3628_v28, %v2881_v63  ;;  %v4216_v20 = vor.u32 %v3624_v48, %v2875_v21  ;;  %v3719_v63 = vld [vmem:[#allocation5 + $0xc4] sm:$0xf]  ;;  %v3251_v21 = vld [vmem:[#allocation5 + $0xc8] sm:$0xf0] }
  0xee   :  { %v1355_v51 = vpop.f32.mrf.mxu1  ;;  %v3254_v48 = vor.u32 %v3719_v63, %v3251_v21  ;;  %v3631_v21 = vld [vmem:[#allocation2 + $0x104] sm:$0xf] }
  0xef   :  { %v4209_v10 = vadd.f32 %v1355_v51, %v1267_v49  ;;  %4925 = vst [vmem:[#allocation47_spill] sm:$0xff] %v4214_v39 }
  0xf0   :  { %4926 = vst [vmem:[#allocation48_spill] sm:$0xff] %v4216_v20  ;;  %1866 = vmatpush.bf16.msra.mxu3 %v3254_v48 }
  0xf2   :  { %v1306_v62 = vpop.f32.mrf.mxu2 }
  0xf3   :  { %v1307_v44 = vadd.f32 %v1306_v62, %v4116_v7  ;;  %v1395_v17 = vpop.f32.mrf.mxu3 }
  0xf4   :  { %v1269_v56 = vpop.f32.mrf.mxu0 }
  0xf5   :  { %v4218_v49 = vadd.f32 %v1395_v17, %v1307_v44  ;;  %v1270_v51 = vadd.f32 %v1269_v56, %v4116_v7  ;;  %v3190_v17 = vor.u32 %v3703_v3, %v3187_v55  ;;  %v3634_v3 = vld [vmem:[#allocation2 + $0x114] sm:$0xf0]  ;;  %v3630_v55 = vld [vmem:[#allocation2 + $0xfc] sm:$0xf] }
  0xf6   :  { %v1358_v42 = vpop.f32.mrf.mxu1 }
  0xf7   :  { %1446 = vmatmul.bf16.gmra.mxu2 %v4212_v60  ;;  %1624 = vmatmul.bf16.gmra.mxu0 %v4214_v39  ;;  %v4225_v62 = vadd.f32 %v1358_v42, %v1270_v51  ;;  %v2897_v39 = vld [vmem:[#allocation2 + $0xf8] sm:$0xf] }
  0xf8   :  { %1535 = vmatmul.bf16.gmra.mxu3 %v4216_v20  ;;  %1777 = vmatpush.bf16.msra.mxu2 %v3190_v17  ;;  %v4236_v48 = vor.u32 %v3633_v24, %v2897_v39 }
  0xf9   :  { %1713 = vmatmul.bf16.gmra.mxu1 %v4221_v59  ;;  %v2905_v59 = vld [vmem:[#allocation2 + $0x100] sm:$0xf] }
  0xfa   :  { %v1309_v28 = vpop.f32.mrf.mxu2  ;;  %4929 = vst [vmem:[#allocation51_spill] sm:$0xff] %v4236_v48 }
  0xfb   :  { %v1310_v18 = vadd.f32 %v1309_v28, %v4116_v7  ;;  %v1398_v53 = vpop.f32.mrf.mxu3  ;;  %v2907_v28 = vld [vmem:[#allocation2 + $0x118] sm:$0xf0] }
  0xfc   :  { %v1271_v44 = vpop.f32.mrf.mxu0  ;;  %v4245_v1 = vor.u32 %v3631_v21, %v2907_v28  ;;  %v2921_v21 = vld [vmem:[#allocation2 + $0x128] sm:$0xf] }
  0xfd   :  { %v4230_v56 = vadd.f32 %v1398_v53, %v1310_v18  ;;  %v1272_v42 = vadd.f32 %v1271_v44, %v4116_v7  ;;  %v4238_v18 = vor.u32 %v3634_v3, %v2905_v59  ;;  %v4240_v44 = vor.u32 %v3630_v55, %v2899_v23 }
  0xfe   :  { %v1360_v51 = vpop.f32.mrf.mxu1  ;;  %4933 = vst [vmem:[#allocation55_spill] sm:$0xff] %v4245_v1 }
  0xff   :  { %4928 = vst [vmem:[#allocation50_spill] sm:$0xff] %v4230_v56  ;;  %v4233_v41 = vadd.f32 %v1360_v51, %v1272_v42 }
 0x100   :  { %4930 = vst [vmem:[#allocation52_spill] sm:$0xff] %v4238_v18 }
 0x101   :  { %4931 = vst [vmem:[#allocation53_spill] sm:$0xff] %v4240_v44 }
 0x102   :  { %v1311_v63 = vpop.f32.mrf.mxu2 }
 0x103   :  { %v1312_v17 = vadd.f32 %v1311_v63, %v4116_v7  ;;  %v1400_v4 = vpop.f32.mrf.mxu3 }
 0x104   :  { %v1274_v53 = vpop.f32.mrf.mxu0 }
 0x105   :  { %v4242_v42 = vadd.f32 %v1400_v4, %v1312_v17  ;;  %v1275_v51 = vadd.f32 %v1274_v53, %v4116_v7  ;;  %v3639_v17 = vld [vmem:[#allocation2 + $0x13c] sm:$0xf0]  ;;  %v3640_v53 = vld [vmem:[#allocation2 + $0x144] sm:$0xf0] }
 0x106   :  { %v1363_v45 = vpop.f32.mrf.mxu1 }
 0x107   :  { %4932 = vst [vmem:[#allocation54_spill] sm:$0xff] %v4242_v42  ;;  %1451 = vmatmul.bf16.gmra.mxu2 %v4236_v48  ;;  %1629 = vmatmul.bf16.gmra.mxu0 %v4238_v18  ;;  %v4249_v63 = vadd.f32 %v1363_v45, %v1275_v51  ;;  %v2929_v45 = vld [vmem:[#allocation2 + $0x130] sm:$0xf]  ;;  %v3636_v51 = vld [vmem:[#allocation2 + $0x12c] sm:$0xf] }
 0x108   :  { %1540 = vmatmul.bf16.gmra.mxu3 %v4240_v44  ;;  %v2923_v18 = vld [vmem:[#allocation2 + $0x140] sm:$0xf0]  ;;  %v4260_v44 = vor.u32 %v3639_v17, %v2921_v21  ;;  %v3701_v21 = vld [vmem:[#allocation5 + $0x34] sm:$0xf]  ;;  %v3179_v17 = vld [vmem:[#allocation5 + $0x38] sm:$0xf0] }
 0x109   :  { %1718 = vmatmul.bf16.gmra.mxu1 %v4245_v1  ;;  %v3637_v1 = vld [vmem:[#allocation2 + $0x134] sm:$0xf]  ;;  %v2971_v42 = vld [vmem:[#allocation2 + $0x1a0] sm:$0xf0] }
 0x10a   :  { %v1314_v24 = vpop.f32.mrf.mxu2  ;;  %4935 = vst [vmem:[#allocation57_spill] sm:$0xff] %v4260_v44 }
 0x10b   :  { %v1315_v23 = vadd.f32 %v1314_v24, %v4116_v7  ;;  %v1403_v4 = vpop.f32.mrf.mxu3 }
 0x10c   :  { %v1276_v59 = vpop.f32.mrf.mxu0 }
 0x10d   :  { %v4254_v39 = vadd.f32 %v1403_v4, %v1315_v23  ;;  %v1277_v3 = vadd.f32 %v1276_v59, %v4116_v7  ;;  %v4262_v23 = vor.u32 %v3640_v53, %v2929_v45  ;;  %v4264_v59 = vor.u32 %v3636_v51, %v2923_v18  ;;  %v3717_v45 = vld [vmem:[#allocation5 + $0xb4] sm:$0xf]  ;;  %v3243_v18 = vld [vmem:[#allocation5 + $0xb8] sm:$0xf0] }
 0x10e   :  { %v1365_v55 = vpop.f32.mrf.mxu1  ;;  %v3246_v51 = vor.u32 %v3717_v45, %v3243_v18  ;;  %v3643_v18 = vld [vmem:[#allocation2 + $0x164] sm:$0xf] }
 0x10f   :  { %4934 = vst [vmem:[#allocation56_spill] sm:$0xff] %v4254_v39  ;;  %v4257_v28 = vadd.f32 %v1365_v55, %v1277_v3  ;;  %v4269_v39 = vor.u32 %v3637_v1, %v2931_v6 }
 0x110   :  { %4936 = vst [vmem:[#allocation58_spill] sm:$0xff] %v4262_v23  ;;  %1867 = vmatpush.bf16.msra.mxu3 %v3246_v51 }
 0x111   :  { %4937 = vst [vmem:[#allocation59_spill] sm:$0xff] %v4264_v59 }
 0x112   :  { %v1316_v38 = vpop.f32.mrf.mxu2  ;;  %4939 = vst [vmem:[#allocation61_spill] sm:$0xff] %v4269_v39 }
 0x113   :  { %v1317_v24 = vadd.f32 %v1316_v38, %v4116_v7  ;;  %v1405_v52 = vpop.f32.mrf.mxu3 }
 0x114   :  { %v1279_v4 = vpop.f32.mrf.mxu0 }
 0x115   :  { %v4266_v3 = vadd.f32 %v1405_v52, %v1317_v24  ;;  %v1280_v55 = vadd.f32 %v1279_v4, %v4116_v7  ;;  %v3182_v52 = vor.u32 %v3701_v21, %v3179_v17  ;;  %v3646_v21 = vld [vmem:[#allocation2 + $0x174] sm:$0xf0]  ;;  %v3642_v17 = vld [vmem:[#allocation2 + $0x15c] sm:$0xf] }
 0x116   :  { %v1368_v2 = vpop.f32.mrf.mxu1 }
 0x117   :  { %4938 = vst [vmem:[#allocation60_spill] sm:$0xff] %v4266_v3  ;;  %1456 = vmatmul.bf16.gmra.mxu2 %v4260_v44  ;;  %1634 = vmatmul.bf16.gmra.mxu0 %v4262_v23  ;;  %v4273_v38 = vadd.f32 %v1368_v2, %v1280_v55  ;;  %v2945_v23 = vld [vmem:[#allocation2 + $0x158] sm:$0xf]  ;;  %v3645_v44 = vld [vmem:[#allocation2 + $0x16c] sm:$0xf0] }
 0x118   :  { %1545 = vmatmul.bf16.gmra.mxu3 %v4264_v59  ;;  %1778 = vmatpush.bf16.msra.mxu2 %v3182_v52  ;;  %v2947_v3 = vld [vmem:[#allocation2 + $0x170] sm:$0xf0]  ;;  %v4284_v51 = vor.u32 %v3645_v44, %v2945_v23 }
 0x119   :  { %1723 = vmatmul.bf16.gmra.mxu1 %v4269_v39  ;;  %v2953_v39 = vld [vmem:[#allocation2 + $0x160] sm:$0xf] }
 0x11a   :  { %v1319_v53 = vpop.f32.mrf.mxu2  ;;  %4941 = vst [vmem:[#allocation63_spill] sm:$0xff] %v4284_v51 }
 0x11b   :  { %v1320_v1 = vadd.f32 %v1319_v53, %v4116_v7  ;;  %v1408_v6 = vpop.f32.mrf.mxu3  ;;  %v2955_v53 = vld [vmem:[#allocation2 + $0x178] sm:$0xf0] }
 0x11c   :  { %v1281_v24 = vpop.f32.mrf.mxu0 }
 0x11d   :  { %v4278_v4 = vadd.f32 %v1408_v6, %v1320_v1  ;;  %v1282_v2 = vadd.f32 %v1281_v24, %v4116_v7  ;;  %v4286_v1 = vor.u32 %v3646_v21, %v2953_v39  ;;  %v4288_v24 = vor.u32 %v3642_v17, %v2947_v3  ;;  %v3741_v17 = vld [vmem:[#allocation5 + $0x174] sm:$0xf] }
 0x11e   :  { %v1370_v55 = vpop.f32.mrf.mxu1 }
 0x11f   :  { %4940 = vst [vmem:[#allocation62_spill] sm:$0xff] %v4278_v4  ;;  %v4281_v59 = vadd.f32 %v1370_v55, %v1282_v2  ;;  %v4293_v4 = vor.u32 %v3643_v18, %v2955_v53  ;;  %v3339_v18 = vld [vmem:[#allocation5 + $0x178] sm:$0xf0]  ;;  %v3757_v53 = vld [vmem:[#allocation5 + $0x1f4] sm:$0xf] }
 0x120   :  { %4942 = vst [vmem:[#allocation64_spill] sm:$0xff] %v4286_v1 }
 0x121   :  { %4943 = vst [vmem:[#allocation65_spill] sm:$0xff] %v4288_v24 }
 0x122   :  { %v1321_v45 = vpop.f32.mrf.mxu2  ;;  %4945 = vst [vmem:[#allocation67_spill] sm:$0xff] %v4293_v4 }
 0x123   :  { %v1322_v52 = vadd.f32 %v1321_v45, %v4116_v7  ;;  %v1410_v48 = vpop.f32.mrf.mxu3 }
 0x124   :  { %v1284_v6 = vpop.f32.mrf.mxu0 }
 0x125   :  { %v4290_v2 = vadd.f32 %v1410_v48, %v1322_v52  ;;  %v1285_v55 = vadd.f32 %v1284_v6, %v4116_v7  ;;  %v3342_v6 = vor.u32 %v3741_v17, %v3339_v18 }
 0x126   :  { %v1373_v57 = vpop.f32.mrf.mxu1 }
 0x127   :  { %4944 = vst [vmem:[#allocation66_spill] sm:$0xff] %v4290_v2  ;;  %1461 = vmatmul.bf16.gmra.mxu2 %v4284_v51  ;;  %1639 = vmatmul.bf16.gmra.mxu0 %v4286_v1  ;;  %v4297_v45 = vadd.f32 %v1373_v57, %v1285_v55  ;;  %v3403_v57 = vld [vmem:[#allocation5 + $0x1f8] sm:$0xf0]  ;;  %v2969_v55 = vld [vmem:[#allocation2 + $0x188] sm:$0xf] }
 0x128   :  { %1550 = vmatmul.bf16.gmra.mxu3 %v4288_v24  ;;  %v3406_v24 = vor.u32 %v3757_v53, %v3403_v57  ;;  %v2977_v51 = vld [vmem:[#allocation2 + $0x190] sm:$0xf]  ;;  %v3652_v2 = vld [vmem:[#allocation2 + $0x1a4] sm:$0xf0]  ;;  %1952 = vmatpush.bf16.msra.mxu0 %v3342_v6 }
 0x129   :  { %1728 = vmatmul.bf16.gmra.mxu1 %v4293_v4  ;;  %v3651_v4 = vld [vmem:[#allocation2 + $0x19c] sm:$0xf0]  ;;  %v4310_v17 = vor.u32 %v3652_v2, %v2977_v51 }
 0x12a   :  { %v1324_v44 = vpop.f32.mrf.mxu2  ;;  %2041 = vmatpush.bf16.msra.mxu1 %v3406_v24  ;;  %v4308_v20 = vor.u32 %v3651_v4, %v2969_v55  ;;  %v3171_v24 = vld [vmem:[#allocation5 + $0x28] sm:$0xf0] }
 0x12b   :  { %v1325_v39 = vadd.f32 %v1324_v44, %v4116_v7  ;;  %v1413_v48 = vpop.f32.mrf.mxu3  ;;  %v3648_v44 = vld [vmem:[#allocation2 + $0x18c] sm:$0xf]  ;;  %4948 = vst [vmem:[#allocation70_spill] sm:$0xff] %v4310_v17 }
 0x12c   :  { %v1286_v23 = vpop.f32.mrf.mxu0  ;;  %4947 = vst [vmem:[#allocation69_spill] sm:$0xff] %v4308_v20  ;;  %v4312_v18 = vor.u32 %v3648_v44, %v2971_v42 }
 0x12d   :  { %v4302_v3 = vadd.f32 %v1413_v48, %v1325_v39  ;;  %v1287_v21 = vadd.f32 %v1286_v23, %v4116_v7  ;;  %v3649_v48 = vld [vmem:[#allocation2 + $0x194] sm:$0xf]  ;;  %v2979_v23 = vld [vmem:[#allocation2 + $0x1a8] sm:$0xf0] }
 0x12e   :  { %v1375_v52 = vpop.f32.mrf.mxu1  ;;  %4949 = vst [vmem:[#allocation71_spill] sm:$0xff] %v4312_v18 }
 0x12f   :  { %4946 = vst [vmem:[#allocation68_spill] sm:$0xff] %v4302_v3  ;;  %v4305_v1 = vadd.f32 %v1375_v52, %v1287_v21  ;;  %v4316_v52 = vor.u32 %v3649_v48, %v2979_v23  ;;  %v2993_v23 = vld [vmem:[#allocation2 + $0x1b8] sm:$0xf] }
 0x131   :  { %4951 = vst [vmem:[#allocation73_spill] sm:$0xff] %v4316_v52 }
 0x132   :  { %v1326_v39 = vpop.f32.mrf.mxu2 }
 0x133   :  { %v1327_v3 = vadd.f32 %v1326_v39, %v4116_v7  ;;  %v1415_v56 = vpop.f32.mrf.mxu3  ;;  %v3699_v7 = vld [vmem:[#allocation5 + $0x24] sm:$0xf] }
 0x134   :  { %v1605_v21 = vpop.f32.mrf.mxu0  ;;  %v3174_v4 = vor.u32 %v3699_v7, %v3171_v24  ;;  %v2995_v7 = vld [vmem:[#allocation2 + $0x1d0] sm:$0xf0] }
 0x135   :  { %v4314_v53 = vadd.f32 %v1415_v56, %v1327_v3  ;;  %v3715_v56 = vld [vmem:[#allocation5 + $0xa4] sm:$0xf]  ;;  %v3235_v3 = vld [vmem:[#allocation5 + $0xa8] sm:$0xf0] }
 0x136   :  { %v1694_v6 = vpop.f32.mrf.mxu1  ;;  %1779 = vmatpush.bf16.msra.mxu2 %v3174_v4  ;;  %v3238_v55 = vor.u32 %v3715_v56, %v3235_v3 }
 0x137   :  { %4950 = vst [vmem:[#allocation72_spill] sm:$0xff] %v4314_v53  ;;  %1466 = vmatmul.bf16.gmra.mxu2 %v4308_v20  ;;  %1644 = vmatmul.bf16.gmra.mxu0 %v4310_v17  ;;  %v3657_v17 = vld [vmem:[#allocation2 + $0x1cc] sm:$0xf0]  ;;  %v3658_v20 = vld [vmem:[#allocation2 + $0x1d4] sm:$0xf0] }
 0x138   :  { %1555 = vmatmul.bf16.gmra.mxu3 %v4312_v18  ;;  %v3001_v18 = vld [vmem:[#allocation2 + $0x1c0] sm:$0xf]  ;;  %v4324_v60 = vor.u32 %v3657_v17, %v2993_v23 }
 0x139   :  { %1733 = vmatmul.bf16.gmra.mxu1 %v4316_v52  ;;  %1868 = vmatpush.bf16.msra.mxu3 %v3238_v55  ;;  %v3654_v52 = vld [vmem:[#allocation2 + $0x1bc] sm:$0xf]  ;;  %v4326_v56 = vor.u32 %v3658_v20, %v3001_v18 }
 0x13a   :  { %v1427_v51 = vpop.f32.mrf.mxu2  ;;  %4952 = vst [vmem:[#allocation74_spill] sm:$0xff] %v4324_v60 }
 0x13b   :  { %v1428_v42 = vadd.f32 %v1427_v51, %v4129_v15  ;;  %v1516_v2 = vpop.f32.mrf.mxu3  ;;  %v3003_v15 = vld [vmem:[#allocation2 + $0x1d8] sm:$0xf0]  ;;  %4953 = vst [vmem:[#allocation75_spill] sm:$0xff] %v4326_v56 }
 0x13c   :  { %v1607_v57 = vpop.f32.mrf.mxu0  ;;  %v4330_v3 = vor.u32 %v3655_v19, %v3003_v15  ;;  %v3331_v19 = vld [vmem:[#allocation5 + $0x168] sm:$0xf0] }
 0x13d   :  { %v1517_v44 = vadd.f32 %v1516_v2, %v1428_v42  ;;  %v4328_v2 = vor.u32 %v3654_v52, %v2995_v7 }
 0x13e   :  { %v1696_v39 = vpop.f32.mrf.mxu1  ;;  %4955 = vst [vmem:[#allocation77_spill] sm:$0xff] %v4330_v3 }
 0x13f   :  { %v1606_v48 = vadd.f32 %v1605_v21, %v1517_v44  ;;  %4954 = vst [vmem:[#allocation76_spill] sm:$0xff] %v4328_v2 }
 0x141   :  { %v1695_v53 = vadd.f32 %v1694_v6, %v1606_v48  ;;  %v3739_v48 = vld [vmem:[#allocation5 + $0x164] sm:$0xf] }
 0x142   :  { %v1429_v24 = vpop.f32.mrf.mxu2  ;;  %v3334_v7 = vor.u32 %v3739_v48, %v3331_v19  ;;  %v3027_v48 = vld [vmem:[#allocation2 + $0x208] sm:$0xf0] }
 0x143   :  { %v1430_v4 = vadd.f32 %v1429_v24, %v4137_v46  ;;  %v1518_v51 = vpop.f32.mrf.mxu3  ;;  %v2308_v20 = vmax.f32 %v1695_v53, 0.0  ;;  %v3025_v53 = vld [vmem:[#allocation2 + $0x1f0] sm:$0xf] }
 0x144   :  { %v1610_v42 = vpop.f32.mrf.mxu0  ;;  %1953 = vmatpush.bf16.msra.mxu0 %v3334_v7 }
 0x145   :  { %v1519_v21 = vadd.f32 %v1518_v51, %v1430_v4  ;;  %v3755_v4 = vld [vmem:[#allocation5 + $0x1e4] sm:$0xf] }
 0x146   :  { %v1699_v55 = vpop.f32.mrf.mxu1 }
 0x147   :  { %1471 = vmatmul.bf16.gmra.mxu2 %v4324_v60  ;;  %1649 = vmatmul.bf16.gmra.mxu0 %v4326_v56  ;;  %v1608_v6 = vadd.f32 %v1607_v57, %v1519_v21  ;;  %v3395_v57 = vld [vmem:[#allocation5 + $0x1e8] sm:$0xf0]  ;;  %v3019_v56 = vld [vmem:[#allocation2 + $0x200] sm:$0xf0]  ;;  %v3661_v60 = vld [vmem:[#allocation2 + $0x1f4] sm:$0xf] }
 0x148   :  { %1560 = vmatmul.bf16.gmra.mxu3 %v4328_v2 }
 0x149   :  { %v1697_v46 = vadd.f32 %v1696_v39, %v1608_v6  ;;  %1738 = vmatmul.bf16.gmra.mxu1 %v4330_v3  ;;  %v3398_v39 = vor.u32 %v3755_v4, %v3395_v57  ;;  %v3017_v6 = vld [vmem:[#allocation2 + $0x1e8] sm:$0xf]  ;;  %v3663_v3 = vld [vmem:[#allocation2 + $0x1fc] sm:$0xf0] }
 0x14a   :  { %v1432_v17 = vpop.f32.mrf.mxu2 }
 0x14b   :  { %v2310_v18 = vmax.f32 %v1697_v46, 0.0  ;;  %v1433_v52 = vadd.f32 %v1432_v17, %v4153_v31  ;;  %v1521_v44 = vpop.f32.mrf.mxu3  ;;  %v3664_v46 = vld [vmem:[#allocation2 + $0x204] sm:$0xf0]  ;;  %2042 = vmatpush.bf16.msra.mxu1 %v3398_v39  ;;  %v3660_v17 = vld [vmem:[#allocation2 + $0x1ec] sm:$0xf] }
 0x14c   :  { %v1612_v23 = vpop.f32.mrf.mxu0 }
 0x14d   :  { %v4337_v24 = vpack.c.bf16 %v2310_v18, %v2308_v20  ;;  %v1522_v15 = vadd.f32 %v1521_v44, %v1433_v52  ;;  %v4340_v52 = vor.u32 %v3663_v3, %v3017_v6  ;;  %v4342_v44 = vor.u32 %v3664_v46, %v3025_v53  ;;  %v3713_v53 = vld [vmem:[#allocation5 + $0x94] sm:$0xf]  ;;  %v3227_v46 = vld [vmem:[#allocation5 + $0x98] sm:$0xf0] }
 0x14e   :  { %v1701_v51 = vpop.f32.mrf.mxu1 }
 0x14f   :  { %4956 = vst [vmem:[#allocation78_spill] sm:$0xff] %v4337_v24  ;;  %v1611_v21 = vadd.f32 %v1610_v42, %v1522_v15  ;;  %v4344_v42 = vor.u32 %v3660_v17, %v3019_v56  ;;  %v4346_v15 = vor.u32 %v3661_v60, %v3027_v48  ;;  %v3230_v48 = vor.u32 %v3713_v53, %v3227_v46 }
 0x150   :  { %4957 = vst [vmem:[#allocation79_spill] sm:$0xff] %v4342_v44 }
 0x151   :  { %v1700_v31 = vadd.f32 %v1699_v55, %v1611_v21  ;;  %4958 = vst [vmem:[#allocation80_spill] sm:$0xff] %v4346_v15  ;;  %1869 = vmatpush.bf16.msra.mxu3 %v3230_v48 }
 0x152   :  { %v1434_v2 = vpop.f32.mrf.mxu2 }
 0x153   :  { %v1435_v20 = vadd.f32 %v1434_v2, %v4161_v50  ;;  %v1523_v18 = vpop.f32.mrf.mxu3  ;;  %v3697_v50 = vld [vmem:[#allocation5 + $0x14] sm:$0xf]  ;;  %v3163_v2 = vld [vmem:[#allocation5 + $0x18] sm:$0xf0]  ;;  %v2312_v56 = vmax.f32 %v1700_v31, 0.0 }
 0x154   :  { %v1615_v19 = vpop.f32.mrf.mxu0  ;;  %v3166_v57 = vor.u32 %v3697_v50, %v3163_v2  ;;  %v3049_v50 = vld [vmem:[#allocation2 + $0x220] sm:$0xf]  ;;  %v3670_v2 = vld [vmem:[#allocation2 + $0x234] sm:$0xf0] }
 0x155   :  { %v1524_v7 = vadd.f32 %v1523_v18, %v1435_v20 }
 0x156   :  { %v1704_v4 = vpop.f32.mrf.mxu1  ;;  %1780 = vmatpush.bf16.msra.mxu2 %v3166_v57  ;;  %v3051_v57 = vld [vmem:[#allocation2 + $0x238] sm:$0xf0] }
 0x157   :  { %1476 = vmatmul.bf16.gmra.mxu2 %v4340_v52  ;;  %1654 = vmatmul.bf16.gmra.mxu0 %v4342_v44  ;;  %v1613_v55 = vadd.f32 %v1612_v23, %v1524_v7  ;;  %v3041_v7 = vld [vmem:[#allocation2 + $0x218] sm:$0xf] }
 0x158   :  { %1565 = vmatmul.bf16.gmra.mxu3 %v4344_v42 }
 0x159   :  { %v1702_v3 = vadd.f32 %v1701_v51, %v1613_v55  ;;  %1743 = vmatmul.bf16.gmra.mxu1 %v4346_v15  ;;  %v3669_v55 = vld [vmem:[#allocation2 + $0x22c] sm:$0xf0]  ;;  %v3043_v15 = vld [vmem:[#allocation2 + $0x230] sm:$0xf0] }
 0x15a   :  { %v1437_v39 = vpop.f32.mrf.mxu2  ;;  %v4356_v53 = vor.u32 %v3669_v55, %v3041_v7 }
 0x15b   :  { %v2314_v21 = vmax.f32 %v1702_v3, 0.0  ;;  %v1438_v60 = vadd.f32 %v1437_v39, %v4177_v12  ;;  %v1526_v6 = vpop.f32.mrf.mxu3  ;;  %v3666_v3 = vld [vmem:[#allocation2 + $0x21c] sm:$0xf]  ;;  %v3667_v39 = vld [vmem:[#allocation2 + $0x224] sm:$0xf] }
 0x15c   :  { %v1617_v17 = vpop.f32.mrf.mxu0 }
 0x15d   :  { %v1527_v23 = vadd.f32 %v1526_v6, %v1438_v60  ;;  %v4353_v20 = vpack.c.bf16 %v2314_v21, %v2312_v56  ;;  %v4358_v56 = vor.u32 %v3670_v2, %v3049_v50  ;;  %v4360_v60 = vor.u32 %v3666_v3, %v3043_v15  ;;  %v3753_v3 = vld [vmem:[#allocation5 + $0x1d4] sm:$0xf] }
 0x15e   :  { %v1706_v18 = vpop.f32.mrf.mxu1  ;;  %v4362_v6 = vor.u32 %v3667_v39, %v3051_v57 }
 0x15f   :  { %4959 = vst [vmem:[#allocation81_spill] sm:$0xff] %v4353_v20  ;;  %v1616_v51 = vadd.f32 %v1615_v19, %v1527_v23  ;;  %v3673_v20 = vld [vmem:[#allocation2 + $0x254] sm:$0xf] }
 0x160   :  { %4960 = vst [vmem:[#allocation82_spill] sm:$0xff] %v4358_v56 }
 0x161   :  { %v1705_v31 = vadd.f32 %v1704_v4, %v1616_v51  ;;  %4961 = vst [vmem:[#allocation83_spill] sm:$0xff] %v4362_v6 }
 0x162   :  { %v1439_v12 = vpop.f32.mrf.mxu2 }
 0x163   :  { %v1440_v44 = vadd.f32 %v1439_v12, %v4185_v9  ;;  %v1528_v24 = vpop.f32.mrf.mxu3  ;;  %v2316_v23 = vmax.f32 %v1705_v31, 0.0  ;;  %v3387_v12 = vld [vmem:[#allocation5 + $0x1d8] sm:$0xf0]  ;;  %v3073_v31 = vld [vmem:[#allocation2 + $0x250] sm:$0xf] }
 0x164   :  { %v1620_v21 = vpop.f32.mrf.mxu0 }
 0x165   :  { %v1529_v19 = vadd.f32 %v1528_v24, %v1440_v44  ;;  %v3737_v24 = vld [vmem:[#allocation5 + $0x154] sm:$0xf]  ;;  %v3323_v44 = vld [vmem:[#allocation5 + $0x158] sm:$0xf0] }
 0x166   :  { %v1709_v46 = vpop.f32.mrf.mxu1  ;;  %v3326_v50 = vor.u32 %v3737_v24, %v3323_v44  ;;  %v3075_v24 = vld [vmem:[#allocation2 + $0x268] sm:$0xf0] }
 0x167   :  { %1481 = vmatmul.bf16.gmra.mxu2 %v4356_v53  ;;  %1659 = vmatmul.bf16.gmra.mxu0 %v4358_v56  ;;  %v1618_v4 = vadd.f32 %v1617_v17, %v1529_v19  ;;  %v3065_v19 = vld [vmem:[#allocation2 + $0x248] sm:$0xf] }
 0x168   :  { %1570 = vmatmul.bf16.gmra.mxu3 %v4360_v60  ;;  %1954 = vmatpush.bf16.msra.mxu0 %v3326_v50 }
 0x169   :  { %v1707_v9 = vadd.f32 %v1706_v18, %v1618_v4  ;;  %1748 = vmatmul.bf16.gmra.mxu1 %v4362_v6  ;;  %v3390_v18 = vor.u32 %v3753_v3, %v3387_v12  ;;  %v3675_v4 = vld [vmem:[#allocation2 + $0x25c] sm:$0xf0]  ;;  %v3067_v6 = vld [vmem:[#allocation2 + $0x260] sm:$0xf0] }
 0x16a   :  { %v1442_v48 = vpop.f32.mrf.mxu2 }
 0x16b   :  { %v2318_v51 = vmax.f32 %v1707_v9, 0.0  ;;  %v1443_v15 = vadd.f32 %v1442_v48, %v4201_v54  ;;  %v1531_v7 = vpop.f32.mrf.mxu3  ;;  %v3676_v9 = vld [vmem:[#allocation2 + $0x264] sm:$0xf0]  ;;  %2043 = vmatpush.bf16.msra.mxu1 %v3390_v18  ;;  %v3672_v48 = vld [vmem:[#allocation2 + $0x24c] sm:$0xf] }
 0x16c   :  { %v1622_v55 = vpop.f32.mrf.mxu0 }
 0x16d   :  { %v1532_v2 = vadd.f32 %v1531_v7, %v1443_v15  ;;  %v4369_v39 = vpack.c.bf16 %v2318_v51, %v2316_v23  ;;  %v4372_v23 = vor.u32 %v3675_v4, %v3065_v19  ;;  %v4374_v51 = vor.u32 %v3676_v9, %v3073_v31  ;;  %v3711_v31 = vld [vmem:[#allocation5 + $0x84] sm:$0xf]  ;;  %v3219_v9 = vld [vmem:[#allocation5 + $0x88] sm:$0xf0] }
 0x16e   :  { %v1711_v17 = vpop.f32.mrf.mxu1 }
 0x16f   :  { %4962 = vst [vmem:[#allocation84_spill] sm:$0xff] %v4369_v39  ;;  %v1621_v57 = vadd.f32 %v1620_v21, %v1532_v2  ;;  %v4376_v21 = vor.u32 %v3672_v48, %v3067_v6  ;;  %v4378_v2 = vor.u32 %v3673_v20, %v3075_v24  ;;  %v3222_v24 = vor.u32 %v3711_v31, %v3219_v9  ;;  %v3315_v39 = vld [vmem:[#allocation5 + $0x148] sm:$0xf0] }
 0x170   :  { %4963 = vst [vmem:[#allocation85_spill] sm:$0xff] %v4374_v51 }
 0x171   :  { %v1710_v54 = vadd.f32 %v1709_v46, %v1621_v57  ;;  %4964 = vst [vmem:[#allocation86_spill] sm:$0xff] %v4376_v21  ;;  %1870 = vmatpush.bf16.msra.mxu3 %v3222_v24 }
 0x172   :  { %v1444_v56 = vpop.f32.mrf.mxu2  ;;  %4965 = vst [vmem:[#allocation87_spill] sm:$0xff] %v4378_v2 }
 0x173   :  { %v1445_v15 = vadd.f32 %v1444_v56, %v4209_v10  ;;  %v1533_v7 = vpop.f32.mrf.mxu3  ;;  %v3695_v10 = vld [vmem:[#allocation5 + $0x4] sm:$0xf]  ;;  %v3155_v56 = vld [vmem:[#allocation5 + $0x8] sm:$0xf0]  ;;  %v2320_v6 = vmax.f32 %v1710_v54, 0.0 }
 0x174   :  { %v1625_v44 = vpop.f32.mrf.mxu0  ;;  %v3158_v18 = vor.u32 %v3695_v10, %v3155_v56  ;;  %v3097_v10 = vld [vmem:[#allocation2 + $0x280] sm:$0xf]  ;;  %v3682_v56 = vld [vmem:[#allocation2 + $0x294] sm:$0xf0] }
 0x175   :  { %v1534_v50 = vadd.f32 %v1533_v7, %v1445_v15 }
 0x176   :  { %v1714_v3 = vpop.f32.mrf.mxu1  ;;  %1781 = vmatpush.bf16.msra.mxu2 %v3158_v18  ;;  %v3099_v18 = vld [vmem:[#allocation2 + $0x298] sm:$0xf0] }
 0x177   :  { %1486 = vmatmul.bf16.gmra.mxu2 %v4372_v23  ;;  %1664 = vmatmul.bf16.gmra.mxu0 %v4374_v51  ;;  %v1623_v46 = vadd.f32 %v1622_v55, %v1534_v50  ;;  %v3089_v50 = vld [vmem:[#allocation2 + $0x278] sm:$0xf]  ;;  %v3735_v51 = vld [vmem:[#allocation5 + $0x144] sm:$0xf] }
 0x178   :  { %1575 = vmatmul.bf16.gmra.mxu3 %v4376_v21  ;;  %v3363_v21 = vld [vmem:[#allocation5 + $0x1a8] sm:$0xf0] }
 0x179   :  { %v1712_v12 = vadd.f32 %v1711_v17, %v1623_v46  ;;  %1753 = vmatmul.bf16.gmra.mxu1 %v4378_v2  ;;  %v3681_v46 = vld [vmem:[#allocation2 + $0x28c] sm:$0xf0]  ;;  %v3091_v2 = vld [vmem:[#allocation2 + $0x290] sm:$0xf0] }
 0x17a   :  { %v1447_v57 = vpop.f32.mrf.mxu2 }
 0x17b   :  { %v2322_v19 = vmax.f32 %v1712_v12, 0.0  ;;  %v1448_v20 = vadd.f32 %v1447_v57, %v4225_v62  ;;  %v1536_v4 = vpop.f32.mrf.mxu3  ;;  %v3678_v12 = vld [vmem:[#allocation2 + $0x27c] sm:$0xf]  ;;  %v3679_v62 = vld [vmem:[#allocation2 + $0x284] sm:$0xf] }
 0x17c   :  { %v1627_v48 = vpop.f32.mrf.mxu0  ;;  %v4392_v9 = vor.u32 %v3678_v12, %v3091_v2  ;;  %v3299_v2 = vld [vmem:[#allocation5 + $0x128] sm:$0xf0] }
 0x17d   :  { %v1537_v55 = vadd.f32 %v1536_v4, %v1448_v20  ;;  %v4385_v15 = vpack.c.bf16 %v2322_v19, %v2320_v6  ;;  %v4388_v6 = vor.u32 %v3681_v46, %v3089_v50  ;;  %v4390_v19 = vor.u32 %v3682_v56, %v3097_v10 }
 0x17e   :  { %v1716_v7 = vpop.f32.mrf.mxu1  ;;  %4969 = vst [vmem:[#allocation91_spill] sm:$0xff] %v4392_v9 }
 0x17f   :  { %4966 = vst [vmem:[#allocation88_spill] sm:$0xff] %v4385_v15  ;;  %v1626_v17 = vadd.f32 %v1625_v44, %v1537_v55  ;;  %v3318_v44 = vor.u32 %v3735_v51, %v3315_v39  ;;  %v3731_v51 = vld [vmem:[#allocation5 + $0x124] sm:$0xf]  ;;  %v3121_v15 = vld [vmem:[#allocation2 + $0x2b0] sm:$0xf] }
 0x180   :  { %4967 = vst [vmem:[#allocation89_spill] sm:$0xff] %v4388_v6 }
 0x181   :  { %v1715_v54 = vadd.f32 %v1714_v3, %v1626_v17  ;;  %4968 = vst [vmem:[#allocation90_spill] sm:$0xff] %v4390_v19  ;;  %v4394_v3 = vor.u32 %v3679_v62, %v3099_v18  ;;  %1955 = vmatpush.bf16.msra.mxu0 %v3318_v44  ;;  %v3302_v18 = vor.u32 %v3731_v51, %v3299_v2  ;;  %v3379_v44 = vld [vmem:[#allocation5 + $0x1c8] sm:$0xf0]  ;;  %v3115_v51 = vld [vmem:[#allocation2 + $0x2c0] sm:$0xf0] }
 0x182   :  { %v1449_v57 = vpop.f32.mrf.mxu2  ;;  %v3685_v2 = vld [vmem:[#allocation2 + $0x2b4] sm:$0xf] }
 0x183   :  { %v1450_v31 = vadd.f32 %v1449_v57, %v4233_v41  ;;  %v1538_v20 = vpop.f32.mrf.mxu3  ;;  %4970 = vst [vmem:[#allocation92_spill] sm:$0xff] %v4394_v3  ;;  %v3733_v41 = vld [vmem:[#allocation5 + $0x134] sm:$0xf]  ;;  %v3307_v57 = vld [vmem:[#allocation5 + $0x138] sm:$0xf0]  ;;  %v2324_v10 = vmax.f32 %v1715_v54, 0.0 }
 0x184   :  { %v1630_v4 = vpop.f32.mrf.mxu0  ;;  %v3310_v50 = vor.u32 %v3733_v41, %v3307_v57  ;;  %v3291_v57 = vld [vmem:[#allocation5 + $0x118] sm:$0xf0] }
 0x185   :  { %v1539_v24 = vadd.f32 %v1538_v20, %v1450_v31  ;;  %v3751_v20 = vld [vmem:[#allocation5 + $0x1c4] sm:$0xf] }
 0x186   :  { %v1719_v55 = vpop.f32.mrf.mxu1  ;;  %1956 = vmatpush.bf16.msra.mxu0 %v3310_v50 }
 0x187   :  { %1491 = vmatmul.bf16.gmra.mxu2 %v4388_v6  ;;  %1669 = vmatmul.bf16.gmra.mxu0 %v4390_v19  ;;  %v1628_v17 = vadd.f32 %v1627_v48, %v1539_v24  ;;  %v3687_v19 = vld [vmem:[#allocation2 + $0x2bc] sm:$0xf0]  ;;  %v3747_v6 = vld [vmem:[#allocation5 + $0x1a4] sm:$0xf] }
 0x188   :  { %1580 = vmatmul.bf16.gmra.mxu3 %v4392_v9 }
 0x189   :  { %v1717_v46 = vadd.f32 %v1716_v7, %v1628_v17  ;;  %1758 = vmatmul.bf16.gmra.mxu1 %v4394_v3  ;;  %v3382_v7 = vor.u32 %v3751_v20, %v3379_v44  ;;  %v3729_v17 = vld [vmem:[#allocation5 + $0x114] sm:$0xf]  ;;  %v3113_v3 = vld [vmem:[#allocation2 + $0x2a8] sm:$0xf] }
 0x18a   :  { %v1452_v39 = vpop.f32.mrf.mxu2  ;;  %1957 = vmatpush.bf16.msra.mxu0 %v3302_v18  ;;  %v3294_v54 = vor.u32 %v3729_v17, %v3291_v57  ;;  %v3749_v20 = vld [vmem:[#allocation5 + $0x1b4] sm:$0xf]  ;;  %v3371_v57 = vld [vmem:[#allocation5 + $0x1b8] sm:$0xf0] }
 0x18b   :  { %v2326_v56 = vmax.f32 %v1717_v46, 0.0  ;;  %v1453_v12 = vadd.f32 %v1452_v39, %v4249_v63  ;;  %v1541_v62 = vpop.f32.mrf.mxu3  ;;  %v3684_v46 = vld [vmem:[#allocation2 + $0x2ac] sm:$0xf]  ;;  %v3688_v63 = vld [vmem:[#allocation2 + $0x2c4] sm:$0xf0]  ;;  %2044 = vmatpush.bf16.msra.mxu1 %v3382_v7 }
 0x18c   :  { %v1632_v31 = vpop.f32.mrf.mxu0  ;;  %v4408_v7 = vor.u32 %v3684_v46, %v3115_v51 }
 0x18d   :  { %v1542_v48 = vadd.f32 %v1541_v62, %v1453_v12  ;;  %v4401_v24 = vpack.c.bf16 %v2326_v56, %v2324_v10  ;;  %v3123_v12 = vld [vmem:[#allocation2 + $0x2c8] sm:$0xf0]  ;;  %v3727_v10 = vld [vmem:[#allocation5 + $0x104] sm:$0xf] }
 0x18e   :  { %v1721_v41 = vpop.f32.mrf.mxu1  ;;  %1958 = vmatpush.bf16.msra.mxu0 %v3294_v54  ;;  %v3283_v56 = vld [vmem:[#allocation5 + $0x108] sm:$0xf0]  ;;  %v4410_v9 = vor.u32 %v3685_v2, %v3123_v12  ;;  %v3745_v2 = vld [vmem:[#allocation5 + $0x194] sm:$0xf]  ;;  %v3355_v12 = vld [vmem:[#allocation5 + $0x198] sm:$0xf0] }
 0x18f   :  { %4971 = vst [vmem:[#allocation93_spill] sm:$0xff] %v4401_v24  ;;  %v1631_v50 = vadd.f32 %v1630_v4, %v1542_v48  ;;  %v4404_v4 = vor.u32 %v3687_v19, %v3113_v3  ;;  %v4406_v48 = vor.u32 %v3688_v63, %v3121_v15  ;;  %v3286_v17 = vor.u32 %v3727_v10, %v3283_v56  ;;  %v3773_v19 = vld [vmem:[#allocation5 + $0x274] sm:$0xf]  ;;  %v3467_v3 = vld [vmem:[#allocation5 + $0x278] sm:$0xf0] }
 0x190   :  { %v3366_v15 = vor.u32 %v3747_v6, %v3363_v21  ;;  %v3470_v63 = vor.u32 %v3773_v19, %v3467_v3  ;;  %v3531_v21 = vld [vmem:[#allocation5 + $0x2f8] sm:$0xf0]  ;;  %v3358_v6 = vor.u32 %v3745_v2, %v3355_v12  ;;  %v3693_v19 = vld [vmem:[#allocation2 + $0x2ec] sm:$0xf0]  ;;  %v3694_v3 = vld [vmem:[#allocation2 + $0x2f4] sm:$0xf0] }
 0x191   :  { %v1720_v39 = vadd.f32 %v1719_v55, %v1631_v50  ;;  %v3374_v55 = vor.u32 %v3749_v20, %v3371_v57  ;;  %v3691_v12 = vld [vmem:[#allocation2 + $0x2e4] sm:$0xf] }
 0x192   :  { %v1454_v62 = vpop.f32.mrf.mxu2  ;;  %1959 = vmatpush.bf16.msra.mxu0 %v3286_v17  ;;  %2130 = vmatpush.bf16.msrb.mxu2 %v3470_v63  ;;  %v3690_v63 = vld [vmem:[#allocation2 + $0x2dc] sm:$0xf] }
 0x193   :  { %v1455_v18 = vadd.f32 %v1454_v62, %v4257_v28  ;;  %v1543_v44 = vpop.f32.mrf.mxu3  ;;  %2045 = vmatpush.bf16.msra.mxu1 %v3374_v55  ;;  %v2328_v62 = vmax.f32 %v1720_v39, 0.0  ;;  %v3743_v55 = vld [vmem:[#allocation5 + $0x184] sm:$0xf]  ;;  %v3137_v39 = vld [vmem:[#allocation2 + $0x2d8] sm:$0xf] }
 0x194   :  { %v1635_v24 = vpop.f32.mrf.mxu0 }
 0x195   :  { %v1544_v50 = vadd.f32 %v1543_v44, %v1455_v18 }
 0x196   :  { %v1724_v54 = vpop.f32.mrf.mxu1 }
 0x197   :  { %1496 = vmatmul.bf16.gmra.mxu2 %v4404_v4  ;;  %1674 = vmatmul.bf16.gmra.mxu0 %v4406_v48  ;;  %v1633_v28 = vadd.f32 %v1632_v31, %v1544_v50  ;;  %v3789_v31 = vld [vmem:[#allocation5 + $0x2f4] sm:$0xf]  ;;  %v3347_v50 = vld [vmem:[#allocation5 + $0x188] sm:$0xf0] }
 0x198   :  { %1585 = vmatmul.bf16.gmra.mxu3 %v4408_v7  ;;  %2046 = vmatpush.bf16.msra.mxu1 %v3366_v15  ;;  %v3534_v44 = vor.u32 %v3789_v31, %v3531_v21  ;;  %v3350_v15 = vor.u32 %v3743_v55, %v3347_v50  ;;  %v3147_v31 = vld [vmem:[#allocation2 + $0x2f8] sm:$0xf0] }
 0x199   :  { %v1722_v46 = vadd.f32 %v1721_v41, %v1633_v28  ;;  %1763 = vmatmul.bf16.gmra.mxu1 %v4410_v9 }
 0x19a   :  { %v1457_v51 = vpop.f32.mrf.mxu2  ;;  %2219 = vmatpush.bf16.msrb.mxu3 %v3534_v44  ;;  %v4426_v44 = vor.u32 %v3691_v12, %v3147_v31 }
 0x19b   :  { %v2330_v10 = vmax.f32 %v1722_v46, 0.0  ;;  %v1458_v56 = vadd.f32 %v1457_v51, %v4273_v38  ;;  %v1546_v20 = vpop.f32.mrf.mxu3  ;;  %v3145_v38 = vld [vmem:[#allocation2 + $0x2e0] sm:$0xf]  ;;  %v3139_v51 = vld [vmem:[#allocation2 + $0x2f0] sm:$0xf0] }
 0x19c   :  { %v1637_v18 = vpop.f32.mrf.mxu0  ;;  %2047 = vmatpush.bf16.msra.mxu1 %v3358_v6  ;;  %v4424_v21 = vor.u32 %v3690_v63, %v3139_v51 }
 0x19d   :  { %v1547_v17 = vadd.f32 %v1546_v20, %v1458_v56  ;;  %v4417_v41 = vpack.c.bf16 %v2330_v10, %v2328_v62  ;;  %v4420_v56 = vor.u32 %v3693_v19, %v3137_v39  ;;  %v4422_v20 = vor.u32 %v3694_v3, %v3145_v38 }
 0x19e   :  { %v1726_v57 = vpop.f32.mrf.mxu1 }
 0x19f   :  { %v1636_v28 = vadd.f32 %v1635_v24, %v1547_v17 }
 0x1a0   :  { %2048 = vmatpush.bf16.msra.mxu1 %v3350_v15 }
 0x1a1   :  { %v1725_v46 = vadd.f32 %v1724_v54, %v1636_v28 }
 0x1a2   :  { %v1459_v2 = vpop.f32.mrf.mxu2 }
 0x1a3   :  { %v1460_v62 = vadd.f32 %v1459_v2, %v4281_v59  ;;  %v1548_v10 = vpop.f32.mrf.mxu3  ;;  %v2332_v50 = vmax.f32 %v1725_v46, 0.0  ;;  %v3771_v46 = vld [vmem:[#allocation5 + $0x264] sm:$0xf] }
 0x1a4   :  { %v1640_v24 = vpop.f32.mrf.mxu0 }
 0x1a5   :  { %v1549_v6 = vadd.f32 %v1548_v10, %v1460_v62 }
 0x1a6   :  { %v1729_v54 = vpop.f32.mrf.mxu1 }
 0x1a7   :  { %1501 = vmatmul.bf16.gmra.mxu2 %v4420_v56  ;;  %1679 = vmatmul.bf16.gmra.mxu0 %v4422_v20  ;;  %v1638_v17 = vadd.f32 %v1637_v18, %v1549_v6  ;;  %v3459_v6 = vld [vmem:[#allocation5 + $0x268] sm:$0xf0] }
 0x1a8   :  { %1590 = vmatmul.bf16.gmra.mxu3 %v4424_v21 }
 0x1a9   :  { %v1727_v59 = vadd.f32 %v1726_v57, %v1638_v17  ;;  %1768 = vmatmul.bf16.gmra.mxu1 %v4426_v44 }
 0x1aa   :  { %v1462_v55 = vpop.f32.mrf.mxu2 }
 0x1ab   :  { %v2334_v28 = vmax.f32 %v1727_v59, 0.0  ;;  %v1463_v39 = vadd.f32 %v1462_v55, %v4297_v45  ;;  %v1551_v15 = vpop.f32.mrf.mxu3 }
 0x1ac   :  { %v1642_v19 = vpop.f32.mrf.mxu0 }
 0x1ad   :  { %v1552_v38 = vadd.f32 %v1551_v15, %v1463_v39  ;;  %v4433_v3 = vpack.c.bf16 %v2334_v28, %v2332_v50  ;;  %v3787_v28 = vld [vmem:[#allocation5 + $0x2e4] sm:$0xf] }
 0x1ae   :  { %v1731_v63 = vpop.f32.mrf.mxu1 }
 0x1af   :  { %v1641_v51 = vadd.f32 %v1640_v24, %v1552_v38  ;;  %v3462_v24 = vor.u32 %v3771_v46, %v3459_v6 }
 0x1b1   :  { %v1730_v2 = vadd.f32 %v1729_v54, %v1641_v51  ;;  %2131 = vmatpush.bf16.msrb.mxu2 %v3462_v24 }
 0x1b2   :  { %v1464_v12 = vpop.f32.mrf.mxu2 }
 0x1b3   :  { %v1465_v18 = vadd.f32 %v1464_v12, %v4305_v1  ;;  %v1553_v31 = vpop.f32.mrf.mxu3  ;;  %v2336_v59 = vmax.f32 %v1730_v2, 0.0 }
 0x1b4   :  { %v1645_v57 = vpop.f32.mrf.mxu0 }
 0x1b5   :  { %v1554_v62 = vadd.f32 %v1553_v31, %v1465_v18 }
 0x1b6   :  { %v1734_v10 = vpop.f32.mrf.mxu1 }
 0x1b7   :  { %1782 = vmatmul.bf16.vlgmr.msra.gmra.mxu2 %v4020_v0  ;;  %1960 = vmatmul.bf16.vlgmr.msra.gmra.mxu0 %v4118_v8  ;;  %v1643_v45 = vadd.f32 %v1642_v19, %v1554_v62  ;;  %v3523_v0 = vld [vmem:[#allocation5 + $0x2e8] sm:$0xf0] }
 0x1b8   :  { %1871 = vmatmul.bf16.vlgmr.msra.gmra.mxu3 %v4026_v5  ;;  %v3526_v8 = vor.u32 %v3787_v28, %v3523_v0  ;;  %v3769_v28 = vld [vmem:[#allocation5 + $0x254] sm:$0xf]  ;;  %v3451_v0 = vld [vmem:[#allocation5 + $0x258] sm:$0xf0] }
 0x1b9   :  { %v1732_v17 = vadd.f32 %v1731_v63, %v1643_v45  ;;  %2049 = vmatmul.bf16.vlgmr.msra.gmra.mxu1 %v4122_v11 }
 0x1ba   :  { %v1467_v54 = vpop.f32.mrf.mxu2  ;;  %2220 = vmatpush.bf16.msrb.mxu3 %v3526_v8  ;;  %v3454_v8 = vor.u32 %v3769_v28, %v3451_v0  ;;  %v4973_v28 = vld [vmem:[#allocation25_spill] sm:$0xff]  ;;  %v3767_v0 = vld [vmem:[#allocation5 + $0x244] sm:$0xf] }
 0x1bb   :  { %v2338_v1 = vmax.f32 %v1732_v17, 0.0  ;;  %v1468_v55 = vadd.f32 %v1467_v54, %v4134_v34  ;;  %v1556_v50 = vpop.f32.mrf.mxu3 }
 0x1bc   :  { %v1647_v39 = vpop.f32.mrf.mxu0  ;;  %2132 = vmatpush.bf16.msrb.mxu2 %v3454_v8 }
 0x1bd   :  { %v1557_v15 = vadd.f32 %v1556_v50, %v1468_v55  ;;  %v4441_v19 = vpack.c.bf16 %v2338_v1, %v2336_v59 }
 0x1be   :  { %v1736_v5 = vpop.f32.mrf.mxu1 }
 0x1bf   :  { %v1646_v38 = vadd.f32 %v1645_v57, %v1557_v15 }
 0x1c1   :  { %v1735_v63 = vadd.f32 %v1734_v10, %v1646_v38 }
 0x1c2   :  { %v1469_v11 = vpop.f32.mrf.mxu2 }
 0x1c3   :  { %v1470_v51 = vadd.f32 %v1469_v11, %v4146_v27  ;;  %v1558_v2 = vpop.f32.mrf.mxu3  ;;  %v2340_v57 = vmax.f32 %v1735_v63, 0.0  ;;  %v3785_v11 = vld [vmem:[#allocation5 + $0x2d4] sm:$0xf] }
 0x1c4   :  { %v1650_v12 = vpop.f32.mrf.mxu0 }
 0x1c5   :  { %v1559_v18 = vadd.f32 %v1558_v2, %v1470_v51 }
 0x1c6   :  { %v1739_v34 = vpop.f32.mrf.mxu1 }
 0x1c7   :  { %1787 = vmatmul.bf16.gmra.mxu2 %v4032_v22  ;;  %1965 = vmatmul.bf16.gmra.mxu0 %v4140_v14  ;;  %v1648_v31 = vadd.f32 %v1647_v39, %v1559_v18 }
 0x1c8   :  { %1876 = vmatmul.bf16.gmra.mxu3 %v4038_v25 }
 0x1c9   :  { %v1737_v62 = vadd.f32 %v1736_v5, %v1648_v31  ;;  %2054 = vmatmul.bf16.gmra.mxu1 %v4144_v26 }
 0x1ca   :  { %v1472_v45 = vpop.f32.mrf.mxu2 }
 0x1cb   :  { %v2342_v10 = vmax.f32 %v1737_v62, 0.0  ;;  %v1473_v46 = vadd.f32 %v1472_v45, %v4158_v37  ;;  %v1561_v27 = vpop.f32.mrf.mxu3 }
 0x1cc   :  { %v1652_v6 = vpop.f32.mrf.mxu0 }
 0x1cd   :  { %v1562_v17 = vadd.f32 %v1561_v27, %v1473_v46  ;;  %v4449_v24 = vpack.c.bf16 %v2342_v10, %v2340_v57 }
 0x1ce   :  { %v1741_v54 = vpop.f32.mrf.mxu1 }
 0x1cf   :  { %v1651_v22 = vadd.f32 %v1650_v12, %v1562_v17 }
 0x1d1   :  { %v1740_v59 = vadd.f32 %v1739_v34, %v1651_v22 }
 0x1d2   :  { %v1474_v14 = vpop.f32.mrf.mxu2 }
 0x1d3   :  { %v1475_v1 = vadd.f32 %v1474_v14, %v4170_v47  ;;  %v1563_v25 = vpop.f32.mrf.mxu3  ;;  %v2344_v5 = vmax.f32 %v1740_v59, 0.0 }
 0x1d4   :  { %v1655_v55 = vpop.f32.mrf.mxu0 }
 0x1d5   :  { %v1564_v50 = vadd.f32 %v1563_v25, %v1475_v1 }
 0x1d6   :  { %v1744_v26 = vpop.f32.mrf.mxu1 }
 0x1d7   :  { %1792 = vmatmul.bf16.gmra.mxu2 %v4044_v40  ;;  %1970 = vmatmul.bf16.gmra.mxu0 %v4164_v29  ;;  %v1653_v37 = vadd.f32 %v1652_v6, %v1564_v50  ;;  %v3515_v40 = vld [vmem:[#allocation5 + $0x2d8] sm:$0xf0] }
 0x1d8   :  { %1881 = vmatmul.bf16.gmra.mxu3 %v4050_v43  ;;  %v3518_v29 = vor.u32 %v3785_v11, %v3515_v40 }
 0x1d9   :  { %v1742_v39 = vadd.f32 %v1741_v54, %v1653_v37  ;;  %2059 = vmatmul.bf16.gmra.mxu1 %v4168_v36  ;;  %v4972_v37 = vld [vmem:[#allocation46_spill] sm:$0xff] }
 0x1da   :  { %v1477_v15 = vpop.f32.mrf.mxu2  ;;  %2221 = vmatpush.bf16.msrb.mxu3 %v3518_v29 }
 0x1db   :  { %v2346_v47 = vmax.f32 %v1742_v39, 0.0  ;;  %v1478_v38 = vadd.f32 %v1477_v15, %v4182_v35  ;;  %v1566_v63 = vpop.f32.mrf.mxu3  ;;  %v3443_v39 = vld [vmem:[#allocation5 + $0x248] sm:$0xf0] }
 0x1dc   :  { %v1657_v51 = vpop.f32.mrf.mxu0  ;;  %v4974_v15 = vld [vmem:[#allocation48_spill] sm:$0xff] }
 0x1dd   :  { %v1567_v2 = vadd.f32 %v1566_v63, %v1478_v38  ;;  %v4457_v12 = vpack.c.bf16 %v2346_v47, %v2344_v5  ;;  %v3446_v5 = vor.u32 %v3767_v0, %v3443_v39  ;;  %v4975_v63 = vld [vmem:[#allocation50_spill] sm:$0xff]  ;;  %v4982_v39 = vld [vmem:[#allocation60_spill] sm:$0xff] }
 0x1de   :  { %v1746_v43 = vpop.f32.mrf.mxu1 }
 0x1df   :  { %v1656_v18 = vadd.f32 %v1655_v55, %v1567_v2  ;;  %2133 = vmatpush.bf16.msrb.mxu2 %v3446_v5 }
 0x1e1   :  { %v1745_v34 = vadd.f32 %v1744_v26, %v1656_v18 }
 0x1e2   :  { %v1479_v36 = vpop.f32.mrf.mxu2 }
 0x1e3   :  { %v1480_v31 = vadd.f32 %v1479_v36, %v4194_v13  ;;  %v1568_v62 = vpop.f32.mrf.mxu3  ;;  %v2348_v6 = vmax.f32 %v1745_v34, 0.0 }
 0x1e4   :  { %v1660_v45 = vpop.f32.mrf.mxu0 }
 0x1e5   :  { %v1569_v57 = vadd.f32 %v1568_v62, %v1480_v31 }
 0x1e6   :  { %v1749_v35 = vpop.f32.mrf.mxu1 }
 0x1e7   :  { %1797 = vmatmul.bf16.gmra.mxu2 %v4056_v58  ;;  %1975 = vmatmul.bf16.gmra.mxu0 %v4188_v30  ;;  %v1658_v10 = vadd.f32 %v1657_v51, %v1569_v57  ;;  %v3783_v51 = vld [vmem:[#allocation5 + $0x2c4] sm:$0xf] }
 0x1e8   :  { %1886 = vmatmul.bf16.gmra.mxu3 %v4062_v61 }
 0x1e9   :  { %v1747_v46 = vadd.f32 %v1746_v43, %v1658_v10  ;;  %2064 = vmatmul.bf16.gmra.mxu1 %v4192_v32 }
 0x1ea   :  { %v1482_v27 = vpop.f32.mrf.mxu2 }
 0x1eb   :  { %v2350_v17 = vmax.f32 %v1747_v46, 0.0  ;;  %v1483_v54 = vadd.f32 %v1482_v27, %v4206_v33  ;;  %v1571_v13 = vpop.f32.mrf.mxu3 }
 0x1ec   :  { %v1662_v22 = vpop.f32.mrf.mxu0 }
 0x1ed   :  { %v1572_v59 = vadd.f32 %v1571_v13, %v1483_v54  ;;  %v4465_v14 = vpack.c.bf16 %v2350_v17, %v2348_v6  ;;  %v4977_v6 = vld [vmem:[#allocation26_spill] sm:$0xff]  ;;  %v4978_v17 = vld [vmem:[#allocation51_spill] sm:$0xff]  ;;  %v4979_v13 = vld [vmem:[#allocation29_spill] sm:$0xff] }
 0x1ee   :  { %v1751_v1 = vpop.f32.mrf.mxu1 }
 0x1ef   :  { %v1661_v58 = vadd.f32 %v1660_v45, %v1572_v59  ;;  %v4976_v45 = vld [vmem:[#allocation54_spill] sm:$0xff]  ;;  %v4980_v59 = vld [vmem:[#allocation53_spill] sm:$0xff] }
 0x1f1   :  { %v1750_v25 = vadd.f32 %v1749_v35, %v1661_v58 }
 0x1f2   :  { %v1484_v30 = vpop.f32.mrf.mxu2 }
 0x1f3   :  { %v1485_v55 = vadd.f32 %v1484_v30, %v4218_v49  ;;  %v1573_v61 = vpop.f32.mrf.mxu3  ;;  %v2352_v38 = vmax.f32 %v1750_v25, 0.0  ;;  %v4981_v30 = vld [vmem:[#allocation56_spill] sm:$0xff] }
 0x1f4   :  { %v1665_v50 = vpop.f32.mrf.mxu0 }
 0x1f5   :  { %v1574_v26 = vadd.f32 %v1573_v61, %v1485_v55 }
 0x1f6   :  { %v1754_v32 = vpop.f32.mrf.mxu1 }
 0x1f7   :  { %1802 = vmatmul.bf16.gmra.mxu2 %v4068_v16  ;;  %1980 = vmatmul.bf16.gmra.mxu0 %v4972_v37  ;;  %v1663_v33 = vadd.f32 %v1662_v22, %v1574_v26  ;;  %v3507_v16 = vld [vmem:[#allocation5 + $0x2c8] sm:$0xf0] }
 0x1f8   :  { %1891 = vmatmul.bf16.gmra.mxu3 %v4973_v28  ;;  %v3510_v2 = vor.u32 %v3783_v51, %v3507_v16  ;;  %v3765_v51 = vld [vmem:[#allocation5 + $0x234] sm:$0xf]  ;;  %v3435_v16 = vld [vmem:[#allocation5 + $0x238] sm:$0xf0] }
 0x1f9   :  { %v1752_v8 = vadd.f32 %v1751_v1, %v1663_v33  ;;  %2069 = vmatmul.bf16.gmra.mxu1 %v4974_v15 }
 0x1fa   :  { %v1487_v47 = vpop.f32.mrf.mxu2  ;;  %2222 = vmatpush.bf16.msrb.mxu3 %v3510_v2  ;;  %v4986_v2 = vld [vmem:[#allocation59_spill] sm:$0xff] }
 0x1fb   :  { %v2354_v49 = vmax.f32 %v1752_v8, 0.0  ;;  %v1488_v11 = vadd.f32 %v1487_v47, %v4975_v63  ;;  %v1576_v40 = vpop.f32.mrf.mxu3  ;;  %v4984_v63 = vld [vmem:[#allocation57_spill] sm:$0xff] }
 0x1fc   :  { %v1667_v29 = vpop.f32.mrf.mxu0 }
 0x1fd   :  { %v1577_v43 = vadd.f32 %v1576_v40, %v1488_v11  ;;  %v4473_v18 = vpack.c.bf16 %v2354_v49, %v2352_v38  ;;  %v4983_v49 = vld [vmem:[#allocation30_spill] sm:$0xff]  ;;  %v4985_v40 = vld [vmem:[#allocation33_spill] sm:$0xff] }
 0x1fe   :  { %v1756_v34 = vpop.f32.mrf.mxu1 }
 0x1ff   :  { %v1666_v36 = vadd.f32 %v1665_v50, %v1577_v43  ;;  %v3438_v43 = vor.u32 %v3765_v51, %v3435_v16 }
 0x201   :  { %v1755_v31 = vadd.f32 %v1754_v32, %v1666_v36  ;;  %2134 = vmatpush.bf16.msrb.mxu2 %v3438_v43 }
 0x202   :  { %v1489_v62 = vpop.f32.mrf.mxu2 }
 0x203   :  { %v1490_v57 = vadd.f32 %v1489_v62, %v4976_v45  ;;  %v1578_v35 = vpop.f32.mrf.mxu3  ;;  %v2356_v58 = vmax.f32 %v1755_v31, 0.0  ;;  %v4987_v62 = vld [vmem:[#allocation62_spill] sm:$0xff] }
 0x204   :  { %v1670_v10 = vpop.f32.mrf.mxu0 }
 0x205   :  { %v1579_v46 = vadd.f32 %v1578_v35, %v1490_v57  ;;  %v3781_v35 = vld [vmem:[#allocation5 + $0x2b4] sm:$0xf] }
 0x206   :  { %v1759_v27 = vpop.f32.mrf.mxu1 }
 0x207   :  { %1807 = vmatmul.bf16.gmra.mxu2 %v4977_v6  ;;  %1985 = vmatmul.bf16.gmra.mxu0 %v4978_v17  ;;  %v1668_v54 = vadd.f32 %v1667_v29, %v1579_v46 }
 0x208   :  { %1896 = vmatmul.bf16.gmra.mxu3 %v4979_v13 }
 0x209   :  { %v1757_v22 = vadd.f32 %v1756_v34, %v1668_v54  ;;  %2074 = vmatmul.bf16.gmra.mxu1 %v4980_v59 }
 0x20a   :  { %v1492_v1 = vpop.f32.mrf.mxu2 }
 0x20b   :  { %v2358_v25 = vmax.f32 %v1757_v22, 0.0  ;;  %v1493_v55 = vadd.f32 %v1492_v1, %v4981_v30  ;;  %v1581_v61 = vpop.f32.mrf.mxu3  ;;  %v4988_v1 = vld [vmem:[#allocation66_spill] sm:$0xff] }
 0x20c   :  { %v1672_v50 = vpop.f32.mrf.mxu0 }
 0x20d   :  { %v1582_v26 = vadd.f32 %v1581_v61, %v1493_v55  ;;  %v4481_v32 = vpack.c.bf16 %v2358_v25, %v2356_v58 }
 0x20e   :  { %v1761_v37 = vpop.f32.mrf.mxu1 }
 0x20f   :  { %v1671_v33 = vadd.f32 %v1670_v10, %v1582_v26  ;;  %v3499_v10 = vld [vmem:[#allocation5 + $0x2b8] sm:$0xf0]  ;;  %v4990_v26 = vld [vmem:[#allocation63_spill] sm:$0xff] }
 0x211   :  { %v1760_v28 = vadd.f32 %v1759_v27, %v1671_v33  ;;  %v3502_v27 = vor.u32 %v3781_v35, %v3499_v10  ;;  %v4991_v33 = vld [vmem:[#allocation37_spill] sm:$0xff]  ;;  %v4995_v35 = vld [vmem:[#allocation15_spill] sm:$0xff] }
 0x212   :  { %v1494_v0 = vpop.f32.mrf.mxu2  ;;  %v4996_v10 = vld [vmem:[#allocation69_spill] sm:$0xff] }
 0x213   :  { %v1495_v8 = vadd.f32 %v1494_v0, %v4982_v39  ;;  %v1583_v15 = vpop.f32.mrf.mxu3  ;;  %v2360_v36 = vmax.f32 %v1760_v28, 0.0  ;;  %2223 = vmatpush.bf16.msrb.mxu3 %v3502_v27  ;;  %v4992_v0 = vld [vmem:[#allocation65_spill] sm:$0xff]  ;;  %v3798_v39 = vld [vmem:[#allocation8 + $0x38] sm:$0xff] }
 0x214   :  { %v1675_v5 = vpop.f32.mrf.mxu0  ;;  %2536 = vmatpush.bf16.msrb.mxu0 %v3798_v39  ;;  %v3835_v27 = vld [vmem:[#allocation7] sm:$0x3] }
 0x215   :  { %v1584_v47 = vadd.f32 %v1583_v15, %v1495_v8 }
 0x216   :  { %v1764_v38 = vpop.f32.mrf.mxu1 }
 0x217   :  { %1812 = vmatmul.bf16.gmra.mxu2 %v4983_v49  ;;  %1990 = vmatmul.bf16.gmra.mxu0 %v4984_v63  ;;  %v1673_v11 = vadd.f32 %v1672_v50, %v1584_v47  ;;  %v4989_v50 = vld [vmem:[#allocation34_spill] sm:$0xff]  ;;  %v4993_v47 = vld [vmem:[#allocation68_spill] sm:$0xff] }
 0x218   :  { %1901 = vmatmul.bf16.gmra.mxu3 %v4985_v40  ;;  %v3806_v40 = vld [vmem:[#allocation8 + $0x78] sm:$0xff] }
 0x219   :  { %v1762_v29 = vadd.f32 %v1761_v37, %v1673_v11  ;;  %2079 = vmatmul.bf16.gmra.mxu1 %v4986_v2 }
 0x21a   :  { %v1497_v34 = vpop.f32.mrf.mxu2  ;;  %2625 = vmatpush.bf16.msrb.mxu1 %v3806_v40 }
 0x21b   :  { %v2362_v31 = vmax.f32 %v1762_v29, 0.0  ;;  %v1498_v45 = vadd.f32 %v1497_v34, %v4987_v62  ;;  %v1586_v57 = vpop.f32.mrf.mxu3  ;;  %v4994_v34 = vld [vmem:[#allocation72_spill] sm:$0xff] }
 0x21c   :  { %v1677_v46 = vpop.f32.mrf.mxu0 }
 0x21d   :  { %v1587_v6 = vadd.f32 %v1586_v57, %v1498_v45  ;;  %v4489_v17 = vpack.c.bf16 %v2362_v31, %v2360_v36 }
 0x21e   :  { %v1766_v54 = vpop.f32.mrf.mxu1 }
 0x21f   :  { %v1676_v13 = vadd.f32 %v1675_v5, %v1587_v6  ;;  %v4502_v6 = vperm.slane %v3835_v27, 1 }
 0x221   :  { %v1765_v22 = vadd.f32 %v1764_v38, %v1676_v13  ;;  %v3763_v13 = vld [vmem:[#allocation5 + $0x224] sm:$0xf] }
 0x222   :  { %v1499_v59 = vpop.f32.mrf.mxu2 }
 0x223   :  { %v1500_v58 = vadd.f32 %v1499_v59, %v4988_v1  ;;  %v1588_v25 = vpop.f32.mrf.mxu3  ;;  %v2364_v15 = vmax.f32 %v1765_v22, 0.0  ;;  %v3427_v22 = vld [vmem:[#allocation5 + $0x228] sm:$0xf0]  ;;  %v4998_v1 = vld [vmem:[#allocation71_spill] sm:$0xff] }
 0x224   :  { %v1680_v30 = vpop.f32.mrf.mxu0 }
 0x225   :  { %v1589_v55 = vadd.f32 %v1588_v25, %v1500_v58  ;;  %v3430_v58 = vor.u32 %v3763_v13, %v3427_v22  ;;  %v3779_v25 = vld [vmem:[#allocation5 + $0x2a4] sm:$0xf] }
 0x226   :  { %v1769_v61 = vpop.f32.mrf.mxu1 }
 0x227   :  { %1817 = vmatmul.bf16.gmra.mxu2 %v4989_v50  ;;  %1995 = vmatmul.bf16.gmra.mxu0 %v4990_v26  ;;  %v1678_v37 = vadd.f32 %v1677_v46, %v1589_v55 }
 0x228   :  { %1906 = vmatmul.bf16.gmra.mxu3 %v4991_v33  ;;  %2135 = vmatpush.bf16.msrb.mxu2 %v3430_v58 }
 0x229   :  { %v1767_v28 = vadd.f32 %v1766_v54, %v1678_v37  ;;  %2084 = vmatmul.bf16.gmra.mxu1 %v4992_v0  ;;  %v4997_v54 = vld [vmem:[#allocation16_spill] sm:$0xff] }
 0x22a   :  { %v1502_v8 = vpop.f32.mrf.mxu2 }
 0x22b   :  { %v2366_v5 = vmax.f32 %v1767_v28, 0.0  ;;  %v1503_v38 = vadd.f32 %v1502_v8, %v4993_v47  ;;  %v1591_v49 = vpop.f32.mrf.mxu3 }
 0x22c   :  { %v1682_v63 = vpop.f32.mrf.mxu0 }
 0x22d   :  { %v1592_v11 = vadd.f32 %v1591_v49, %v1503_v38  ;;  %v4497_v51 = vpack.c.bf16 %v2366_v5, %v2364_v15 }
 0x22e   :  { %v1771_v16 = vpop.f32.mrf.mxu1 }
 0x22f   :  { %v1681_v29 = vadd.f32 %v1680_v30, %v1592_v11  ;;  %v3491_v30 = vld [vmem:[#allocation5 + $0x2a8] sm:$0xf0] }
 0x231   :  { %v1770_v2 = vadd.f32 %v1769_v61, %v1681_v29  ;;  %v3494_v61 = vor.u32 %v3779_v25, %v3491_v30  ;;  %v5000_v29 = vld [vmem:[#allocation74_spill] sm:$0xff] }
 0x232   :  { %v1504_v43 = vpop.f32.mrf.mxu2 }
 0x233   :  { %v1505_v36 = vadd.f32 %v1504_v43, %v4994_v34  ;;  %v1593_v31 = vpop.f32.mrf.mxu3  ;;  %v2368_v50 = vmax.f32 %v1770_v2, 0.0  ;;  %2224 = vmatpush.bf16.msrb.mxu3 %v3494_v61  ;;  %v5001_v43 = vld [vmem:[#allocation18_spill] sm:$0xff] }
 0x234   :  { %v1961_v62 = vpop.f32.mrf.mxu0 }
 0x235   :  { %v1594_v45 = vadd.f32 %v1593_v31, %v1505_v36  ;;  %v5002_v36 = vld [vmem:[#allocation76_spill] sm:$0xff]  ;;  %v3797_v31 = vld [vmem:[#allocation8 + $0x30] sm:$0xff] }
 0x236   :  { %v2050_v57 = vpop.f32.mrf.mxu1  ;;  %2537 = vmatpush.bf16.msrb.mxu0 %v3797_v31 }
 0x237   :  { %1822 = vmatmul.bf16.gmra.mxu2 %v4995_v35  ;;  %2000 = vmatmul.bf16.gmra.mxu0 %v4996_v10  ;;  %v1683_v46 = vadd.f32 %v1682_v63, %v1594_v45 }
 0x238   :  { %1911 = vmatmul.bf16.gmra.mxu3 %v4997_v54 }
 0x239   :  { %v1772_v59 = vadd.f32 %v1771_v16, %v1683_v46  ;;  %2089 = vmatmul.bf16.gmra.mxu1 %v4998_v1  ;;  %v4999_v16 = vld [vmem:[#allocation17_spill] sm:$0xff] }
 0x23a   :  { %v1783_v55 = vpop.f32.mrf.mxu2  ;;  %v3805_v46 = vld [vmem:[#allocation8 + $0x70] sm:$0xff] }
 0x23b   :  { %v2370_v26 = vmax.f32 %v1772_v59, 0.0  ;;  %v1784_v37 = vadd.f32 %v1783_v55, %v4502_v6  ;;  %v1872_v33 = vpop.f32.mrf.mxu3  ;;  %2626 = vmatpush.bf16.msrb.mxu1 %v3805_v46  ;;  %v5003_v55 = vld [vmem:[#allocation19_spill] sm:$0xff] }
 0x23c   :  { %v1963_v28 = vpop.f32.mrf.mxu0 }
 0x23d   :  { %v1873_v0 = vadd.f32 %v1872_v33, %v1784_v37  ;;  %v4507_v39 = vpack.c.bf16 %v2370_v26, %v2368_v50  ;;  %v5004_v50 = vld [vmem:[#allocation20_spill] sm:$0xff]  ;;  %v3761_v26 = vld [vmem:[#allocation5 + $0x214] sm:$0xf]  ;;  %v3419_v37 = vld [vmem:[#allocation5 + $0x218] sm:$0xf0] }
 0x23e   :  { %v2052_v8 = vpop.f32.mrf.mxu1 }
 0x23f   :  { %v1962_v15 = vadd.f32 %v1961_v62, %v1873_v0  ;;  %v3777_v0 = vld [vmem:[#allocation5 + $0x294] sm:$0xf] }
 0x241   :  { %v4509_v5 = vadd.f32 %v2050_v57, %v1962_v15 }
 0x242   :  { %v1785_v47 = vpop.f32.mrf.mxu2 }
 0x243   :  { %v1786_v38 = vadd.f32 %v1785_v47, %v4502_v6  ;;  %v1874_v49 = vpop.f32.mrf.mxu3 }
 0x244   :  { %v1966_v63 = vpop.f32.mrf.mxu0 }
 0x245   :  { %v1875_v11 = vadd.f32 %v1874_v49, %v1786_v38 }
 0x246   :  { %v2055_v40 = vpop.f32.mrf.mxu1 }
 0x247   :  { %1827 = vmatmul.bf16.gmra.mxu2 %v4999_v16  ;;  %2005 = vmatmul.bf16.gmra.mxu0 %v5000_v29  ;;  %v1964_v2 = vadd.f32 %v1963_v28, %v1875_v11  ;;  %v3422_v28 = vor.u32 %v3761_v26, %v3419_v37  ;;  %v5007_v37 = vld [vmem:[#allocation23_spill] sm:$0xff] }
 0x248   :  { %1916 = vmatmul.bf16.gmra.mxu3 %v5001_v43 }
 0x249   :  { %v4515_v34 = vadd.f32 %v2052_v8, %v1964_v2  ;;  %2094 = vmatmul.bf16.gmra.mxu1 %v5002_v36  ;;  %v3483_v8 = vld [vmem:[#allocation5 + $0x298] sm:$0xf0]  ;;  %2136 = vmatpush.bf16.msrb.mxu2 %v3422_v28 }
 0x24a   :  { %v1788_v62 = vpop.f32.mrf.mxu2  ;;  %v3486_v47 = vor.u32 %v3777_v0, %v3483_v8  ;;  %v5008_v0 = vld [vmem:[#allocation24_spill] sm:$0xff]  ;;  %v3759_v8 = vld [vmem:[#allocation5 + $0x204] sm:$0xf] }
 0x24b   :  { %v1789_v45 = vadd.f32 %v1788_v62, %v4502_v6  ;;  %v1877_v57 = vpop.f32.mrf.mxu3  ;;  %v5005_v62 = vld [vmem:[#allocation21_spill] sm:$0xff] }
 0x24c   :  { %v1968_v35 = vpop.f32.mrf.mxu0  ;;  %2225 = vmatpush.bf16.msrb.mxu3 %v3486_v47 }
 0x24d   :  { %v1878_v10 = vadd.f32 %v1877_v57, %v1789_v45  ;;  %v5006_v57 = vld [vmem:[#allocation22_spill] sm:$0xff] }
 0x24e   :  { %v2057_v27 = vpop.f32.mrf.mxu1 }
 0x24f   :  { %v1967_v54 = vadd.f32 %v1966_v63, %v1878_v10  ;;  %v3796_v10 = vld [vmem:[#allocation8 + $0x28] sm:$0xff] }
 0x250   :  { %2538 = vmatpush.bf16.msrb.mxu0 %v3796_v10  ;;  %v3795_v10 = vld [vmem:[#allocation8 + $0x20] sm:$0xff] }
 0x251   :  { %v4519_v13 = vadd.f32 %v2055_v40, %v1967_v54 }
 0x252   :  { %v1790_v22 = vpop.f32.mrf.mxu2 }
 0x253   :  { %v1791_v59 = vadd.f32 %v1790_v22, %v4502_v6  ;;  %v1879_v1 = vpop.f32.mrf.mxu3 }
 0x254   :  { %v1971_v58 = vpop.f32.mrf.mxu0  ;;  %2539 = vmatpush.bf16.msrb.mxu0 %v3795_v10 }
 0x255   :  { %v1880_v25 = vadd.f32 %v1879_v1, %v1791_v59  ;;  %v3804_v1 = vld [vmem:[#allocation8 + $0x68] sm:$0xff] }
 0x256   :  { %v2060_v30 = vpop.f32.mrf.mxu1  ;;  %2627 = vmatpush.bf16.msrb.mxu1 %v3804_v1 }
 0x257   :  { %1832 = vmatmul.bf16.gmra.mxu2 %v5003_v55  ;;  %2010 = vmatmul.bf16.gmra.mxu0 %v4340_v52  ;;  %v1969_v61 = vadd.f32 %v1968_v35, %v1880_v25 }
 0x258   :  { %1921 = vmatmul.bf16.gmra.mxu3 %v5004_v50 }
 0x259   :  { %v4525_v33 = vadd.f32 %v2057_v27, %v1969_v61  ;;  %2099 = vmatmul.bf16.gmra.mxu1 %v4344_v42 }
 0x25a   :  { %v1793_v15 = vpop.f32.mrf.mxu2 }
 0x25b   :  { %v1794_v38 = vadd.f32 %v1793_v15, %v4502_v6  ;;  %v1882_v49 = vpop.f32.mrf.mxu3  ;;  %v3411_v15 = vld [vmem:[#allocation5 + $0x208] sm:$0xf0] }
 0x25c   :  { %v1973_v63 = vpop.f32.mrf.mxu0 }
 0x25d   :  { %v1883_v52 = vadd.f32 %v1882_v49, %v1794_v38  ;;  %v5009_v38 = vld [vmem:[#allocation86_spill] sm:$0xff]  ;;  %v3414_v49 = vor.u32 %v3759_v8, %v3411_v15  ;;  %v3792_v15 = vld [vmem:[#allocation8 + $0x8] sm:$0xff] }
 0x25e   :  { %v2062_v11 = vpop.f32.mrf.mxu1 }
 0x25f   :  { %v1972_v40 = vadd.f32 %v1971_v58, %v1883_v52  ;;  %v3475_v52 = vld [vmem:[#allocation5 + $0x288] sm:$0xf0]  ;;  %2137 = vmatpush.bf16.msrb.mxu2 %v3414_v49 }
 0x261   :  { %v4529_v16 = vadd.f32 %v2060_v30, %v1972_v40 }
 0x262   :  { %v1795_v29 = vpop.f32.mrf.mxu2 }
 0x263   :  { %v1796_v2 = vadd.f32 %v1795_v29, %v4502_v6  ;;  %v1884_v42 = vpop.f32.mrf.mxu3 }
 0x264   :  { %v1976_v43 = vpop.f32.mrf.mxu0 }
 0x265   :  { %v1885_v36 = vadd.f32 %v1884_v42, %v1796_v2 }
 0x266   :  { %v2065_v31 = vpop.f32.mrf.mxu1 }
 0x267   :  { %1837 = vmatmul.bf16.gmra.mxu2 %v5005_v62  ;;  %2015 = vmatmul.bf16.gmra.mxu0 %v4356_v53  ;;  %v1974_v45 = vadd.f32 %v1973_v63, %v1885_v36  ;;  %v3775_v63 = vld [vmem:[#allocation5 + $0x284] sm:$0xf] }
 0x268   :  { %1926 = vmatmul.bf16.gmra.mxu3 %v5006_v57  ;;  %v3478_v40 = vor.u32 %v3775_v63, %v3475_v52 }
 0x269   :  { %v4535_v35 = vadd.f32 %v2062_v11, %v1974_v45  ;;  %2104 = vmatmul.bf16.gmra.mxu1 %v4360_v60 }
 0x26a   :  { %v1798_v46 = vpop.f32.mrf.mxu2  ;;  %2226 = vmatpush.bf16.msrb.mxu3 %v3478_v40 }
 0x26b   :  { %v1799_v27 = vadd.f32 %v1798_v46, %v4502_v6  ;;  %v1887_v54 = vpop.f32.mrf.mxu3 }
 0x26c   :  { %v1978_v22 = vpop.f32.mrf.mxu0 }
 0x26d   :  { %v1888_v59 = vadd.f32 %v1887_v54, %v1799_v27 }
 0x26e   :  { %v2067_v58 = vpop.f32.mrf.mxu1 }
 0x26f   :  { %v1977_v25 = vadd.f32 %v1976_v43, %v1888_v59  ;;  %v5011_v59 = vld [vmem:[#allocation89_spill] sm:$0xff] }
 0x271   :  { %v4539_v53 = vadd.f32 %v2065_v31, %v1977_v25  ;;  %v5012_v25 = vld [vmem:[#allocation28_spill] sm:$0xff] }
 0x272   :  { %v1800_v30 = vpop.f32.mrf.mxu2 }
 0x273   :  { %v1801_v55 = vadd.f32 %v1800_v30, %v4502_v6  ;;  %v1889_v61 = vpop.f32.mrf.mxu3  ;;  %v5013_v30 = vld [vmem:[#allocation91_spill] sm:$0xff] }
 0x274   :  { %v1981_v50 = vpop.f32.mrf.mxu0 }
 0x275   :  { %v1890_v60 = vadd.f32 %v1889_v61, %v1801_v55 }
 0x276   :  { %v2070_v26 = vpop.f32.mrf.mxu1 }
 0x277   :  { %1842 = vmatmul.bf16.gmra.mxu2 %v5007_v37  ;;  %2020 = vmatmul.bf16.gmra.mxu0 %v4372_v23  ;;  %v1979_v28 = vadd.f32 %v1978_v22, %v1890_v60  ;;  %v5010_v22 = vld [vmem:[#allocation27_spill] sm:$0xff]  ;;  %v3793_v60 = vld [vmem:[#allocation8 + $0x10] sm:$0xff] }
 0x278   :  { %1931 = vmatmul.bf16.gmra.mxu3 %v5008_v0 }
 0x279   :  { %v4545_v47 = vadd.f32 %v2067_v58, %v1979_v28  ;;  %2109 = vmatmul.bf16.gmra.mxu1 %v5009_v38  ;;  %v3794_v58 = vld [vmem:[#allocation8 + $0x18] sm:$0xff]  ;;  %v3803_v28 = vld [vmem:[#allocation8 + $0x60] sm:$0xff] }
 0x27a   :  { %v1803_v11 = vpop.f32.mrf.mxu2  ;;  %2540 = vmatpush.bf16.msrb.mxu0 %v3794_v58  ;;  %2628 = vmatpush.bf16.msrb.mxu1 %v3803_v28 }
 0x27b   :  { %v1804_v29 = vadd.f32 %v1803_v11, %v4502_v6  ;;  %v1892_v2 = vpop.f32.mrf.mxu3  ;;  %v3791_v11 = vld [vmem:[#allocation8] sm:$0xff] }
 0x27c   :  { %v1983_v42 = vpop.f32.mrf.mxu0 }
 0x27d   :  { %v1893_v23 = vadd.f32 %v1892_v2, %v1804_v29 }
 0x27e   :  { %v4549_v43 = vpop.f32.mrf.mxu1  ;;  %2541 = vmatpush.bf16.msrb.mxu0 %v3793_v60 }
 0x27f   :  { %v1982_v36 = vadd.f32 %v1981_v50, %v1893_v23 }
 0x281   :  { %v4551_v31 = vadd.f32 %v2070_v26, %v1982_v36  ;;  %v5015_v36 = vld [vmem:[#allocation32_spill] sm:$0xff] }
 0x282   :  { %v1805_v62 = vpop.f32.mrf.mxu2  ;;  %2542 = vmatpush.bf16.msrb.mxu0 %v3792_v15  ;;  %v3802_v15 = vld [vmem:[#allocation8 + $0x58] sm:$0xff] }
 0x283   :  { %v1806_v45 = vadd.f32 %v1805_v62, %v4502_v6  ;;  %v1894_v57 = vpop.f32.mrf.mxu3  ;;  %2629 = vmatpush.bf16.msrb.mxu1 %v3802_v15  ;;  %v5023_v15 = vld [vmem:[#allocation41_spill] sm:$0xff] }
 0x284   :  { %v1986_v46 = vpop.f32.mrf.mxu0 }
 0x285   :  { %v1895_v27 = vadd.f32 %v1894_v57, %v1806_v45 }
 0x286   :  { %v2075_v54 = vpop.f32.mrf.mxu1  ;;  %2543 = vmatpush.bf16.msrb.mxu0 %v3791_v11 }
 0x287   :  { %1847 = vmatmul.bf16.gmra.mxu2 %v5010_v22  ;;  %2025 = vmatmul.bf16.gmra.mxu0 %v5011_v59  ;;  %v4556_v1 = vadd.f32 %v1983_v42, %v1895_v27  ;;  %v5014_v42 = vld [vmem:[#allocation31_spill] sm:$0xff] }
 0x288   :  { %1936 = vmatmul.bf16.gmra.mxu3 %v5012_v25 }
 0x289   :  { %2114 = vmatmul.bf16.gmra.mxu1 %v5013_v30 }
 0x28a   :  { %v1808_v55 = vpop.f32.mrf.mxu2 }
 0x28b   :  { %v1809_v61 = vadd.f32 %v1808_v55, %v4502_v6  ;;  %v1897_v50 = vpop.f32.mrf.mxu3 }
 0x28c   :  { %v1988_v26 = vpop.f32.mrf.mxu0 }
 0x28d   :  { %v1898_v37 = vadd.f32 %v1897_v50, %v1809_v61  ;;  %v5016_v61 = vld [vmem:[#allocation35_spill] sm:$0xff]  ;;  %v5017_v50 = vld [vmem:[#allocation36_spill] sm:$0xff] }
 0x28e   :  { %v4561_v0 = vpop.f32.mrf.mxu1 }
 0x28f   :  { %v1987_v8 = vadd.f32 %v1986_v46, %v1898_v37 }
 0x291   :  { %v4563_v38 = vadd.f32 %v2075_v54, %v1987_v8 }
 0x292   :  { %v1810_v49 = vpop.f32.mrf.mxu2 }
 0x293   :  { %v1811_v63 = vadd.f32 %v1810_v49, %v4502_v6  ;;  %v1899_v52 = vpop.f32.mrf.mxu3 }
 0x294   :  { %v1991_v40 = vpop.f32.mrf.mxu0 }
 0x295   :  { %v1900_v29 = vadd.f32 %v1899_v52, %v1811_v63 }
 0x296   :  { %v2080_v2 = vpop.f32.mrf.mxu1 }
 0x297   :  { %1852 = vmatmul.bf16.gmra.mxu2 %v5014_v42  ;;  %2030 = vmatmul.bf16.gmra.mxu0 %v4404_v4  ;;  %v4568_v23 = vadd.f32 %v1988_v26, %v1900_v29  ;;  %v5018_v42 = vld [vmem:[#allocation38_spill] sm:$0xff] }
 0x298   :  { %1941 = vmatmul.bf16.gmra.mxu3 %v5015_v36  ;;  %v5019_v36 = vld [vmem:[#allocation78_spill] sm:$0xff] }
 0x299   :  { %2119 = vmatmul.bf16.gmra.mxu1 %v4408_v7 }
 0x29a   :  { %v1813_v62 = vpop.f32.mrf.mxu2 }
 0x29b   :  { %v1814_v45 = vadd.f32 %v1813_v62, %v4502_v6  ;;  %v1902_v57 = vpop.f32.mrf.mxu3 }
 0x29c   :  { %v1993_v10 = vpop.f32.mrf.mxu0 }
 0x29d   :  { %v1903_v46 = vadd.f32 %v1902_v57, %v1814_v45  ;;  %v5020_v45 = vld [vmem:[#allocation39_spill] sm:$0xff] }
 0x29e   :  { %v4573_v27 = vpop.f32.mrf.mxu1 }
 0x29f   :  { %v1992_v54 = vadd.f32 %v1991_v40, %v1903_v46 }
 0x2a1   :  { %v4575_v22 = vadd.f32 %v2080_v2, %v1992_v54 }
 0x2a2   :  { %v1815_v59 = vpop.f32.mrf.mxu2 }
 0x2a3   :  { %v1816_v4 = vadd.f32 %v1815_v59, %v4502_v6  ;;  %v1904_v58 = vpop.f32.mrf.mxu3 }
 0x2a4   :  { %v1996_v25 = vpop.f32.mrf.mxu0 }
 0x2a5   :  { %v1905_v30 = vadd.f32 %v1904_v58, %v1816_v4 }
 0x2a6   :  { %v2085_v55 = vpop.f32.mrf.mxu1 }
 0x2a7   :  { %1857 = vmatmul.bf16.gmra.mxu2 %v5016_v61  ;;  %2035 = vmatmul.bf16.gmra.mxu0 %v4420_v56  ;;  %v4580_v7 = vadd.f32 %v1993_v10, %v1905_v30 }
 0x2a8   :  { %1946 = vmatmul.bf16.gmra.mxu3 %v5017_v50 }
 0x2a9   :  { %2124 = vmatmul.bf16.gmra.mxu1 %v4424_v21 }
 0x2aa   :  { %v1818_v60 = vpop.f32.mrf.mxu2 }
 0x2ab   :  { %v1819_v26 = vadd.f32 %v1818_v60, %v4502_v6  ;;  %v1907_v37 = vpop.f32.mrf.mxu3 }
 0x2ac   :  { %v1998_v28 = vpop.f32.mrf.mxu0 }
 0x2ad   :  { %v1908_v8 = vadd.f32 %v1907_v37, %v1819_v26  ;;  %v5021_v37 = vld [vmem:[#allocation40_spill] sm:$0xff] }
 0x2ae   :  { %v4585_v49 = vpop.f32.mrf.mxu1 }
 0x2af   :  { %v1997_v63 = vadd.f32 %v1996_v25, %v1908_v8 }
 0x2b1   :  { %v4587_v52 = vadd.f32 %v2085_v55, %v1997_v63 }
 0x2b2   :  { %v1820_v56 = vpop.f32.mrf.mxu2 }
 0x2b3   :  { %v1821_v11 = vadd.f32 %v1820_v56, %v4502_v6  ;;  %v1909_v40 = vpop.f32.mrf.mxu3 }
 0x2b4   :  { %v2001_v29 = vpop.f32.mrf.mxu0 }
 0x2b5   :  { %v1910_v2 = vadd.f32 %v1909_v40, %v1821_v11 }
 0x2b6   :  { %v2090_v21 = vpop.f32.mrf.mxu1 }
 0x2b7   :  { %2138 = vmatmul.bf16.vlgmr.msrb.gmra.mxu2 %v5018_v42  ;;  %2544 = vmatmul.bf16.vlgmr.msrb.gmra.mxu0 %v5019_v36  ;;  %v4592_v62 = vadd.f32 %v1998_v28, %v1910_v2  ;;  %v5022_v28 = vld [vmem:[#allocation81_spill] sm:$0xff] }
 0x2b8   :  { %2227 = vmatmul.bf16.vlgmr.msrb.gmra.mxu3 %v5020_v45  ;;  %v3801_v2 = vld [vmem:[#allocation8 + $0x50] sm:$0xff] }
 0x2b9   :  { %2630 = vmatpush.bf16.msrb.mxu1 %v3801_v2 }
 0x2ba   :  { %v1823_v57 = vpop.f32.mrf.mxu2 }
 0x2bb   :  { %v1824_v10 = vadd.f32 %v1823_v57, %v4502_v6  ;;  %v1912_v46 = vpop.f32.mrf.mxu3 }
 0x2bc   :  { %v2003_v54 = vpop.f32.mrf.mxu0 }
 0x2bd   :  { %v1913_v59 = vadd.f32 %v1912_v46, %v1824_v10 }
 0x2be   :  { %v4596_v4 = vpop.f32.mrf.mxu1 }
 0x2bf   :  { %v2002_v58 = vadd.f32 %v2001_v29, %v1913_v59 }
 0x2c1   :  { %v4598_v25 = vadd.f32 %v2090_v21, %v2002_v58  ;;  %v5024_v58 = vld [vmem:[#allocation42_spill] sm:$0xff] }
 0x2c2   :  { %v1825_v30 = vpop.f32.mrf.mxu2 }
 0x2c3   :  { %v1826_v55 = vadd.f32 %v1825_v30, %v4502_v6  ;;  %v1914_v61 = vpop.f32.mrf.mxu3  ;;  %v5025_v30 = vld [vmem:[#allocation84_spill] sm:$0xff] }
 0x2c4   :  { %v2006_v50 = vpop.f32.mrf.mxu0 }
 0x2c5   :  { %v1915_v60 = vadd.f32 %v1914_v61, %v1826_v55  ;;  %v5026_v61 = vld [vmem:[#allocation43_spill] sm:$0xff] }
 0x2c6   :  { %v2095_v26 = vpop.f32.mrf.mxu1 }
 0x2c7   :  { %2143 = vmatmul.bf16.gmra.mxu2 %v5021_v37  ;;  %2549 = vmatmul.bf16.gmra.mxu0 %v5022_v28  ;;  %v4603_v8 = vadd.f32 %v2003_v54, %v1915_v60 }
 0x2c8   :  { %2232 = vmatmul.bf16.gmra.mxu3 %v5023_v15 }
 0x2ca   :  { %v1828_v63 = vpop.f32.mrf.mxu2 }
 0x2cb   :  { %v1829_v56 = vadd.f32 %v1828_v63, %v4502_v6  ;;  %v1917_v11 = vpop.f32.mrf.mxu3 }
 0x2cc   :  { %v2008_v40 = vpop.f32.mrf.mxu0 }
 0x2cd   :  { %v1918_v29 = vadd.f32 %v1917_v11, %v1829_v56 }
 0x2ce   :  { %v4607_v21 = vpop.f32.mrf.mxu1 }
 0x2cf   :  { %v2007_v42 = vadd.f32 %v2006_v50, %v1918_v29 }
 0x2d1   :  { %v4609_v36 = vadd.f32 %v2095_v26, %v2007_v42 }
 0x2d2   :  { %v1830_v45 = vpop.f32.mrf.mxu2 }
 0x2d3   :  { %v1831_v57 = vadd.f32 %v1830_v45, %v4502_v6  ;;  %v1919_v10 = vpop.f32.mrf.mxu3 }
 0x2d4   :  { %v2011_v46 = vpop.f32.mrf.mxu0 }
 0x2d5   :  { %v1920_v54 = vadd.f32 %v1919_v10, %v1831_v57  ;;  %v5027_v57 = vld [vmem:[#allocation44_spill] sm:$0xff] }
 0x2d6   :  { %v2100_v59 = vpop.f32.mrf.mxu1  ;;  %v5028_v10 = vld [vmem:[#allocation88_spill] sm:$0xff] }
 0x2d7   :  { %2148 = vmatmul.bf16.gmra.mxu2 %v5024_v58  ;;  %2554 = vmatmul.bf16.gmra.mxu0 %v5025_v30  ;;  %v4614_v55 = vadd.f32 %v2008_v40, %v1920_v54  ;;  %v5029_v58 = vld [vmem:[#allocation45_spill] sm:$0xff] }
 0x2d8   :  { %2237 = vmatmul.bf16.gmra.mxu3 %v5026_v61 }
 0x2da   :  { %v1833_v60 = vpop.f32.mrf.mxu2 }
 0x2db   :  { %v1834_v50 = vadd.f32 %v1833_v60, %v4502_v6  ;;  %v1922_v26 = vpop.f32.mrf.mxu3 }
 0x2dc   :  { %v2013_v37 = vpop.f32.mrf.mxu0 }
 0x2dd   :  { %v1923_v28 = vadd.f32 %v1922_v26, %v1834_v50  ;;  %v3800_v50 = vld [vmem:[#allocation8 + $0x48] sm:$0xff] }
 0x2de   :  { %v4618_v15 = vpop.f32.mrf.mxu1  ;;  %2631 = vmatpush.bf16.msrb.mxu1 %v3800_v50 }
 0x2df   :  { %v2012_v63 = vadd.f32 %v2011_v46, %v1923_v28 }
 0x2e1   :  { %v4620_v56 = vadd.f32 %v2100_v59, %v2012_v63 }
 0x2e2   :  { %v1835_v11 = vpop.f32.mrf.mxu2 }
 0x2e3   :  { %v1836_v29 = vadd.f32 %v1835_v11, %v4502_v6  ;;  %v1924_v2 = vpop.f32.mrf.mxu3 }
 0x2e4   :  { %v2016_v42 = vpop.f32.mrf.mxu0 }
 0x2e5   :  { %v1925_v40 = vadd.f32 %v1924_v2, %v1836_v29 }
 0x2e6   :  { %v2105_v45 = vpop.f32.mrf.mxu1 }
 0x2e7   :  { %2153 = vmatmul.bf16.gmra.mxu2 %v5027_v57  ;;  %2559 = vmatmul.bf16.gmra.mxu0 %v5028_v10  ;;  %v4625_v54 = vadd.f32 %v2013_v37, %v1925_v40  ;;  %v5031_v10 = vld [vmem:[#allocation47_spill] sm:$0xff] }
 0x2e8   :  { %2242 = vmatmul.bf16.gmra.mxu3 %v5029_v58  ;;  %v5032_v58 = vld [vmem:[#allocation93_spill] sm:$0xff] }
 0x2ea   :  { %v1838_v30 = vpop.f32.mrf.mxu2 }
 0x2eb   :  { %v1839_v46 = vadd.f32 %v1838_v30, %v4502_v6  ;;  %v1927_v59 = vpop.f32.mrf.mxu3 }
 0x2ec   :  { %v2018_v61 = vpop.f32.mrf.mxu0 }
 0x2ed   :  { %v1928_v60 = vadd.f32 %v1927_v59, %v1839_v46  ;;  %v5034_v46 = vld [vmem:[#allocation49_spill] sm:$0xff] }
 0x2ee   :  { %v4629_v26 = vpop.f32.mrf.mxu1 }
 0x2ef   :  { %5030 = vst [vmem:[#allocation46_spill] sm:$0xff] %v4629_v26  ;;  %v2017_v28 = vadd.f32 %v2016_v42, %v1928_v60 }
 0x2f1   :  { %v4631_v63 = vadd.f32 %v2105_v45, %v2017_v28 }
 0x2f2   :  { %v1840_v11 = vpop.f32.mrf.mxu2 }
 0x2f3   :  { %v1841_v29 = vadd.f32 %v1840_v11, %v4502_v6  ;;  %v1929_v37 = vpop.f32.mrf.mxu3 }
 0x2f4   :  { %v2021_v2 = vpop.f32.mrf.mxu0 }
 0x2f5   :  { %v1930_v40 = vadd.f32 %v1929_v37, %v1841_v29 }
 0x2f6   :  { %v2110_v57 = vpop.f32.mrf.mxu1 }
 0x2f7   :  { %2158 = vmatmul.bf16.gmra.mxu2 %v5031_v10  ;;  %2564 = vmatmul.bf16.gmra.mxu0 %v5032_v58  ;;  %v4636_v30 = vadd.f32 %v2018_v61, %v1930_v40 }
 0x2f8   :  { %2247 = vmatmul.bf16.gmra.mxu3 %v5034_v46 }
 0x2f9   :  { %5033 = vst [vmem:[#allocation25_spill] sm:$0xff] %v4636_v30  ;;  %v5036_v30 = vld [vmem:[#allocation52_spill] sm:$0xff] }
 0x2fa   :  { %v1843_v59 = vpop.f32.mrf.mxu2 }
 0x2fb   :  { %v1844_v42 = vadd.f32 %v1843_v59, %v4502_v6  ;;  %v1932_v45 = vpop.f32.mrf.mxu3  ;;  %v5037_v59 = vld [vmem:[#allocation55_spill] sm:$0xff] }
 0x2fc   :  { %v2023_v60 = vpop.f32.mrf.mxu0 }
 0x2fd   :  { %v1933_v50 = vadd.f32 %v1932_v45, %v1844_v42 }
 0x2fe   :  { %v4640_v28 = vpop.f32.mrf.mxu1 }
 0x2ff   :  { %5035 = vst [vmem:[#allocation48_spill] sm:$0xff] %v4640_v28  ;;  %v2022_v11 = vadd.f32 %v2021_v2, %v1933_v50  ;;  %v3799_v50 = vld [vmem:[#allocation8 + $0x40] sm:$0xff] }
 0x300   :  { %2632 = vmatpush.bf16.msrb.mxu1 %v3799_v50 }
 0x301   :  { %v4642_v26 = vadd.f32 %v2110_v57, %v2022_v11 }
 0x302   :  { %v1845_v29 = vpop.f32.mrf.mxu2 }
 0x303   :  { %v1846_v37 = vadd.f32 %v1845_v29, %v4502_v6  ;;  %v1934_v10 = vpop.f32.mrf.mxu3 }
 0x304   :  { %v2026_v58 = vpop.f32.mrf.mxu0 }
 0x305   :  { %v1935_v61 = vadd.f32 %v1934_v10, %v1846_v37 }
 0x306   :  { %v2115_v40 = vpop.f32.mrf.mxu1 }
 0x307   :  { %2163 = vmatmul.bf16.gmra.mxu2 %v5036_v30  ;;  %2569 = vmatmul.bf16.gmra.mxu0 %v4417_v41  ;;  %v4647_v46 = vadd.f32 %v2023_v60, %v1935_v61  ;;  %v5039_v61 = vld [vmem:[#allocation58_spill] sm:$0xff] }
 0x308   :  { %2252 = vmatmul.bf16.gmra.mxu3 %v5037_v59 }
 0x30a   :  { %v1848_v42 = vpop.f32.mrf.mxu2 }
 0x30b   :  { %v1849_v2 = vadd.f32 %v1848_v42, %v4502_v6  ;;  %v1937_v57 = vpop.f32.mrf.mxu3 }
 0x30c   :  { %v2028_v11 = vpop.f32.mrf.mxu0 }
 0x30d   :  { %v1938_v45 = vadd.f32 %v1937_v57, %v1849_v2  ;;  %v5040_v2 = vld [vmem:[#allocation61_spill] sm:$0xff] }
 0x30e   :  { %v4651_v28 = vpop.f32.mrf.mxu1 }
 0x30f   :  { %v2027_v29 = vadd.f32 %v2026_v58, %v1938_v45  ;;  %5038 = vst [vmem:[#allocation50_spill] sm:$0xff] %v4651_v28 }
 0x311   :  { %v4653_v37 = vadd.f32 %v2115_v40, %v2027_v29 }
 0x312   :  { %v1850_v30 = vpop.f32.mrf.mxu2 }
 0x313   :  { %v1851_v41 = vadd.f32 %v1850_v30, %v4502_v6  ;;  %v1939_v60 = vpop.f32.mrf.mxu3 }
 0x314   :  { %v2031_v42 = vpop.f32.mrf.mxu0 }
 0x315   :  { %v1940_v10 = vadd.f32 %v1939_v60, %v1851_v41 }
 0x316   :  { %v2120_v57 = vpop.f32.mrf.mxu1 }
 0x317   :  { %2168 = vmatmul.bf16.gmra.mxu2 %v5039_v61  ;;  %2574 = vmatmul.bf16.gmra.mxu0 %v4433_v3  ;;  %v4658_v59 = vadd.f32 %v2028_v11, %v1940_v10  ;;  %v5043_v10 = vld [vmem:[#allocation64_spill] sm:$0xff] }
 0x318   :  { %2257 = vmatmul.bf16.gmra.mxu3 %v5040_v2 }
 0x31a   :  { %v1853_v58 = vpop.f32.mrf.mxu2 }
 0x31b   :  { %v1854_v45 = vadd.f32 %v1853_v58, %v4502_v6  ;;  %v1942_v40 = vpop.f32.mrf.mxu3  ;;  %v5044_v58 = vld [vmem:[#allocation67_spill] sm:$0xff] }
 0x31c   :  { %v2033_v30 = vpop.f32.mrf.mxu0 }
 0x31d   :  { %v1943_v50 = vadd.f32 %v1942_v40, %v1854_v45 }
 0x31e   :  { %v4665_v3 = vpop.f32.mrf.mxu1 }
 0x31f   :  { %v2032_v29 = vadd.f32 %v2031_v42, %v1943_v50  ;;  %5042 = vst [vmem:[#allocation26_spill] sm:$0xff] %v4665_v3 }
 0x321   :  { %v4662_v28 = vadd.f32 %v2120_v57, %v2032_v29 }
 0x322   :  { %v1855_v41 = vpop.f32.mrf.mxu2 }
 0x323   :  { %5041 = vst [vmem:[#allocation54_spill] sm:$0xff] %v4662_v28  ;;  %v1856_v60 = vadd.f32 %v1855_v41, %v4502_v6  ;;  %v1944_v61 = vpop.f32.mrf.mxu3 }
 0x324   :  { %v2036_v40 = vpop.f32.mrf.mxu0 }
 0x325   :  { %v1945_v11 = vadd.f32 %v1944_v61, %v1856_v60 }
 0x326   :  { %v2125_v29 = vpop.f32.mrf.mxu1 }
 0x327   :  { %2173 = vmatmul.bf16.gmra.mxu2 %v5043_v10  ;;  %2579 = vmatmul.bf16.gmra.mxu0 %v4441_v19  ;;  %v4669_v2 = vadd.f32 %v2033_v30, %v1945_v11  ;;  %v5045_v30 = vld [vmem:[#allocation70_spill] sm:$0xff] }
 0x328   :  { %2262 = vmatmul.bf16.gmra.mxu3 %v5044_v58  ;;  %v5046_v58 = vld [vmem:[#allocation73_spill] sm:$0xff] }
 0x32a   :  { %v1858_v45 = vpop.f32.mrf.mxu2 }
 0x32b   :  { %v1859_v42 = vadd.f32 %v1858_v45, %v4502_v6  ;;  %v1947_v57 = vpop.f32.mrf.mxu3 }
 0x32c   :  { %v2038_v19 = vpop.f32.mrf.mxu0 }
 0x32d   :  { %v1948_v50 = vadd.f32 %v1947_v57, %v1859_v42 }
 0x32f   :  { %v2037_v41 = vadd.f32 %v2036_v40, %v1948_v50 }
 0x331   :  { %v4673_v28 = vadd.f32 %v2125_v29, %v2037_v41 }
 0x332   :  { %v1860_v3 = vpop.f32.mrf.mxu2 }
 0x333   :  { %v1861_v60 = vadd.f32 %v1860_v3, %v4502_v6  ;;  %v1949_v61 = vpop.f32.mrf.mxu3 }
 0x335   :  { %v1950_v10 = vadd.f32 %v1949_v61, %v1861_v60  ;;  %v5047_v61 = vld [vmem:[#allocation75_spill] sm:$0xff] }
 0x337   :  { %2178 = vmatmul.bf16.gmra.mxu2 %v5045_v30  ;;  %2584 = vmatmul.bf16.gmra.mxu0 %v4449_v24  ;;  %v4678_v11 = vadd.f32 %v2038_v19, %v1950_v10  ;;  %v5048_v24 = vld [vmem:[#allocation77_spill] sm:$0xff] }
 0x338   :  { %2267 = vmatmul.bf16.gmra.mxu3 %v5046_v58 }
 0x33a   :  { %v2139_v45 = vpop.f32.mrf.mxu2 }
 0x33b   :  { %v2228_v42 = vpop.f32.mrf.mxu3  ;;  %v2140_v57 = vadd.f32 %v2139_v45, %v4509_v5 }
 0x33d   :  { %v2229_v50 = vadd.f32 %v2228_v42, %v2140_v57 }
 0x33f   :  { %v2309_v41 = vmax.f32 %v2229_v50, 0.0 }
 0x342   :  { %v2141_v40 = vpop.f32.mrf.mxu2 }
 0x343   :  { %v2142_v29 = vadd.f32 %v2141_v40, %v4515_v34  ;;  %v2230_v6 = vpop.f32.mrf.mxu3 }
 0x345   :  { %v2231_v3 = vadd.f32 %v2230_v6, %v2142_v29  ;;  %v5049_v29 = vld [vmem:[#allocation79_spill] sm:$0xff] }
 0x347   :  { %v2311_v60 = vmax.f32 %v2231_v3, 0.0  ;;  %2183 = vmatmul.bf16.gmra.mxu2 %v5047_v61  ;;  %2589 = vmatmul.bf16.gmra.mxu0 %v4457_v12  ;;  %v5050_v12 = vld [vmem:[#allocation80_spill] sm:$0xff] }
 0x348   :  { %2272 = vmatmul.bf16.gmra.mxu3 %v5048_v24 }
 0x349   :  { %v2373_v10 = vpack.c.bf16 %v2311_v60, %v2309_v41  ;;  %v4692_v60 = vpop.f32.mrf.mxu0 }
 0x34a   :  { %v2144_v19 = vpop.f32.mrf.mxu2 }
 0x34b   :  { %v2233_v30 = vpop.f32.mrf.mxu3  ;;  %2633 = vmatmul.bf16.vlgmr.msrb.gmra.mxu1 %v2373_v10  ;;  %v2145_v5 = vadd.f32 %v2144_v19, %v4519_v13 }
 0x34d   :  { %v2234_v45 = vadd.f32 %v2233_v30, %v2145_v5 }
 0x34f   :  { %v2313_v40 = vmax.f32 %v2234_v45, 0.0 }
 0x352   :  { %v2146_v58 = vpop.f32.mrf.mxu2 }
 0x353   :  { %v2147_v34 = vadd.f32 %v2146_v58, %v4525_v33  ;;  %v2235_v42 = vpop.f32.mrf.mxu3  ;;  %v5051_v58 = vld [vmem:[#allocation82_spill] sm:$0xff] }
 0x355   :  { %v2236_v57 = vadd.f32 %v2235_v42, %v2147_v34  ;;  %v4698_v42 = vpop.f32.mrf.mxu0 }
 0x357   :  { %v2315_v50 = vmax.f32 %v2236_v57, 0.0  ;;  %2188 = vmatmul.bf16.gmra.mxu2 %v5049_v29  ;;  %2594 = vmatmul.bf16.gmra.mxu0 %v4465_v14  ;;  %v5052_v14 = vld [vmem:[#allocation83_spill] sm:$0xff] }
 0x358   :  { %2277 = vmatmul.bf16.gmra.mxu3 %v5050_v12 }
 0x359   :  { %v2375_v6 = vpack.c.bf16 %v2315_v50, %v2313_v40 }
 0x35a   :  { %v2149_v3 = vpop.f32.mrf.mxu2 }
 0x35b   :  { %v2238_v41 = vpop.f32.mrf.mxu3  ;;  %2638 = vmatmul.bf16.gmra.mxu1 %v2375_v6  ;;  %v2150_v13 = vadd.f32 %v2149_v3, %v4529_v16 }
 0x35d   :  { %v2239_v33 = vadd.f32 %v2238_v41, %v2150_v13  ;;  %v4702_v12 = vpop.f32.mrf.mxu0  ;;  %v5053_v41 = vld [vmem:[#allocation85_spill] sm:$0xff]  ;;  %v5054_v13 = vld [vmem:[#allocation87_spill] sm:$0xff] }
 0x35f   :  { %v2317_v30 = vmax.f32 %v2239_v33, 0.0 }
 0x362   :  { %v2151_v61 = vpop.f32.mrf.mxu2 }
 0x363   :  { %v2152_v24 = vadd.f32 %v2151_v61, %v4535_v35  ;;  %v2240_v10 = vpop.f32.mrf.mxu3 }
 0x365   :  { %v2241_v19 = vadd.f32 %v2240_v10, %v2152_v24  ;;  %v2073_v10 = vadd.f32 %v4549_v43, %v4556_v1  ;;  %v2078_v1 = vadd.f32 %v4561_v0, %v4568_v23 }
 0x367   :  { %v2319_v5 = vmax.f32 %v2241_v19, 0.0  ;;  %2193 = vmatmul.bf16.gmra.mxu2 %v5051_v58  ;;  %2599 = vmatmul.bf16.gmra.mxu0 %v4473_v18 }
 0x368   :  { %2282 = vmatmul.bf16.gmra.mxu3 %v5052_v14 }
 0x369   :  { %v2377_v45 = vpack.c.bf16 %v2319_v5, %v2317_v30 }
 0x36a   :  { %v2154_v34 = vpop.f32.mrf.mxu2 }
 0x36b   :  { %v2243_v16 = vpop.f32.mrf.mxu3  ;;  %2643 = vmatmul.bf16.gmra.mxu1 %v2377_v45  ;;  %v2155_v57 = vadd.f32 %v2154_v34, %v4539_v53  ;;  %v4707_v53 = vpop.f32.mrf.mxu0  ;;  %v5055_v34 = vld [vmem:[#allocation90_spill] sm:$0xff] }
 0x36d   :  { %v2244_v35 = vadd.f32 %v2243_v16, %v2155_v57  ;;  %v5056_v16 = vld [vmem:[#allocation92_spill] sm:$0xff] }
 0x36f   :  { %v2321_v3 = vmax.f32 %v2244_v35, 0.0 }
 0x372   :  { %v2156_v40 = vpop.f32.mrf.mxu2 }
 0x373   :  { %v2157_v50 = vadd.f32 %v2156_v40, %v4545_v47  ;;  %v2245_v29 = vpop.f32.mrf.mxu3  ;;  %v4715_v57 = vpop.f32.mrf.mxu0 }
 0x375   :  { %v2246_v6 = vadd.f32 %v2245_v29, %v2157_v50 }
 0x377   :  { %v2323_v18 = vmax.f32 %v2246_v6, 0.0  ;;  %2198 = vmatmul.bf16.gmra.mxu2 %v5053_v41  ;;  %2604 = vmatmul.bf16.gmra.mxu0 %v4481_v32 }
 0x378   :  { %2287 = vmatmul.bf16.gmra.mxu3 %v5054_v13 }
 0x379   :  { %v2379_v61 = vpack.c.bf16 %v2323_v18, %v2321_v3 }
 0x37a   :  { %v2159_v33 = vpop.f32.mrf.mxu2 }
 0x37b   :  { %v2248_v24 = vpop.f32.mrf.mxu3  ;;  %2648 = vmatmul.bf16.gmra.mxu1 %v2379_v61  ;;  %v2160_v47 = vadd.f32 %v2159_v33, %v4551_v31  ;;  %v4720_v29 = vpop.f32.mrf.mxu0 }
 0x37d   :  { %v2249_v30 = vadd.f32 %v2248_v24, %v2160_v47  ;;  %v2083_v24 = vadd.f32 %v4573_v27, %v4580_v7  ;;  %v2088_v7 = vadd.f32 %v4585_v49, %v4592_v62  ;;  %v4746_v49 = vld [vmem:[%s4825_s4] ss:$0 sm:$0xff]  ;;  %s3974_s4 = smov [#allocation10]  }
 0x37e   :  { %s2750_s17 = sshll.u32 %s3974_s4, 4  ;;  %s2751_s17 = int_to_ptr.vmem [resolvable:$true] %s2750_s17 }
 0x37f   :  { %v2325_v45 = vmax.f32 %v2249_v30, 0.0 }
 0x382   :  { %v2161_v19 = vpop.f32.mrf.mxu2 }
 0x383   :  { %v2162_v5 = vadd.f32 %v2161_v19, %v2073_v10  ;;  %v2250_v58 = vpop.f32.mrf.mxu3  ;;  %v4725_v0 = vpop.f32.mrf.mxu0 }
 0x385   :  { %v2251_v14 = vadd.f32 %v2250_v58, %v2162_v5 }
 0x387   :  { %v2327_v32 = vmax.f32 %v2251_v14, 0.0  ;;  %2203 = vmatmul.bf16.gmra.mxu2 %v5055_v34  ;;  %2609 = vmatmul.bf16.gmra.mxu0 %v4489_v17 }
 0x388   :  { %2292 = vmatmul.bf16.gmra.mxu3 %v5056_v16 }
 0x389   :  { %v2381_v40 = vpack.c.bf16 %v2327_v32, %v2325_v45 }
 0x38a   :  { %v2164_v31 = vpop.f32.mrf.mxu2 }
 0x38b   :  { %v2253_v35 = vpop.f32.mrf.mxu3  ;;  %2653 = vmatmul.bf16.gmra.mxu1 %v2381_v40  ;;  %v2165_v43 = vadd.f32 %v2164_v31, %v4563_v38  ;;  %v4730_v5 = vpop.f32.mrf.mxu0 }
 0x38d   :  { %v2254_v6 = vadd.f32 %v2253_v35, %v2165_v43 }
 0x38f   :  { %v2329_v41 = vmax.f32 %v2254_v6, 0.0 }
 0x392   :  { %v2166_v50 = vpop.f32.mrf.mxu2 }
 0x393   :  { %v2167_v3 = vadd.f32 %v2166_v50, %v2078_v1  ;;  %v2255_v18 = vpop.f32.mrf.mxu3  ;;  %v4739_v1 = vpop.f32.mrf.mxu1 }
 0x395   :  { %v2256_v17 = vadd.f32 %v2255_v18, %v2167_v3 }
 0x397   :  { %v2331_v13 = vmax.f32 %v2256_v17, 0.0  ;;  %2208 = vmatmul.bf16.gmra.mxu2 %v4406_v48  ;;  %2614 = vmatmul.bf16.gmra.mxu0 %v4497_v51  ;;  %v2546_v17 = vadd.f32 %v4746_v49, %v4692_v60 }
 0x398   :  { %2297 = vmatmul.bf16.gmra.mxu3 %v4410_v9 }
 0x399   :  { %v2383_v61 = vpack.c.bf16 %v2331_v13, %v2329_v41 }
 0x39a   :  { %v2169_v38 = vpop.f32.mrf.mxu2 }
 0x39b   :  { %v2258_v33 = vpop.f32.mrf.mxu3  ;;  %2658 = vmatmul.bf16.gmra.mxu1 %v2383_v61  ;;  %v2170_v23 = vadd.f32 %v2169_v38, %v4575_v22 }
 0x39d   :  { %v2259_v10 = vadd.f32 %v2258_v33, %v2170_v23 }
 0x39f   :  { %v2333_v51 = vmax.f32 %v2259_v10, 0.0 }
 0x3a2   :  { %v2171_v47 = vpop.f32.mrf.mxu2 }
 0x3a3   :  { %v2172_v19 = vadd.f32 %v2171_v47, %v2083_v24  ;;  %v2260_v30 = vpop.f32.mrf.mxu3  ;;  %v2098_v47 = vadd.f32 %v4607_v21, %v4614_v55  ;;  %v2553_v55 = vadd.f32 %v4746_v49, %v4707_v53 }
 0x3a5   :  { %v2261_v48 = vadd.f32 %v2260_v30, %v2172_v19 }
 0x3a7   :  { %v2335_v9 = vmax.f32 %v2261_v48, 0.0  ;;  %2213 = vmatmul.bf16.gmra.mxu2 %v4422_v20  ;;  %2619 = vmatmul.bf16.gmra.mxu0 %v4507_v39 }
 0x3a8   :  { %2302 = vmatmul.bf16.gmra.mxu3 %v4426_v44 }
 0x3a9   :  { %v2385_v58 = vpack.c.bf16 %v2335_v9, %v2333_v51  ;;  %v4755_v9 = vpop.f32.mrf.mxu0 }
 0x3aa   :  { %v2174_v22 = vpop.f32.mrf.mxu2 }
 0x3ab   :  { %v2263_v14 = vpop.f32.mrf.mxu3  ;;  %2663 = vmatmul.bf16.gmra.mxu1 %v2385_v58  ;;  %v2175_v27 = vadd.f32 %v2174_v22, %v4587_v52  ;;  %v2093_v52 = vadd.f32 %v4596_v4, %v4603_v8  ;;  %v2548_v8 = vadd.f32 %v4746_v49, %v4698_v42  ;;  %v2551_v58 = vadd.f32 %v4746_v49, %v4702_v12 }
 0x3ac   :  { %v2103_v12 = vadd.f32 %v4618_v15, %v4625_v54  ;;  %v2558_v15 = vadd.f32 %v4746_v49, %v4720_v29 }
 0x3ad   :  { %v2264_v32 = vadd.f32 %v2263_v14, %v2175_v27 }
 0x3af   :  { %v2337_v31 = vmax.f32 %v2264_v32, 0.0 }
 0x3b1   :  { %v4762_v32 = vpop.f32.mrf.mxu0 }
 0x3b2   :  { %v2176_v45 = vpop.f32.mrf.mxu2 }
 0x3b3   :  { %v2177_v34 = vadd.f32 %v2176_v45, %v2088_v7  ;;  %v2265_v16 = vpop.f32.mrf.mxu3 }
 0x3b5   :  { %v2266_v40 = vadd.f32 %v2265_v16, %v2177_v34 }
 0x3b7   :  { %v2339_v20 = vmax.f32 %v2266_v40, 0.0 }
 0x3b9   :  { %v2387_v35 = vpack.c.bf16 %v2339_v20, %v2337_v31 }
 0x3ba   :  { %v2179_v39 = vpop.f32.mrf.mxu2 }
 0x3bb   :  { %v2268_v43 = vpop.f32.mrf.mxu3  ;;  %2668 = vmatmul.bf16.gmra.mxu1 %v2387_v35  ;;  %v2180_v44 = vadd.f32 %v2179_v39, %v4598_v25 }
 0x3bd   :  { %v2269_v62 = vadd.f32 %v2268_v43, %v2180_v44  ;;  %v2556_v43 = vadd.f32 %v4746_v49, %v4715_v57 }
 0x3bf   :  { %v2341_v41 = vmax.f32 %v2269_v62, 0.0  ;;  %v2570_v62 = vpop.f32.mrf.mxu0 }
 0x3c2   :  { %v2181_v50 = vpop.f32.mrf.mxu2 }
 0x3c3   :  { %v2182_v6 = vadd.f32 %v2181_v50, %v2093_v52  ;;  %v2270_v3 = vpop.f32.mrf.mxu3 }
 0x3c5   :  { %v2271_v18 = vadd.f32 %v2270_v3, %v2182_v6 }
 0x3c7   :  { %v2343_v25 = vmax.f32 %v2271_v18, 0.0 }
 0x3c8   :  { %v2634_v13 = vpop.f32.mrf.mxu1 }
 0x3c9   :  { %v2389_v61 = vpack.c.bf16 %v2343_v25, %v2341_v41  ;;  %v2635_v38 = vadd.f32 %v2634_v13, %v2546_v17  ;;  %v5057_v17 = vld [vmem:[#allocation25_spill] sm:$0xff]  ;;  %v5058_v41 = vld [vmem:[#allocation46_spill] sm:$0xff] }
 0x3ca   :  { %v2184_v33 = vpop.f32.mrf.mxu2  ;;  %v2108_v25 = vadd.f32 %v5058_v41, %v5057_v17 }
 0x3cb   :  { %2714 = vst [vmem:[#allocation10] sm:$0xff] %v2635_v38  ;;  %v2273_v4 = vpop.f32.mrf.mxu3  ;;  %2673 = vmatmul.bf16.gmra.mxu1 %v2389_v61  ;;  %v2185_v23 = vadd.f32 %v2184_v33, %v4609_v36 }
 0x3cd   :  { %v2274_v19 = vadd.f32 %v2273_v4, %v2185_v23  ;;  %v2572_v4 = vpop.f32.mrf.mxu0  ;;  %v2561_v23 = vadd.f32 %v4746_v49, %v4725_v0 }
 0x3cf   :  { %v2345_v22 = vmax.f32 %v2274_v19, 0.0 }
 0x3d0   :  { %v2636_v24 = vpop.f32.mrf.mxu1 }
 0x3d1   :  { %v2637_v10 = vadd.f32 %v2636_v24, %v2548_v8 }
 0x3d2   :  { %v2186_v60 = vpop.f32.mrf.mxu2 }
 0x3d3   :  { %2715 = vst [vmem:[#allocation10 + $0x8] sm:$0xff] %v2637_v10  ;;  %v2187_v30 = vadd.f32 %v2186_v60, %v2098_v47  ;;  %v2275_v48 = vpop.f32.mrf.mxu3 }
 0x3d5   :  { %v2276_v51 = vadd.f32 %v2275_v48, %v2187_v30  ;;  %v2575_v30 = vpop.f32.mrf.mxu0  ;;  %v2563_v48 = vadd.f32 %v4746_v49, %v4730_v5 }
 0x3d7   :  { %v2347_v42 = vmax.f32 %v2276_v51, 0.0 }
 0x3d8   :  { %v2639_v14 = vpop.f32.mrf.mxu1 }
 0x3d9   :  { %v2391_v36 = vpack.c.bf16 %v2347_v42, %v2345_v22  ;;  %v2640_v27 = vadd.f32 %v2639_v14, %v2551_v58  ;;  %v5059_v22 = vld [vmem:[#allocation48_spill] sm:$0xff] }
 0x3da   :  { %v2189_v7 = vpop.f32.mrf.mxu2  ;;  %v2113_v42 = vadd.f32 %v5059_v22, %v4647_v46  ;;  %v2568_v46 = vadd.f32 %v4746_v49, %v4762_v32 }
 0x3db   :  { %2716 = vst [vmem:[#allocation10 + $0x10] sm:$0xff] %v2640_v27  ;;  %v2278_v21 = vpop.f32.mrf.mxu3  ;;  %2678 = vmatmul.bf16.gmra.mxu1 %v2391_v36  ;;  %v2190_v45 = vadd.f32 %v2189_v7, %v4620_v56 }
 0x3dd   :  { %v2279_v31 = vadd.f32 %v2278_v21, %v2190_v45 }
 0x3df   :  { %v2349_v44 = vmax.f32 %v2279_v31, 0.0 }
 0x3e0   :  { %v2641_v34 = vpop.f32.mrf.mxu1 }
 0x3e1   :  { %v2642_v16 = vadd.f32 %v2641_v34, %v2553_v55  ;;  %v2566_v55 = vadd.f32 %v4746_v49, %v4755_v9 }
 0x3e2   :  { %v2191_v40 = vpop.f32.mrf.mxu2 }
 0x3e3   :  { %2717 = vst [vmem:[#allocation10 + $0x18] sm:$0xff] %v2642_v16  ;;  %v2192_v20 = vadd.f32 %v2191_v40, %v2103_v12  ;;  %v2280_v35 = vpop.f32.mrf.mxu3  ;;  %v2577_v12 = vpop.f32.mrf.mxu0 }
 0x3e5   :  { %v2281_v39 = vadd.f32 %v2280_v35, %v2192_v20 }
 0x3e7   :  { %v2351_v53 = vmax.f32 %v2281_v39, 0.0  ;;  %v5060_v39 = vld [vmem:[#allocation50_spill] sm:$0xff] }
 0x3e8   :  { %v2644_v52 = vpop.f32.mrf.mxu1 }
 0x3e9   :  { %v2393_v56 = vpack.c.bf16 %v2351_v53, %v2349_v44  ;;  %v2645_v50 = vadd.f32 %v2644_v52, %v2556_v43  ;;  %v2118_v43 = vadd.f32 %v5060_v39, %v4658_v59 }
 0x3ea   :  { %v2194_v6 = vpop.f32.mrf.mxu2 }
 0x3eb   :  { %2718 = vst [vmem:[#allocation10 + $0x20] sm:$0xff] %v2645_v50  ;;  %v2283_v3 = vpop.f32.mrf.mxu3  ;;  %2683 = vmatmul.bf16.gmra.mxu1 %v2393_v56  ;;  %v2195_v54 = vadd.f32 %v2194_v6, %v4631_v63  ;;  %v2580_v44 = vpop.f32.mrf.mxu0 }
 0x3ed   :  { %v2284_v61 = vadd.f32 %v2283_v3, %v2195_v54  ;;  %v2571_v3 = vadd.f32 %v4746_v49, %v2570_v62 }
 0x3ef   :  { %v2353_v24 = vmax.f32 %v2284_v61, 0.0 }
 0x3f0   :  { %v2646_v18 = vpop.f32.mrf.mxu1 }
 0x3f1   :  { %v2647_v57 = vadd.f32 %v2646_v18, %v2558_v15 }
 0x3f2   :  { %v2196_v13 = vpop.f32.mrf.mxu2 }
 0x3f3   :  { %2719 = vst [vmem:[#allocation10 + $0x28] sm:$0xff] %v2647_v57  ;;  %v2197_v38 = vadd.f32 %v2196_v13, %v2108_v25  ;;  %v2285_v33 = vpop.f32.mrf.mxu3  ;;  %v2582_v59 = vpop.f32.mrf.mxu0  ;;  %v2573_v25 = vadd.f32 %v4746_v49, %v2572_v4  ;;  %v5061_v57 = vld [vmem:[#allocation54_spill] sm:$0xff] }
 0x3f5   :  { %v2286_v8 = vadd.f32 %v2285_v33, %v2197_v38  ;;  %v5062_v38 = vld [vmem:[#allocation26_spill] sm:$0xff] }
 0x3f6   :  { %v2123_v33 = vadd.f32 %v5062_v38, %v4669_v2  ;;  %v2578_v2 = vadd.f32 %v4746_v49, %v2577_v12 }
 0x3f7   :  { %v2355_v47 = vmax.f32 %v2286_v8, 0.0 }
 0x3f8   :  { %v2649_v29 = vpop.f32.mrf.mxu1 }
 0x3f9   :  { %v2395_v10 = vpack.c.bf16 %v2355_v47, %v2353_v24  ;;  %v2650_v63 = vadd.f32 %v2649_v29, %v2561_v23 }
 0x3fa   :  { %v2199_v60 = vpop.f32.mrf.mxu2 }
 0x3fb   :  { %2720 = vst [vmem:[#allocation10 + $0x30] sm:$0xff] %v2650_v63  ;;  %v2288_v19 = vpop.f32.mrf.mxu3  ;;  %2688 = vmatmul.bf16.gmra.mxu1 %v2395_v10  ;;  %v2200_v51 = vadd.f32 %v2199_v60, %v4642_v26  ;;  %v2585_v10 = vpop.f32.mrf.mxu0  ;;  %v2576_v63 = vadd.f32 %v4746_v49, %v2575_v30 }
 0x3fd   :  { %v2289_v36 = vadd.f32 %v2288_v19, %v2200_v51 }
 0x3ff   :  { %v2357_v45 = vmax.f32 %v2289_v36, 0.0  ;;  %v2128_v36 = vadd.f32 %v4739_v1, %v4678_v11 }
 0x400   :  { %v2651_v58 = vpop.f32.mrf.mxu1 }
 0x401   :  { %v2652_v0 = vadd.f32 %v2651_v58, %v2563_v48 }
 0x402   :  { %v2201_v14 = vpop.f32.mrf.mxu2 }
 0x403   :  { %2721 = vst [vmem:[#allocation10 + $0x38] sm:$0xff] %v2652_v0  ;;  %v2202_v27 = vadd.f32 %v2201_v14, %v2113_v42  ;;  %v2290_v7 = vpop.f32.mrf.mxu3  ;;  %v2587_v0 = vpop.f32.mrf.mxu0 }
 0x405   :  { %v2291_v21 = vadd.f32 %v2290_v7, %v2202_v27 }
 0x407   :  { %v2359_v34 = vmax.f32 %v2291_v21, 0.0 }
 0x408   :  { %v2654_v5 = vpop.f32.mrf.mxu1 }
 0x409   :  { %v2397_v16 = vpack.c.bf16 %v2359_v34, %v2357_v45  ;;  %v2655_v26 = vadd.f32 %v2654_v5, %v2566_v55  ;;  %v2581_v34 = vadd.f32 %v4746_v49, %v2580_v44 }
 0x40a   :  { %v2204_v40 = vpop.f32.mrf.mxu2 }
 0x40b   :  { %2722 = vst [vmem:[#allocation10 + $0x40] sm:$0xff] %v2655_v26  ;;  %v2293_v31 = vpop.f32.mrf.mxu3  ;;  %2693 = vmatmul.bf16.gmra.mxu1 %v2397_v16  ;;  %v2205_v20 = vadd.f32 %v2204_v40, %v4653_v37 }
 0x40d   :  { %v2294_v52 = vadd.f32 %v2293_v31, %v2205_v20  ;;  %v2583_v31 = vadd.f32 %v4746_v49, %v2582_v59  ;;  %v2586_v20 = vadd.f32 %v4746_v49, %v2585_v10 }
 0x40f   :  { %v2361_v15 = vmax.f32 %v2294_v52, 0.0 }
 0x410   :  { %v2656_v35 = vpop.f32.mrf.mxu1 }
 0x411   :  { %v2657_v9 = vadd.f32 %v2656_v35, %v2568_v46 }
 0x412   :  { %v2206_v53 = vpop.f32.mrf.mxu2 }
 0x413   :  { %2723 = vst [vmem:[#allocation10 + $0x48] sm:$0xff] %v2657_v9  ;;  %v2207_v56 = vadd.f32 %v2206_v53, %v2118_v43  ;;  %v2295_v50 = vpop.f32.mrf.mxu3  ;;  %v2588_v9 = vadd.f32 %v4746_v49, %v2587_v0 }
 0x415   :  { %v2296_v6 = vadd.f32 %v2295_v50, %v2207_v56 }
 0x417   :  { %v2363_v54 = vmax.f32 %v2296_v6, 0.0 }
 0x418   :  { %v2659_v18 = vpop.f32.mrf.mxu1 }
 0x419   :  { %v2399_v32 = vpack.c.bf16 %v2363_v54, %v2361_v15  ;;  %v2660_v17 = vadd.f32 %v2659_v18, %v2571_v3 }
 0x41a   :  { %v2209_v37 = vpop.f32.mrf.mxu2 }
 0x41b   :  { %2724 = vst [vmem:[#allocation10 + $0x50] sm:$0xff] %v2660_v17  ;;  %v2298_v41 = vpop.f32.mrf.mxu3  ;;  %2698 = vmatmul.bf16.gmra.mxu1 %v2399_v32  ;;  %v2210_v13 = vadd.f32 %v2209_v37, %v5061_v57 }
 0x41d   :  { %v2299_v23 = vadd.f32 %v2298_v41, %v2210_v13 }
 0x41f   :  { %v2365_v60 = vmax.f32 %v2299_v23, 0.0 }
 0x420   :  { %v2661_v61 = vpop.f32.mrf.mxu1 }
 0x421   :  { %v2662_v8 = vadd.f32 %v2661_v61, %v2573_v25 }
 0x422   :  { %v2211_v62 = vpop.f32.mrf.mxu2 }
 0x423   :  { %2725 = vst [vmem:[#allocation10 + $0x58] sm:$0xff] %v2662_v8  ;;  %v2212_v24 = vadd.f32 %v2211_v62, %v2123_v33  ;;  %v2300_v47 = vpop.f32.mrf.mxu3 }
 0x425   :  { %v2301_v29 = vadd.f32 %v2300_v47, %v2212_v24 }
 0x427   :  { %v2367_v19 = vmax.f32 %v2301_v29, 0.0 }
 0x428   :  { %v2664_v48 = vpop.f32.mrf.mxu1 }
 0x429   :  { %v2401_v4 = vpack.c.bf16 %v2367_v19, %v2365_v60  ;;  %v2665_v51 = vadd.f32 %v2664_v48, %v2576_v63 }
 0x42a   :  { %v2214_v58 = vpop.f32.mrf.mxu2 }
 0x42b   :  { %2726 = vst [vmem:[#allocation10 + $0x60] sm:$0xff] %v2665_v51  ;;  %v2303_v22 = vpop.f32.mrf.mxu3  ;;  %2703 = vmatmul.bf16.gmra.mxu1 %v2401_v4  ;;  %v2215_v42 = vadd.f32 %v2214_v58, %v4673_v28  ;;  %v2590_v28 = vpop.f32.mrf.mxu0 }
 0x42c   :  { %v2591_v52 = vadd.f32 %v4746_v49, %v2590_v28 }
 0x42d   :  { %v2304_v7 = vadd.f32 %v2303_v22, %v2215_v42 }
 0x42f   :  { %v2369_v5 = vmax.f32 %v2304_v7, 0.0 }
 0x430   :  { %v2666_v14 = vpop.f32.mrf.mxu1 }
 0x431   :  { %v2667_v27 = vadd.f32 %v2666_v14, %v2578_v2 }
 0x432   :  { %v2216_v30 = vpop.f32.mrf.mxu2 }
 0x433   :  { %2727 = vst [vmem:[#allocation10 + $0x68] sm:$0xff] %v2667_v27  ;;  %v2217_v21 = vadd.f32 %v2216_v30, %v2128_v36  ;;  %v2305_v55 = vpop.f32.mrf.mxu3  ;;  %v2592_v46 = vpop.f32.mrf.mxu0 }
 0x434   :  { %v2593_v3 = vadd.f32 %v4746_v49, %v2592_v46 }
 0x435   :  { %v2306_v45 = vadd.f32 %v2305_v55, %v2217_v21 }
 0x437   :  { %v2371_v16 = vmax.f32 %v2306_v45, 0.0 }
 0x438   :  { %v2669_v26 = vpop.f32.mrf.mxu1 }
 0x439   :  { %v2403_v12 = vpack.c.bf16 %v2371_v16, %v2369_v5  ;;  %v2670_v40 = vadd.f32 %v2669_v26, %v2581_v34 }
 0x43b   :  { %2728 = vst [vmem:[#allocation10 + $0x70] sm:$0xff] %v2670_v40  ;;  %2708 = vmatmul.bf16.gmra.mxu1 %v2403_v12  ;;  %v2595_v43 = vpop.f32.mrf.mxu0 }
 0x43c   :  { %v2596_v32 = vadd.f32 %v4746_v49, %v2595_v43 }
 0x440   :  { %v2671_v11 = vpop.f32.mrf.mxu1 }
 0x441   :  { %v2672_v1 = vadd.f32 %v2671_v11, %v2583_v31 }
 0x443   :  { %2729 = vst [vmem:[#allocation10 + $0x78] sm:$0xff] %v2672_v1  ;;  %v2597_v56 = vpop.f32.mrf.mxu0 }
 0x444   :  { %v2598_v59 = vadd.f32 %v4746_v49, %v2597_v56 }
 0x448   :  { %v2674_v35 = vpop.f32.mrf.mxu1 }
 0x449   :  { %v2675_v39 = vadd.f32 %v2674_v35, %v2586_v20 }
 0x44b   :  { %2730 = vst [vmem:[#allocation10 + $0x80] sm:$0xff] %v2675_v39  ;;  %v2600_v18 = vpop.f32.mrf.mxu0 }
 0x44c   :  { %v2601_v61 = vadd.f32 %v4746_v49, %v2600_v18 }
 0x450   :  { %v2676_v44 = vpop.f32.mrf.mxu1 }
 0x451   :  { %v2677_v53 = vadd.f32 %v2676_v44, %v2588_v9 }
 0x453   :  { %2731 = vst [vmem:[#allocation10 + $0x88] sm:$0xff] %v2677_v53  ;;  %v2602_v41 = vpop.f32.mrf.mxu0 }
 0x454   :  { %v2603_v8 = vadd.f32 %v4746_v49, %v2602_v41 }
 0x458   :  { %v2679_v50 = vpop.f32.mrf.mxu1 }
 0x459   :  { %v2680_v6 = vadd.f32 %v2679_v50, %v2591_v52 }
 0x45b   :  { %2732 = vst [vmem:[#allocation10 + $0x90] sm:$0xff] %v2680_v6  ;;  %v2605_v13 = vpop.f32.mrf.mxu0 }
 0x45c   :  { %v2606_v47 = vadd.f32 %v4746_v49, %v2605_v13 }
 0x460   :  { %v2681_v15 = vpop.f32.mrf.mxu1 }
 0x461   :  { %v2682_v54 = vadd.f32 %v2681_v15, %v2593_v3 }
 0x463   :  { %2733 = vst [vmem:[#allocation10 + $0x98] sm:$0xff] %v2682_v54  ;;  %v2607_v62 = vpop.f32.mrf.mxu0 }
 0x464   :  { %v2608_v60 = vadd.f32 %v4746_v49, %v2607_v62 }
 0x468   :  { %v2684_v17 = vpop.f32.mrf.mxu1 }
 0x469   :  { %v2685_v37 = vadd.f32 %v2684_v17, %v2596_v32 }
 0x46b   :  { %2734 = vst [vmem:[#allocation10 + $0xa0] sm:$0xff] %v2685_v37  ;;  %v2610_v63 = vpop.f32.mrf.mxu0 }
 0x46c   :  { %v2611_v51 = vadd.f32 %v4746_v49, %v2610_v63 }
 0x470   :  { %v2686_v25 = vpop.f32.mrf.mxu1 }
 0x471   :  { %v2687_v57 = vadd.f32 %v2686_v25, %v2598_v59 }
 0x473   :  { %2735 = vst [vmem:[#allocation10 + $0xa8] sm:$0xff] %v2687_v57  ;;  %v2612_v4 = vpop.f32.mrf.mxu0 }
 0x474   :  { %v2613_v42 = vadd.f32 %v4746_v49, %v2612_v4 }
 0x478   :  { %v2689_v38 = vpop.f32.mrf.mxu1 }
 0x479   :  { %v2690_v33 = vadd.f32 %v2689_v38, %v2601_v61 }
 0x47b   :  { %2736 = vst [vmem:[#allocation10 + $0xb0] sm:$0xff] %v2690_v33  ;;  %v2615_v2 = vpop.f32.mrf.mxu0 }
 0x47c   :  { %v2616_v36 = vadd.f32 %v4746_v49, %v2615_v2 }
 0x480   :  { %v2691_v23 = vpop.f32.mrf.mxu1 }
 0x481   :  { %v2692_v24 = vadd.f32 %v2691_v23, %v2603_v8 }
 0x483   :  { %2737 = vst [vmem:[#allocation10 + $0xb8] sm:$0xff] %v2692_v24  ;;  %v2617_v27 = vpop.f32.mrf.mxu0 }
 0x484   :  { %v2618_v21 = vadd.f32 %v4746_v49, %v2617_v27 }
 0x488   :  { %v2694_v29 = vpop.f32.mrf.mxu1 }
 0x489   :  { %v2695_v10 = vadd.f32 %v2694_v29, %v2606_v47 }
 0x48b   :  { %2738 = vst [vmem:[#allocation10 + $0xc0] sm:$0xff] %v2695_v10  ;;  %v2620_v34 = vpop.f32.mrf.mxu0 }
 0x48c   :  { %v2621_v5 = vadd.f32 %v4746_v49, %v2620_v34 }
 0x490   :  { %v2696_v19 = vpop.f32.mrf.mxu1 }
 0x491   :  { %v2697_v48 = vadd.f32 %v2696_v19, %v2608_v60 }
 0x493   :  { %2739 = vst [vmem:[#allocation10 + $0xc8] sm:$0xff] %v2697_v48  ;;  %v2622_v12 = vpop.f32.mrf.mxu0 }
 0x494   :  { %v2623_v40 = vadd.f32 %v4746_v49, %v2622_v12 }
 0x498   :  { %v2699_v58 = vpop.f32.mrf.mxu1 }
 0x499   :  { %v2700_v22 = vadd.f32 %v2699_v58, %v2611_v51 }
 0x49b   :  { %2740 = vst [vmem:[#allocation10 + $0xd0] sm:$0xff] %v2700_v22 }
 0x4a0   :  { %v2701_v0 = vpop.f32.mrf.mxu1 }
 0x4a1   :  { %v2702_v14 = vadd.f32 %v2701_v0, %v2613_v42 }
 0x4a3   :  { %2741 = vst [vmem:[#allocation10 + $0xd8] sm:$0xff] %v2702_v14 }
 0x4a8   :  { %v2704_v30 = vpop.f32.mrf.mxu1 }
 0x4a9   :  { %v2705_v7 = vadd.f32 %v2704_v30, %v2616_v36 }
 0x4ab   :  { %2742 = vst [vmem:[#allocation10 + $0xe0] sm:$0xff] %v2705_v7 }
 0x4b0   :  { %v2706_v55 = vpop.f32.mrf.mxu1 }
 0x4b1   :  { %v2707_v45 = vadd.f32 %v2706_v55, %v2618_v21 }
 0x4b3   :  { %2743 = vst [vmem:[#allocation10 + $0xe8] sm:$0xff] %v2707_v45 }
 0x4b8   :  { %v2709_v16 = vpop.f32.mrf.mxu1 }
 0x4b9   :  { %v2710_v26 = vadd.f32 %v2709_v16, %v2621_v5 }
 0x4bb   :  { %2744 = vst [vmem:[#allocation10 + $0xf0] sm:$0xff] %v2710_v26 }
 0x4c0   :  { %v2711_v28 = vpop.f32.mrf.mxu1 }
 0x4c1   :  { %v2712_v31 = vadd.f32 %v2711_v28, %v2623_v40 }
 0x4c3   :  { %2745 = vst [vmem:[#allocation10 + $0xf8] sm:$0xff] %v2712_v31 }
 0x4c4   :  { %2758 = dma.vmem_to_hbm [thread:$0]  %s2751_s17, 4096, %s2753_s20, [#allocation4], %s3965_s26, %s3965_s26, %s3966_s27  }
 0x4c5   :  { %3962 = dma.done.wait [#allocation4], 4096  }
 0x4c6   :  { %3963 = vsyncadd [#allocation4], 4294963200 }
 0x4c7   :  { %2763 = vsyncpa [#allocation3], 1 }
 0x4c8   :  { %2764 = vsyncpa [#allocation6], 1 }
 0x4c9   :  { %2765 = vsyncpa [#allocation9], 1 }
 0x4ca   :  { %2766 = vsyncpa [#allocation4], 1 }

</bundles_post_ra>
